<compile_context>
chip_gen: v7x
topology: tpu7x:2x2x1
jax: 0.10.0
libtpu: 0.0.40
codegen_flags: <defaults>
</compile_context>

<pallas_src>
import functools
import math

import numpy as np
import jax
import jax.numpy as jnp
from jax.experimental import pallas as pl
from jax.experimental.pallas import tpu as pltpu

LN_EPS = 1e-5


def _gelu_exact(v):
    # PyTorch nn.GELU() default = exact erf GELU.
    return 0.5 * v * (1.0 + jax.lax.erf(v * (1.0 / math.sqrt(2.0))))


def _ln_gelu(h, w, b, mask, n_valid):
    """LayerNorm over all *valid* (non-guard) elements of h, then exact GELU.

    h, w, b: (C, HWP) in guard-padded layout; w/b are zero on guard lanes so guard
    lanes come out exactly zero (required by the next conv's boundary behaviour).
    mask: (1, HWP) with 1.0 on valid lanes.
    """
    inv_n = 1.0 / float(n_valid)
    h = h * mask                        # kill roll/matmul garbage on guard lanes
    mu = jnp.sum(h) * inv_n
    d = (h - mu) * mask
    var = jnp.sum(d * d) * inv_n
    y = d * jax.lax.rsqrt(var + LN_EPS) * w + b
    return _gelu_exact(y)


def _conv3x3(x, w_mat, row_stride):
    """3x3 'same' conv on guard-padded, spatially-flattened activations.

    x: (C_in, HWP), zero guard ring, lane index q = (y+1)*row_stride + (x+1).
    w_mat: (C_out, 9*C_in) with columns ordered (ky, kx, c) row-major.
    Each tap is one lane roll (guard ring supplies zero padding); the 9 taps are
    stacked along sublanes and consumed by a single MXU matmul.
    """
    hwp = x.shape[-1]
    taps = []
    for dy in (-1, 0, 1):
        for dx in (-1, 0, 1):
            d = dy * row_stride + dx
            if d == 0:
                taps.append(x)
            else:
                # shifted[:, q] = x[:, q + d]  (== jnp.roll(x, -d, axis=1));
                # wrapped lanes only ever land on guard positions (masked later).
                taps.append(pltpu.roll(x, (-d) % hwp, 1))
    stacked = jnp.concatenate(taps, axis=0)                 # (9*C_in, HWP)
    return jnp.dot(w_mat, stacked, preferred_element_type=jnp.float32)


def up_kernel(x1_ref, x2_ref, up_ref, w1_ref, ln1w_ref, ln1b_ref,
              w2_ref, ln2w_ref, ln2b_ref, mask_ref, out_ref,
              *, row_stride, n_content):
    mask = mask_ref[...]                                    # (1, HWP)
    x1 = x1_ref[0]                                          # (C1, H1*W1)
    x2 = x2_ref[0]                                          # (C2, HWP), guard ring is zero

    # nn.Upsample(scale_factor=2, bilinear, align_corners=True) + F.pad,
    # folded into one MXU matmul against the precomputed operator.
    x1u = jnp.dot(x1, up_ref[...], preferred_element_type=jnp.float32)  # (C1, HWP)

    # torch.cat([x2, x1], dim=1)  (8-sublane aligned concat)
    h = jnp.concatenate([x2, x1u], axis=0)                  # (C_in, HWP)

    # DoubleConv: (Conv3x3 -> LayerNorm([C,30,30]) -> GELU) * 2
    h = _conv3x3(h, w1_ref[...], row_stride)
    h = _ln_gelu(h, ln1w_ref[...], ln1b_ref[...], mask, n_content * w1_ref.shape[0])
    h = _conv3x3(h, w2_ref[...], row_stride)
    h = _ln_gelu(h, ln2w_ref[...], ln2b_ref[...], mask, n_content * w2_ref.shape[0])

    out_ref[0] = h.astype(out_ref.dtype)


# ---------------------------------------------------------------------------
# One-time parameter preparation (hoisted out of the per-call path per review)
# ---------------------------------------------------------------------------

def _interp_matrix(out_size, in_size):
    """PyTorch Upsample(mode='bilinear', align_corners=True) weights, (out, in)."""
    U = np.zeros((out_size, in_size), np.float32)
    if in_size == 1 or out_size == 1:
        U[:, 0] = 1.0
        return U
    scale = (in_size - 1) / (out_size - 1)
    for r in range(out_size):
        src = r * scale
        lo = min(int(np.floor(src)), in_size - 2)
        frac = src - lo
        U[r, lo] += 1.0 - frac
        U[r, lo + 1] += frac
    return U


def prepare_up_params(params, x1_hw, x2_hw):
    """Build the upsample+pad operator, fused conv weight matrices, guard-embedded
    LayerNorm params and the valid-lane mask.  Called once, not per forward."""
    H1, W1 = x1_hw
    H2, W2 = x2_hw
    Hu, Wu = 2 * H1, 2 * W1                      # nn.Upsample(scale_factor=2)
    diffY, diffX = H2 - Hu, W2 - Wu
    assert diffY >= 0 and diffX >= 0
    pad_t, pad_l = diffY // 2, diffX // 2
    row = W2 + 2                                 # guard columns left/right
    hwp = (H2 + 2) * row                         # 32 * 32 = 1024 for 30x30

    w1 = np.asarray(params["w1"], np.float32)    # (C_mid, C_in, 3, 3)
    w2 = np.asarray(params["w2"], np.float32)    # (C_out, C_mid, 3, 3)
    c_mid, c_in = w1.shape[0], w1.shape[1]
    c_out = w2.shape[0]

    def conv_mat(w):                             # (co, ci, 3, 3) -> (co, 9*ci), (ky,kx,c) order
        co, ci, kh, kw = w.shape
        return np.ascontiguousarray(
            np.transpose(w, (2, 3, 1, 0)).reshape(kh * kw * ci, co).T)

    def embed(p):                                # (C, H2, W2) -> (C, HWP), zero guards
        p = np.asarray(p, np.float32)
        out = np.zeros((p.shape[0], H2 + 2, row), np.float32)
        out[:, 1:H2 + 1, 1:W2 + 1] = p
        return out.reshape(p.shape[0], hwp)

    # bilinear (align_corners=True) upsample + F.pad as one (H1*W1, HWP) operator
    Uy = _interp_matrix(Hu, H1)
    Ux = _interp_matrix(Wu, W1)
    up_op = np.zeros((H1 * W1, hwp), np.float32)
    for r in range(Hu):
        for s in range(Wu):
            q = (r + pad_t + 1) * row + (s + pad_l + 1)
            up_op[:, q] = np.outer(Uy[r], Ux[s]).reshape(-1)

    mask = np.zeros((1, H2 + 2, row), np.float32)
    mask[:, 1:H2 + 1, 1:W2 + 1] = 1.0

    return dict(
        up_op=jnp.asarray(up_op),
        w1_mat=jnp.asarray(conv_mat(w1)),
        ln1_w=jnp.asarray(embed(params["ln1_w"])),
        ln1_b=jnp.asarray(embed(params["ln1_b"])),
        w2_mat=jnp.asarray(conv_mat(w2)),
        ln2_w=jnp.asarray(embed(params["ln2_w"])),
        ln2_b=jnp.asarray(embed(params["ln2_b"])),
        mask=jnp.asarray(mask.reshape(1, hwp)),
        dims=dict(H1=H1, W1=W1, H2=H2, W2=W2, row=row, hwp=hwp,
                  c_in=c_in, c_mid=c_mid, c_out=c_out),
    )


# ---------------------------------------------------------------------------
# Per-call forward wrapper
# ---------------------------------------------------------------------------

def up_forward_pallas(x1, x2, prep):
    d = prep["dims"]
    B, C1 = x1.shape[0], x1.shape[1]
    C2 = x2.shape[1]
    H1, W1, H2, W2 = d["H1"], d["W1"], d["H2"], d["W2"]
    row, hwp = d["row"], d["hwp"]
    c_in, c_mid, c_out = d["c_in"], d["c_mid"], d["c_out"]
    assert x1.shape[2:] == (H1, W1) and x2.shape[2:] == (H2, W2)
    assert C1 + C2 == c_in

    # Cheap per-call glue only: contiguous reshapes + one zero pad (guard ring).
    x1_flat = x1.reshape(B, C1, H1 * W1).astype(jnp.float32)
    x2_pad = jnp.pad(x2.astype(jnp.float32),
                     ((0, 0), (0, 0), (1, 1), (1, 1))).reshape(B, C2, hwp)

    kernel = functools.partial(up_kernel, row_stride=row, n_content=H2 * W2)
    full = lambda shape: pl.BlockSpec(shape, lambda b, _s=shape: (0,) * len(_s))

    out = pl.pallas_call(
        kernel,
        out_shape=jax.ShapeDtypeStruct((B, c_out, hwp), jnp.float32),
        grid_spec=pltpu.PrefetchScalarGridSpec(
            num_scalar_prefetch=0,
            grid=(B,),
            in_specs=[
                pl.BlockSpec((1, C1, H1 * W1), lambda b: (b, 0, 0)),   # x1 (flattened)
                pl.BlockSpec((1, C2, hwp), lambda b: (b, 0, 0)),       # x2 (guard padded)
                full((H1 * W1, hwp)),                                  # upsample+pad operator
                full((c_mid, 9 * c_in)),                               # conv1 weight matrix
                full((c_mid, hwp)),                                    # LN1 weight (embedded)
                full((c_mid, hwp)),                                    # LN1 bias
                full((c_out, 9 * c_mid)),                              # conv2 weight matrix
                full((c_out, hwp)),                                    # LN2 weight
                full((c_out, hwp)),                                    # LN2 bias
                full((1, hwp)),                                        # valid-lane mask
            ],
            out_specs=pl.BlockSpec((1, c_out, hwp), lambda b: (b, 0, 0)),
        ),
        compiler_params=pltpu.CompilerParams(
            dimension_semantics=("parallel",),
        ),
    )(x1_flat, x2_pad, prep["up_op"], prep["w1_mat"], prep["ln1_w"],
      prep["ln1_b"], prep["w2_mat"], prep["ln2_w"], prep["ln2_b"], prep["mask"])

    # strip the guard ring: (B, C_out, HWP) -> (B, C_out, H2, W2)
    return out.reshape(B, c_out, H2 + 2, row)[:, :, 1:H2 + 1, 1:W2 + 1]


# ---------------------------------------------------------------------------
# Plain-JAX reference (mirrors the PyTorch Up module)
# ---------------------------------------------------------------------------

def _bilinear_upsample_ac(x, oh, ow):
    B, C, H, W = x.shape

    def grid(o, n):
        if n == 1 or o == 1:
            lo = jnp.zeros((o,), jnp.int32)
            return lo, lo, jnp.zeros((o,), jnp.float32)
        src = jnp.arange(o, dtype=jnp.float32) * ((n - 1) / (o - 1))
        lo = jnp.clip(jnp.floor(src).astype(jnp.int32), 0, n - 2)
        return lo, lo + 1, src - lo.astype(jnp.float32)

    y0, y1, fy = grid(oh, H)
    x0, x1, fx = grid(ow, W)
    a = (x[:, :, y0, :] * (1.0 - fy)[None, None, :, None]
         + x[:, :, y1, :] * fy[None, None, :, None])
    return (a[:, :, :, x0] * (1.0 - fx)[None, None, None, :]
            + a[:, :, :, x1] * fx[None, None, None, :])


def up_reference(x1, x2, params):
    H1, W1 = x1.shape[2], x1.shape[3]
    H2, W2 = x2.shape[2], x2.shape[3]
    x1u = _bilinear_upsample_ac(x1, 2 * H1, 2 * W1)
    dY, dX = H2 - 2 * H1, W2 - 2 * W1
    x1u = jnp.pad(x1u, ((0, 0), (0, 0),
                        (dY // 2, dY - dY // 2), (dX // 2, dX - dX // 2)))
    h = jnp.concatenate([x2, x1u], axis=1)

    def block(h, w, lnw, lnb):
        h = jax.lax.conv_general_dilated(
            h, w, (1, 1), "SAME",
            dimension_numbers=("NCHW", "OIHW", "NCHW"),
            precision=jax.lax.Precision.HIGHEST)
        mu = jnp.mean(h, axis=(1, 2, 3), keepdims=True)
        var = jnp.mean((h - mu) ** 2, axis=(1, 2, 3), keepdims=True)
        h = (h - mu) / jnp.sqrt(var + LN_EPS) * lnw[None] + lnb[None]
        return jax.nn.gelu(h, approximate=False)

    h = block(h, params["w1"], params["ln1_w"], params["ln1_b"])
    return block(h, params["w2"], params["ln2_w"], params["ln2_b"])


if __name__ == "__main__":
    # Up(in_channels=16, out_channels=16, bilinear=True):
    #   x1: (B, 8, 15, 15) -> upsampled to 30x30;  x2: (B, 8, 30, 30)
    #   DoubleConv(16 -> 16, mid=8) with LayerNorm([*, 30, 30]) (spatial fixed by module).
    B, C1, C2 = 2, 8, 8
    H1 = W1 = 15
    H2 = W2 = 30
    C_in, C_mid, C_out = C1 + C2, (C1 + C2) // 2, 16

    keys = jax.random.split(jax.random.PRNGKey(0), 8)
    params = {
        "w1": 0.2 * jax.random.normal(keys[0], (C_mid, C_in, 3, 3), jnp.float32),
        "ln1_w": 1.0 + 0.1 * jax.random.normal(keys[1], (C_mid, H2, W2), jnp.float32),
        "ln1_b": 0.05 * jax.random.normal(keys[2], (C_mid, H2, W2), jnp.float32),
        "w2": 0.2 * jax.random.normal(keys[3], (C_out, C_mid, 3, 3), jnp.float32),
        "ln2_w": 1.0 + 0.1 * jax.random.normal(keys[4], (C_out, H2, W2), jnp.float32),
        "ln2_b": 0.05 * jax.random.normal(keys[5], (C_out, H2, W2), jnp.float32),
    }
    x1 = jax.random.normal(keys[6], (B, C1, H1, W1), jnp.float32)
    x2 = jax.random.normal(keys[7], (B, C2, H2, W2), jnp.float32)

    prep = prepare_up_params(params, (H1, W1), (H2, W2))   # one-time prep

    out = up_forward_pallas(x1, x2, prep)
    out = jax.block_until_ready(out)
    assert out.shape == (B, C_out, H2, W2)

    ref = up_reference(x1, x2, params)
    err = float(jnp.max(jnp.abs(out - ref)))
    assert err < 2e-3, f"mismatch vs reference: max abs err = {err}"

    print("KERNEL_OK")
</pallas_src>

<mosaic_0001>
module attributes {stable_mosaic.version = 11 : i64} {
  func.func @up_kernel(%arg0: i32, %arg1: memref<1x8x225xf32, #tpu.memory_space<vmem>>, %arg2: memref<1x8x1024xf32, #tpu.memory_space<vmem>>, %arg3: memref<225x1024xf32, #tpu.memory_space<vmem>>, %arg4: memref<8x144xf32, #tpu.memory_space<vmem>>, %arg5: memref<8x1024xf32, #tpu.memory_space<vmem>>, %arg6: memref<8x1024xf32, #tpu.memory_space<vmem>>, %arg7: memref<16x72xf32, #tpu.memory_space<vmem>>, %arg8: memref<16x1024xf32, #tpu.memory_space<vmem>>, %arg9: memref<16x1024xf32, #tpu.memory_space<vmem>>, %arg10: memref<1x1024xf32, #tpu.memory_space<vmem>>, %arg11: memref<1x16x1024xf32, #tpu.memory_space<vmem>>) attributes {dimension_semantics = [#tpu.dimension_semantics<parallel>], iteration_bounds = array<i64: 2>, scalar_prefetch = 0 : i64, scratch_operands = 0 : i64, tpu.core_type = #tpu.core_type<tc>, window_params = [{transform_indices = @transform_0, window_bounds = array<i64: 1, 8, 225>}, {transform_indices = @transform_1, window_bounds = array<i64: 1, 8, 1024>}, {pipeline_mode = #tpu.pipeline_mode<synchronous>, transform_indices = @transform_2, window_bounds = array<i64: 225, 1024>}, {pipeline_mode = #tpu.pipeline_mode<synchronous>, transform_indices = @transform_3, window_bounds = array<i64: 8, 144>}, {pipeline_mode = #tpu.pipeline_mode<synchronous>, transform_indices = @transform_4, window_bounds = array<i64: 8, 1024>}, {pipeline_mode = #tpu.pipeline_mode<synchronous>, transform_indices = @transform_5, window_bounds = array<i64: 8, 1024>}, {pipeline_mode = #tpu.pipeline_mode<synchronous>, transform_indices = @transform_6, window_bounds = array<i64: 16, 72>}, {pipeline_mode = #tpu.pipeline_mode<synchronous>, transform_indices = @transform_7, window_bounds = array<i64: 16, 1024>}, {pipeline_mode = #tpu.pipeline_mode<synchronous>, transform_indices = @transform_8, window_bounds = array<i64: 16, 1024>}, {pipeline_mode = #tpu.pipeline_mode<synchronous>, transform_indices = @transform_9, window_bounds = array<i64: 1, 1024>}, {transform_indices = @transform_10, window_bounds = array<i64: 1, 16, 1024>}]} {
    %c0 = arith.constant 0 : index
    %c0_0 = arith.constant 0 : index
    %0 = vector.load %arg10[%c0, %c0_0] : memref<1x1024xf32, #tpu.memory_space<vmem>>, vector<1x1024xf32>
    %c0_1 = arith.constant 0 : index
    %c0_2 = arith.constant 0 : index
    %c0_3 = arith.constant 0 : index
    %1 = vector.load %arg1[%c0_1, %c0_2, %c0_3] : memref<1x8x225xf32, #tpu.memory_space<vmem>>, vector<1x8x225xf32>
    %2 = vector.shape_cast %1 : vector<1x8x225xf32> to vector<8x225xf32>
    %c0_4 = arith.constant 0 : index
    %c0_5 = arith.constant 0 : index
    %c0_6 = arith.constant 0 : index
    %3 = vector.load %arg2[%c0_4, %c0_5, %c0_6] : memref<1x8x1024xf32, #tpu.memory_space<vmem>>, vector<1x8x1024xf32>
    %4 = vector.shape_cast %3 : vector<1x8x1024xf32> to vector<8x1024xf32>
    %c0_7 = arith.constant 0 : index
    %c0_8 = arith.constant 0 : index
    %5 = vector.load %arg3[%c0_7, %c0_8] : memref<225x1024xf32, #tpu.memory_space<vmem>>, vector<225x1024xf32>
    %cst = arith.constant dense<0.000000e+00> : vector<8x1024xf32>
    %6 = tpu.matmul %2, %5, %cst {dimension_numbers = #tpu.dot_dimension_numbers<[1], [0], [0], [1], [0, 0, 1, 1], [], []>} : vector<8x225xf32>, vector<225x1024xf32>, vector<8x1024xf32> -> vector<8x1024xf32>
    %7 = tpu.concatenate %4, %6 in 0 : vector<8x1024xf32>, vector<8x1024xf32> -> vector<16x1024xf32>
    %c0_9 = arith.constant 0 : index
    %c0_10 = arith.constant 0 : index
    %8 = vector.load %arg4[%c0_9, %c0_10] : memref<8x144xf32, #tpu.memory_space<vmem>>, vector<8x144xf32>
    %c33_i32 = arith.constant 33 : i32
    %9 = tpu.dynamic_rotate %7 by %c33_i32 dim 1 : vector<16x1024xf32>, i32 -> vector<16x1024xf32>
    %c32_i32 = arith.constant 32 : i32
    %10 = tpu.dynamic_rotate %7 by %c32_i32 dim 1 : vector<16x1024xf32>, i32 -> vector<16x1024xf32>
    %c31_i32 = arith.constant 31 : i32
    %11 = tpu.dynamic_rotate %7 by %c31_i32 dim 1 : vector<16x1024xf32>, i32 -> vector<16x1024xf32>
    %c1_i32 = arith.constant 1 : i32
    %12 = tpu.dynamic_rotate %7 by %c1_i32 dim 1 : vector<16x1024xf32>, i32 -> vector<16x1024xf32>
    %c1023_i32 = arith.constant 1023 : i32
    %13 = tpu.dynamic_rotate %7 by %c1023_i32 dim 1 : vector<16x1024xf32>, i32 -> vector<16x1024xf32>
    %c993_i32 = arith.constant 993 : i32
    %14 = tpu.dynamic_rotate %7 by %c993_i32 dim 1 : vector<16x1024xf32>, i32 -> vector<16x1024xf32>
    %c992_i32 = arith.constant 992 : i32
    %15 = tpu.dynamic_rotate %7 by %c992_i32 dim 1 : vector<16x1024xf32>, i32 -> vector<16x1024xf32>
    %c991_i32 = arith.constant 991 : i32
    %16 = tpu.dynamic_rotate %7 by %c991_i32 dim 1 : vector<16x1024xf32>, i32 -> vector<16x1024xf32>
    %17 = tpu.concatenate %9, %10, %11, %12, %7, %13, %14, %15, %16 in 0 : vector<16x1024xf32>, vector<16x1024xf32>, vector<16x1024xf32>, vector<16x1024xf32>, vector<16x1024xf32>, vector<16x1024xf32>, vector<16x1024xf32>, vector<16x1024xf32>, vector<16x1024xf32> -> vector<144x1024xf32>
    %cst_11 = arith.constant dense<0.000000e+00> : vector<8x1024xf32>
    %18 = tpu.matmul %8, %17, %cst_11 {dimension_numbers = #tpu.dot_dimension_numbers<[1], [0], [0], [1], [0, 0, 1, 1], [], []>} : vector<8x144xf32>, vector<144x1024xf32>, vector<8x1024xf32> -> vector<8x1024xf32>
    %c0_12 = arith.constant 0 : index
    %c0_13 = arith.constant 0 : index
    %19 = vector.load %arg5[%c0_12, %c0_13] : memref<8x1024xf32, #tpu.memory_space<vmem>>, vector<8x1024xf32>
    %c0_14 = arith.constant 0 : index
    %c0_15 = arith.constant 0 : index
    %20 = vector.load %arg6[%c0_14, %c0_15] : memref<8x1024xf32, #tpu.memory_space<vmem>>, vector<8x1024xf32>
    %21 = vector.broadcast %0 : vector<1x1024xf32> to vector<8x1024xf32>
    %22 = arith.mulf %18, %21 : vector<8x1024xf32>
    %23 = vector.shape_cast %22 : vector<8x1024xf32> to vector<1x8x1024xf32>
    %cst_16 = arith.constant dense<0.000000e+00> : vector<1xf32>
    %24 = vector.multi_reduction <add>, %23, %cst_16 [1, 2] : vector<1x8x1024xf32> to vector<1xf32>
    %25 = vector.shape_cast %24 : vector<1xf32> to vector<1x1x1xf32>
    %26 = vector.extract %25[0, 0, 0] : f32 from vector<1x1x1xf32>
    %cst_17 = arith.constant 1.38888892E-4 : f32
    %27 = arith.mulf %26, %cst_17 : f32
    %28 = vector.broadcast %27 : f32 to vector<8x1024xf32>
    %29 = arith.subf %22, %28 : vector<8x1024xf32>
    %30 = vector.broadcast %0 : vector<1x1024xf32> to vector<8x1024xf32>
    %31 = arith.mulf %29, %30 : vector<8x1024xf32>
    %32 = arith.mulf %31, %31 : vector<8x1024xf32>
    %33 = vector.shape_cast %32 : vector<8x1024xf32> to vector<1x8x1024xf32>
    %cst_18 = arith.constant dense<0.000000e+00> : vector<1xf32>
    %34 = vector.multi_reduction <add>, %33, %cst_18 [1, 2] : vector<1x8x1024xf32> to vector<1xf32>
    %35 = vector.shape_cast %34 : vector<1xf32> to vector<1x1x1xf32>
    %36 = vector.extract %35[0, 0, 0] : f32 from vector<1x1x1xf32>
    %cst_19 = arith.constant 1.38888892E-4 : f32
    %37 = arith.mulf %36, %cst_19 : f32
    %cst_20 = arith.constant 9.99999974E-6 : f32
    %38 = arith.addf %37, %cst_20 : f32
    %39 = math.rsqrt %38 : f32
    %40 = vector.broadcast %39 : f32 to vector<8x1024xf32>
    %41 = arith.mulf %31, %40 : vector<8x1024xf32>
    %42 = arith.mulf %41, %19 : vector<8x1024xf32>
    %43 = arith.addf %42, %20 : vector<8x1024xf32>
    %cst_21 = arith.constant 5.000000e-01 : f32
    %44 = vector.broadcast %cst_21 : f32 to vector<8x1024xf32>
    %45 = arith.mulf %44, %43 : vector<8x1024xf32>
    %cst_22 = arith.constant 0.707106769 : f32
    %46 = vector.broadcast %cst_22 : f32 to vector<8x1024xf32>
    %47 = arith.mulf %43, %46 : vector<8x1024xf32>
    %48 = math.erf %47 : vector<8x1024xf32>
    %cst_23 = arith.constant 1.000000e+00 : f32
    %49 = vector.broadcast %cst_23 : f32 to vector<8x1024xf32>
    %50 = arith.addf %49, %48 : vector<8x1024xf32>
    %51 = arith.mulf %45, %50 : vector<8x1024xf32>
    %c0_24 = arith.constant 0 : index
    %c0_25 = arith.constant 0 : index
    %52 = vector.load %arg7[%c0_24, %c0_25] : memref<16x72xf32, #tpu.memory_space<vmem>>, vector<16x72xf32>
    %c33_i32_26 = arith.constant 33 : i32
    %53 = tpu.dynamic_rotate %51 by %c33_i32_26 dim 1 : vector<8x1024xf32>, i32 -> vector<8x1024xf32>
    %c32_i32_27 = arith.constant 32 : i32
    %54 = tpu.dynamic_rotate %51 by %c32_i32_27 dim 1 : vector<8x1024xf32>, i32 -> vector<8x1024xf32>
    %c31_i32_28 = arith.constant 31 : i32
    %55 = tpu.dynamic_rotate %51 by %c31_i32_28 dim 1 : vector<8x1024xf32>, i32 -> vector<8x1024xf32>
    %c1_i32_29 = arith.constant 1 : i32
    %56 = tpu.dynamic_rotate %51 by %c1_i32_29 dim 1 : vector<8x1024xf32>, i32 -> vector<8x1024xf32>
    %c1023_i32_30 = arith.constant 1023 : i32
    %57 = tpu.dynamic_rotate %51 by %c1023_i32_30 dim 1 : vector<8x1024xf32>, i32 -> vector<8x1024xf32>
    %c993_i32_31 = arith.constant 993 : i32
    %58 = tpu.dynamic_rotate %51 by %c993_i32_31 dim 1 : vector<8x1024xf32>, i32 -> vector<8x1024xf32>
    %c992_i32_32 = arith.constant 992 : i32
    %59 = tpu.dynamic_rotate %51 by %c992_i32_32 dim 1 : vector<8x1024xf32>, i32 -> vector<8x1024xf32>
    %c991_i32_33 = arith.constant 991 : i32
    %60 = tpu.dynamic_rotate %51 by %c991_i32_33 dim 1 : vector<8x1024xf32>, i32 -> vector<8x1024xf32>
    %61 = tpu.concatenate %53, %54, %55, %56, %51, %57, %58, %59, %60 in 0 : vector<8x1024xf32>, vector<8x1024xf32>, vector<8x1024xf32>, vector<8x1024xf32>, vector<8x1024xf32>, vector<8x1024xf32>, vector<8x1024xf32>, vector<8x1024xf32>, vector<8x1024xf32> -> vector<72x1024xf32>
    %cst_34 = arith.constant dense<0.000000e+00> : vector<16x1024xf32>
    %62 = tpu.matmul %52, %61, %cst_34 {dimension_numbers = #tpu.dot_dimension_numbers<[1], [0], [0], [1], [0, 0, 1, 1], [], []>} : vector<16x72xf32>, vector<72x1024xf32>, vector<16x1024xf32> -> vector<16x1024xf32>
    %c0_35 = arith.constant 0 : index
    %c0_36 = arith.constant 0 : index
    %63 = vector.load %arg8[%c0_35, %c0_36] : memref<16x1024xf32, #tpu.memory_space<vmem>>, vector<16x1024xf32>
    %c0_37 = arith.constant 0 : index
    %c0_38 = arith.constant 0 : index
    %64 = vector.load %arg9[%c0_37, %c0_38] : memref<16x1024xf32, #tpu.memory_space<vmem>>, vector<16x1024xf32>
    %65 = vector.broadcast %0 : vector<1x1024xf32> to vector<16x1024xf32>
    %66 = arith.mulf %62, %65 : vector<16x1024xf32>
    %67 = vector.shape_cast %66 : vector<16x1024xf32> to vector<1x16x1024xf32>
    %cst_39 = arith.constant dense<0.000000e+00> : vector<1xf32>
    %68 = vector.multi_reduction <add>, %67, %cst_39 [1, 2] : vector<1x16x1024xf32> to vector<1xf32>
    %69 = vector.shape_cast %68 : vector<1xf32> to vector<1x1x1xf32>
    %70 = vector.extract %69[0, 0, 0] : f32 from vector<1x1x1xf32>
    %cst_40 = arith.constant 6.94444461E-5 : f32
    %71 = arith.mulf %70, %cst_40 : f32
    %72 = vector.broadcast %71 : f32 to vector<16x1024xf32>
    %73 = arith.subf %66, %72 : vector<16x1024xf32>
    %74 = vector.broadcast %0 : vector<1x1024xf32> to vector<16x1024xf32>
    %75 = arith.mulf %73, %74 : vector<16x1024xf32>
    %76 = arith.mulf %75, %75 : vector<16x1024xf32>
    %77 = vector.shape_cast %76 : vector<16x1024xf32> to vector<1x16x1024xf32>
    %cst_41 = arith.constant dense<0.000000e+00> : vector<1xf32>
    %78 = vector.multi_reduction <add>, %77, %cst_41 [1, 2] : vector<1x16x1024xf32> to vector<1xf32>
    %79 = vector.shape_cast %78 : vector<1xf32> to vector<1x1x1xf32>
    %80 = vector.extract %79[0, 0, 0] : f32 from vector<1x1x1xf32>
    %cst_42 = arith.constant 6.94444461E-5 : f32
    %81 = arith.mulf %80, %cst_42 : f32
    %cst_43 = arith.constant 9.99999974E-6 : f32
    %82 = arith.addf %81, %cst_43 : f32
    %83 = math.rsqrt %82 : f32
    %84 = vector.broadcast %83 : f32 to vector<16x1024xf32>
    %85 = arith.mulf %75, %84 : vector<16x1024xf32>
    %86 = arith.mulf %85, %63 : vector<16x1024xf32>
    %87 = arith.addf %86, %64 : vector<16x1024xf32>
    %cst_44 = arith.constant 5.000000e-01 : f32
    %88 = vector.broadcast %cst_44 : f32 to vector<16x1024xf32>
    %89 = arith.mulf %88, %87 : vector<16x1024xf32>
    %cst_45 = arith.constant 0.707106769 : f32
    %90 = vector.broadcast %cst_45 : f32 to vector<16x1024xf32>
    %91 = arith.mulf %87, %90 : vector<16x1024xf32>
    %92 = math.erf %91 : vector<16x1024xf32>
    %cst_46 = arith.constant 1.000000e+00 : f32
    %93 = vector.broadcast %cst_46 : f32 to vector<16x1024xf32>
    %94 = arith.addf %93, %92 : vector<16x1024xf32>
    %95 = arith.mulf %89, %94 : vector<16x1024xf32>
    %c0_47 = arith.constant 0 : index
    %c0_48 = arith.constant 0 : index
    %c0_49 = arith.constant 0 : index
    %96 = vector.load %arg11[%c0_47, %c0_48, %c0_49] : memref<1x16x1024xf32, #tpu.memory_space<vmem>>, vector<1x16x1024xf32>
    %97 = vector.shape_cast %96 : vector<1x16x1024xf32> to vector<16x1024xf32>
    %98 = vector.shape_cast %95 : vector<16x1024xf32> to vector<1x16x1024xf32>
    tpu.vector_store %arg11[%c0_47, %c0_48, %c0_49], %98 {strides = array<i32>} : memref<1x16x1024xf32, #tpu.memory_space<vmem>>, vector<1x16x1024xf32>,
    return
  }
  func.func @transform_0(%arg0: i32) -> (i32, i32, i32) {
    %c0_i32 = arith.constant 0 : i32
    %c0_i32_0 = arith.constant 0 : i32
    %c0_i32_1 = arith.constant 0 : i32
    return %arg0, %c0_i32, %c0_i32_0 : i32, i32, i32
  }
  func.func @transform_1(%arg0: i32) -> (i32, i32, i32) {
    %c0_i32 = arith.constant 0 : i32
    %c0_i32_0 = arith.constant 0 : i32
    %c0_i32_1 = arith.constant 0 : i32
    return %arg0, %c0_i32, %c0_i32_0 : i32, i32, i32
  }
  func.func @transform_2(%arg0: i32) -> (i32, i32) {
    %c0_i32 = arith.constant 0 : i32
    %c0_i32_0 = arith.constant 0 : i32
    %c0_i32_1 = arith.constant 0 : i32
    return %c0_i32, %c0_i32_0 : i32, i32
  }
  func.func @transform_3(%arg0: i32) -> (i32, i32) {
    %c0_i32 = arith.constant 0 : i32
    %c0_i32_0 = arith.constant 0 : i32
    %c0_i32_1 = arith.constant 0 : i32
    return %c0_i32, %c0_i32_0 : i32, i32
  }
  func.func @transform_4(%arg0: i32) -> (i32, i32) {
    %c0_i32 = arith.constant 0 : i32
    %c0_i32_0 = arith.constant 0 : i32
    %c0_i32_1 = arith.constant 0 : i32
    return %c0_i32, %c0_i32_0 : i32, i32
  }
  func.func @transform_5(%arg0: i32) -> (i32, i32) {
    %c0_i32 = arith.constant 0 : i32
    %c0_i32_0 = arith.constant 0 : i32
    %c0_i32_1 = arith.constant 0 : i32
    return %c0_i32, %c0_i32_0 : i32, i32
  }
  func.func @transform_6(%arg0: i32) -> (i32, i32) {
    %c0_i32 = arith.constant 0 : i32
    %c0_i32_0 = arith.constant 0 : i32
    %c0_i32_1 = arith.constant 0 : i32
    return %c0_i32, %c0_i32_0 : i32, i32
  }
  func.func @transform_7(%arg0: i32) -> (i32, i32) {
    %c0_i32 = arith.constant 0 : i32
    %c0_i32_0 = arith.constant 0 : i32
    %c0_i32_1 = arith.constant 0 : i32
    return %c0_i32, %c0_i32_0 : i32, i32
  }
  func.func @transform_8(%arg0: i32) -> (i32, i32) {
    %c0_i32 = arith.constant 0 : i32
    %c0_i32_0 = arith.constant 0 : i32
    %c0_i32_1 = arith.constant 0 : i32
    return %c0_i32, %c0_i32_0 : i32, i32
  }
  func.func @transform_9(%arg0: i32) -> (i32, i32) {
    %c0_i32 = arith.constant 0 : i32
    %c0_i32_0 = arith.constant 0 : i32
    %c0_i32_1 = arith.constant 0 : i32
    return %c0_i32, %c0_i32_0 : i32, i32
  }
  func.func @transform_10(%arg0: i32) -> (i32, i32, i32) {
    %c0_i32 = arith.constant 0 : i32
    %c0_i32_0 = arith.constant 0 : i32
    %c0_i32_1 = arith.constant 0 : i32
    return %arg0, %c0_i32, %c0_i32_0 : i32, i32, i32
  }
}

</mosaic_0001>

<bundles_post_ra>
// kernel: tpu_custom_call.1
= control target key start
LH: loop header
LB: loop body
LE: loop exit
PB: predicated region body
PF: predicated region fallthrough
CT: control target
= control target key end

     0   :  { %s6337_s0 = inlined_call_operand.hbm [shape: f32[2,8,225], index: 0, kind: input, shape index: {}]   ;;  %s6338_s1 = inlined_call_operand.hbm [shape: f32[2,8,1024], index: 1, kind: input, shape index: {}]   ;;  %s6339_s2 = inlined_call_operand.hbm [shape: f32[225,1024], index: 2, kind: input, shape index: {}]   ;;  %s6340_s3 = inlined_call_operand.hbm [shape: f32[8,144], index: 3, kind: input, shape index: {}]   ;;  %s6341_s4 = inlined_call_operand.hbm [shape: f32[8,1024], index: 4, kind: input, shape index: {}]   ;;  %s6342_s5 = inlined_call_operand.hbm [shape: f32[8,1024], index: 5, kind: input, shape index: {}]   ;;  %s6343_s6 = inlined_call_operand.vmem [shape: f32[16,72], index: 6, kind: input, shape index: {}]   ;;  %s6344_s7 = inlined_call_operand.hbm [shape: f32[16,1024], index: 7, kind: input, shape index: {}]   ;;  %s6345_s8 = inlined_call_operand.hbm [shape: f32[16,1024], index: 8, kind: input, shape index: {}]   ;;  %s6346_s9 = inlined_call_operand.vmem [shape: f32[1,1024], index: 9, kind: input, shape index: {}]   ;;  %s6347_s10 = inlined_call_operand.hbm [shape: f32[2,16,1024], index: 10, kind: output, shape index: {}]  }
   0x1   :  { %6387 = sst [smem:[#allocation24_spill]] %s6337_s0 }
   0x2   :  { %6388 = sst [smem:[#allocation25_spill]] %s6339_s2 }
   0x3   :  { %6389 = sst [smem:[#allocation26_spill]] %s6340_s3 }
   0x4   :  { %6390 = sst [smem:[#allocation27_spill]] %s6341_s4 }
   0x5   :  { %6391 = sst [smem:[#allocation28_spill]] %s6343_s6 }
   0x6   :  { %6392 = sst [smem:[#allocation29_spill]] %s6347_s10 }
   0x7   :  { %15 = vsyncpa [#allocation3], 0 }
   0x8   :  { %17 = vsyncpa [#allocation3 + $0x1], 0 }
   0x9   :  { %18 = vsyncpa [#allocation6], 0 }
   0xa   :  { %20 = vsyncpa [#allocation6 + $0x1], 0 }
   0xb   :  { %21 = vsyncpa [#allocation9], 0 }
   0xc   :  { %22 = vsyncpa [#allocation12], 0 }
   0xd   :  { %23 = vsyncpa [#allocation15], 0 }
   0xe   :  { %24 = vsyncpa [#allocation4], 0 }
   0xf   :  { %26 = vsyncpa [#allocation4 + $0x1], 0  ;;  %s4416_s13 = smov 0   ;;  %s4418_s14 = smov 0  }
  0x10   :  { %s4420_s15 = smov 0   ;;  %s4422_s16 = smov 0  }
  0x11 LB: > { %s4339_s17 = smov [#allocation7]   ;;  %s4437_s19 = sadd.s32 4294967295, %s4337_s16   ;;  %s4337_s16 = sphi %s4422_s16, %s6464_s16   ;;  %s4333_s15 = sphi %s4420_s15, %s6463_s15   ;;  %s4329_s14 = sphi %s4418_s14, %s6462_s14   ;;  %s4325_s13 = sphi %s4416_s13, %s6461_s13  }
  0x12   : > { %s295_s18 = sshll.u32 %s4339_s17, 4  ;;  %p2901_p0 = scmp.ge.s32.totalorder %s4337_s16, 1  ;;  %s4442_s18 = int_to_ptr.vmem [resolvable:$true] %s295_s18 }
  0x13   : > { %p6352_p1 = scmp.eq.s32.totalorder %s4437_s19, 0  ;;  %p283_p2 = scmp.lt.s32.totalorder %s4337_s16, 3 }
  0x14   : > { %s4340_s21 = smov [#allocation8]   ;;  %s4341_s24 = smov [#allocation11]  }
  0x15   : > { %p4444_p3 = pnand %p2901_p0, %p283_p2  ;;  %s309_s22 = sshll.u32 %s4340_s21, 4  ;;  %s4457_s22 = int_to_ptr.vmem [resolvable:$true] %s309_s22 }
  0x16   : > { %s331_s25 = sshll.u32 %s4341_s24, 4  ;;  %s6395_s2 = sld [smem:[#allocation25_spill]]  ;;  %s4459_s25 = int_to_ptr.vmem [resolvable:$true] %s331_s25 }
  0x17   : > { %s6393_s20 = scalar_select %p4444_p3, 1, 0 }
  0x18   : > { %p3431_p5 = pneg %p4444_p3 }
  0x1a   : > { %p4453_p6 = pnand %p3431_p5, %p6352_p1 }
  0x1c   : > { %s4023_s28 = scalar_lea.hbm %s6395_s2, 29696  ;;  %p4469_p8 = pneg %p4453_p6 }
  0x1d   : > { %p4024_p7 = scmp.ne.s32.totalorder %s6395_s2, %s4023_s28  ;;  %p4030_p11 = scmp.lt.u32.totalorder %s4023_s28, %s6395_s2 }
  0x1f   : > { %p4026_p9 = pnand %p4469_p8, %p4024_p7 }
  0x21   : > { %p4027_p10 = pneg %p4026_p9 }
  0x23   : > { %p4032_p12 = pnand %p4030_p11, %p4027_p10 }
  0x25   : > { %4035 = shalt.err (!%p4032_p12)
}
  0x26   : > { %s4036_s21 = scalar_lea.vmem %s4442_s18, 29696  ;;  %p4044_p5 = scmp.lt.s32.totalorder %s4442_s18, %s4442_s18 }
  0x27   : > { %p4037_p13 = scmp.ne.s32.totalorder %s4442_s18, %s4036_s21  ;;  %p4045_p4 = scmp.lt.s32.totalorder %s4036_s21, %s4036_s21 }
  0x29   : > { %p4039_p0 = pnand %p4037_p13, %p4469_p8  ;;  %p4046_p7 = por %p4045_p4, %p4044_p5 }
  0x2b   : > { %p4040_p2 = pneg %p4039_p0 }
  0x2d   : > { %p4047_p9 = pnand %p4046_p7, %p4040_p2 }
  0x2f   : > { %4050 = shalt.err (!%p4047_p9)
}
  0x30   : > { %s6350_s24 = smov 1024   ;;  %s4343_s26 = smov 64  }
  0x31   : > { %3434 = dma.hbm_to_vmem [thread:$0]  (!%p4453_p6), %s6395_s2, 29696, %s4442_s18, [#allocation6], %s6350_s24, %s6350_s24, %s4343_s26  }
  0x32   : > { %s6397_s3 = sld [smem:[#allocation26_spill]] }
  0x38   : > { %s4051_s12 = scalar_lea.hbm %s6397_s3, 256 }
  0x39   : > { %p4052_p4 = scmp.ne.s32.totalorder %s6397_s3, %s4051_s12  ;;  %p4058_p12 = scmp.lt.u32.totalorder %s4051_s12, %s6397_s3 }
  0x3b   : > { %p4054_p10 = pnand %p4052_p4, %p4469_p8 }
  0x3d   : > { %p4055_p11 = pneg %p4054_p10 }
  0x3f   : > { %p4060_p13 = pnand %p4058_p12, %p4055_p11 }
  0x41   : > { %4063 = shalt.err (!%p4060_p13)
}
  0x42   : > { %s4064_s18 = scalar_lea.vmem %s4457_s22, 256  ;;  %p4072_p7 = scmp.lt.s32.totalorder %s4457_s22, %s4457_s22 }
  0x43   : > { %p4065_p0 = scmp.ne.s32.totalorder %s4457_s22, %s4064_s18  ;;  %p4073_p9 = scmp.lt.s32.totalorder %s4064_s18, %s4064_s18 }
  0x45   : > { %p4067_p2 = pnand %p4065_p0, %p4469_p8  ;;  %p4074_p4 = por %p4073_p9, %p4072_p7 }
  0x47   : > { %p4068_p5 = pneg %p4067_p2 }
  0x49   : > { %p4075_p10 = pnand %p4074_p4, %p4068_p5 }
  0x4b   : > { %4078 = shalt.err (!%p4075_p10)
}
  0x4c   : > { %3437 = dma.hbm_to_vmem [thread:$0]  (!%p4453_p6), %s6397_s3, 256, %s4457_s22, [#allocation9]  }
  0x4d   : > { %s4079_s29 = scalar_lea.hbm %s6342_s5, 1024 }
  0x4e   : > { %p4080_p11 = scmp.ne.s32.totalorder %s6342_s5, %s4079_s29  ;;  %p4086_p0 = scmp.lt.u32.totalorder %s4079_s29, %s6342_s5 }
  0x50   : > { %p4082_p12 = pnand %p4080_p11, %p4469_p8 }
  0x52   : > { %p4083_p13 = pneg %p4082_p12 }
  0x54   : > { %p4088_p2 = pnand %p4086_p0, %p4083_p13 }
  0x56   : > { %4091 = shalt.err (!%p4088_p2)
}
  0x57   : > { %s4092_s22 = scalar_lea.vmem %s4459_s25, 1024  ;;  %p4100_p4 = scmp.lt.s32.totalorder %s4459_s25, %s4459_s25 }
  0x58   : > { %p4093_p5 = scmp.ne.s32.totalorder %s4459_s25, %s4092_s22  ;;  %p4101_p10 = scmp.lt.s32.totalorder %s4092_s22, %s4092_s22 }
  0x5a   : > { %p4095_p7 = pnand %p4093_p5, %p4469_p8  ;;  %p4102_p11 = por %p4101_p10, %p4100_p4 }
  0x5c   : > { %p4096_p9 = pneg %p4095_p7 }
  0x5e   : > { %p4103_p12 = pnand %p4102_p11, %p4096_p9 }
  0x60   : > { %4106 = shalt.err (!%p4103_p12)
}
  0x61   : > { %3443 = dma.hbm_to_vmem [thread:$0]  (!%p4453_p6), %s6342_s5, 1024, %s4459_s25, [#allocation12]  }
  0x62   : > { %s4344_s10 = smov [#allocation10]   ;;  %s4345_s28 = smov [#allocation13]  }
  0x63   : > { %s320_s27 = sshll.u32 %s4344_s10, 4  ;;  %s344_s29 = sshll.u32 %s4345_s28, 4  ;;  %s321_s27 = int_to_ptr.vmem [resolvable:$true] %s320_s27  ;;  %s345_s29 = int_to_ptr.vmem [resolvable:$true] %s344_s29 }
  0x64   : > { %s6398_s4 = sld [smem:[#allocation27_spill]] }
  0x6a   : > { %s4107_s17 = scalar_lea.hbm %s6398_s4, 1024 }
  0x6b   : > { %p4108_p13 = scmp.ne.s32.totalorder %s6398_s4, %s4107_s17  ;;  %p4114_p5 = scmp.lt.u32.totalorder %s4107_s17, %s6398_s4 }
  0x6d   : > { %p4110_p0 = pnand %p4108_p13, %p4469_p8 }
  0x6f   : > { %p4111_p2 = pneg %p4110_p0 }
  0x71   : > { %p4116_p7 = pnand %p4114_p5, %p4111_p2 }
  0x73   : > { %4119 = shalt.err (!%p4116_p7)
}
  0x74   : > { %s4120_s25 = scalar_lea.vmem %s321_s27, 1024  ;;  %p4128_p11 = scmp.lt.s32.totalorder %s321_s27, %s321_s27 }
  0x75   : > { %p4121_p9 = scmp.ne.s32.totalorder %s321_s27, %s4120_s25  ;;  %p4129_p12 = scmp.lt.s32.totalorder %s4120_s25, %s4120_s25 }
  0x77   : > { %p4123_p4 = pnand %p4121_p9, %p4469_p8  ;;  %p4130_p1 = por %p4129_p12, %p4128_p11 }
  0x79   : > { %p4124_p10 = pneg %p4123_p4 }
  0x7b   : > { %p4131_p3 = pnand %p4130_p1, %p4124_p10 }
  0x7d   : > { %4134 = shalt.err (!%p4131_p3)
}
  0x7e   : > { %3440 = dma.hbm_to_vmem [thread:$0]  (!%p4453_p6), %s6398_s4, 1024, %s321_s27, [#allocation9]  }
  0x7f   : > { %s4135_s30 = scalar_lea.hbm %s6344_s7, 2048 }
  0x80   : > { %p4136_p13 = scmp.ne.s32.totalorder %s6344_s7, %s4135_s30  ;;  %p4142_p3 = scmp.lt.u32.totalorder %s4135_s30, %s6344_s7 }
  0x82   : > { %p4138_p0 = pnand %p4136_p13, %p4469_p8 }
  0x84   : > { %p4139_p1 = pneg %p4138_p0 }
  0x86   : > { %p4144_p2 = pnand %p4142_p3, %p4139_p1 }
  0x88   : > { %4147 = shalt.err (!%p4144_p2)
}
  0x89   : > { %s4148_s18 = scalar_lea.vmem %s345_s29, 2048  ;;  %p4156_p4 = scmp.lt.s32.totalorder %s345_s29, %s345_s29 }
  0x8a   : > { %p4149_p5 = scmp.ne.s32.totalorder %s345_s29, %s4148_s18  ;;  %p4157_p10 = scmp.lt.s32.totalorder %s4148_s18, %s4148_s18 }
  0x8c   : > { %p4151_p7 = pnand %p4149_p5, %p4469_p8  ;;  %p4158_p11 = por %p4157_p10, %p4156_p4 }
  0x8e   : > { %p4152_p9 = pneg %p4151_p7 }
  0x90   : > { %p4159_p12 = pnand %p4158_p11, %p4152_p9 }
  0x92   : > { %4162 = shalt.err (!%p4159_p12)
}
  0x93   : > { %s6399_s27 = smov 1024   ;;  %s4346_s10 = smov [#allocation14]  }
  0x94   : > { %3446 = dma.hbm_to_vmem [thread:$0]  (!%p4453_p6), %s6344_s7, 2048, %s345_s29, [#allocation12], %s6399_s27, %s6399_s27, %s4343_s26  }
  0x95   : > { %s357_s24 = sshll.u32 %s4346_s10, 4  ;;  %s4163_s12 = scalar_lea.hbm %s6345_s8, 2048  ;;  %s358_s24 = int_to_ptr.vmem [resolvable:$true] %s357_s24 }
  0x96   : > { %p4164_p13 = scmp.ne.s32.totalorder %s6345_s8, %s4163_s12  ;;  %p4170_p3 = scmp.lt.u32.totalorder %s4163_s12, %s6345_s8 }
  0x98   : > { %p4166_p0 = pnand %p4164_p13, %p4469_p8 }
  0x9a   : > { %p4167_p1 = pneg %p4166_p0 }
  0x9c   : > { %p4172_p2 = pnand %p4170_p3, %p4167_p1 }
  0x9e   : > { %4175 = shalt.err (!%p4172_p2)
}
  0x9f   : > { %s4176_s29 = scalar_lea.vmem %s358_s24, 2048  ;;  %p4184_p4 = scmp.lt.s32.totalorder %s358_s24, %s358_s24 }
  0xa0   : > { %p4177_p5 = scmp.ne.s32.totalorder %s358_s24, %s4176_s29  ;;  %p4185_p10 = scmp.lt.s32.totalorder %s4176_s29, %s4176_s29 }
  0xa2   : > { %p4179_p7 = pnand %p4177_p5, %p4469_p8  ;;  %p4186_p11 = por %p4185_p10, %p4184_p4 }
  0xa4   : > { %p4180_p9 = pneg %p4179_p7 }
  0xa6   : > { %p4187_p12 = pnand %p4186_p11, %p4180_p9 }
  0xa8   : > { %4190 = shalt.err (!%p4187_p12)
}
  0xa9   : > { %3449 = dma.hbm_to_vmem [thread:$0]  (!%p4453_p6), %s6345_s8, 2048, %s358_s24, [#allocation15], %s6399_s27, %s6399_s27, %s4343_s26  }
  0xaa   : > { %s2900_s23 = sadd.s32 4294967294, %s4337_s16   ;;  %s4601_s11 = sadd.s32 1, %s4337_s16  }
  0xab   : > { %s36_s10 = ssub.s32 %s4337_s16, %s4601_s11  ;;  %s39_s28 = sadd.s32 1, %s4333_s15 }
  0xac   : > { %p37_p8 = scmp.eq.s32.totalorder %s36_s10, 0  ;;  %p46_p13 = scmp.ne.s32.totalorder %s4333_s15, %s4329_s14 }
  0xad   : > { %p47_p0 = scmp.eq.s32.totalorder %s4337_s16, 0  ;;  %p52_p1 = scmp.ne.s32.totalorder %s4329_s14, %s4325_s13 }
  0xae   : > { %s4612_s30 = scalar_select %p37_p8, %s4333_s15, %s39_s28  }
  0xaf   : > { %p4614_p3 = por %p47_p0, %p46_p13  ;;  %p6401_p2 = scmp.eq.s32.totalorder %s4437_s19, 0 }
  0xb0   : > { %p270_p5 = scmp.eq.s32.totalorder %s4437_s19, 1  ;;  %p276_p7 = scmp.eq.s32.totalorder %s2900_s23, 1 }
  0xb1   : > { %p4620_p6 = por %p6401_p2, %p52_p1  ;;  %p3467_p9 = scmp.lt.s32.totalorder %s4337_s16, 2 }
  0xb2   : > { %s4627_s27 = sand.u32 1, %s4333_s15   ;;  %p4629_p4 = por %p270_p5, %p46_p13 }
  0xb3   : > { %s6402_s26 = scalar_select %p4620_p6, 1, 0 }
  0xb4   : > { %s6403_s24 = scalar_select %p4629_p4, 1, 0 }
  0xb5   : > { %p4633_p10 = por %p276_p7, %p52_p1  ;;  %s2909_s21 = sshll.u32 %s4627_s27, 4 }
  0xb6   : > { %s2954_s22 = sshll.u32 %s4337_s16, 8  ;;  %s6405_s0 = sld [smem:[#allocation24_spill]] }
  0xb7   : > { %s6404_s17 = scalar_select %p4633_p10, 1, 0 }
  0xb8   : > { %s378_s6 = scalar_lea.vmem [#allocation2], %s2909_s21  ;;  %p4648_p11 = pnand %p3467_p9, %p4614_p3 }
  0xb9   : > { %s386_s23 = sshll.u32 %s378_s6, 4  ;;  %s2912_s2 = sshll.u32 %s4627_s27, 6  ;;  %s4644_s23 = int_to_ptr.vmem [resolvable:$true] %s386_s23 }
  0xba   : > { %s375_s18 = scalar_lea.sflag [#allocation3], %s4627_s27  ;;  %p4193_p8 = pneg %p4648_p11 }
  0xbc   : > { %s4642_s25 = scalar_lea.hbm %s6405_s0, %s2954_s22  ;;  %s4196_s12 = scalar_lea.hbm %s6405_s0, 512 }
  0xbd   : > { %s4191_s22 = scalar_lea.hbm %s4642_s25, 256  ;;  %p4197_p1 = scmp.lt.u32.totalorder %s4642_s25, %s6405_s0 }
  0xbe   : > { %p4192_p12 = scmp.ne.s32.totalorder %s4642_s25, %s4191_s22  ;;  %p4198_p3 = scmp.lt.u32.totalorder %s4196_s12, %s4191_s22 }
  0xbf   : > { %p4200_p5 = scmp.lt.u32.totalorder %s4191_s22, %s4642_s25 }
  0xc0   : > { %p4194_p13 = pnand %p4193_p8, %p4192_p12  ;;  %p4199_p2 = por %p4198_p3, %p4197_p1 }
  0xc2   : > { %p4195_p0 = pneg %p4194_p13  ;;  %p4201_p7 = por %p4200_p5, %p4199_p2 }
  0xc4   : > { %p4202_p9 = pnand %p4201_p7, %p4195_p0 }
  0xc6   : > { %4205 = shalt.err (!%p4202_p9)
}
  0xc7   : > { %s4206_s28 = scalar_lea.vmem %s4644_s23, 256  ;;  %s4347_s21 = smov [#allocation2]  }
  0xc8   : > { %p4207_p12 = scmp.ne.s32.totalorder %s4644_s23, %s4206_s28  ;;  %s4211_s29 = sshll.u32 %s4347_s21, 4  ;;  %s4212_s29 = int_to_ptr.vmem [resolvable:$false] %s4211_s29 }
  0xc9   : > { %s4213_s3 = scalar_lea.vmem %s4212_s29, 512  ;;  %p4214_p4 = scmp.lt.s32.totalorder %s4644_s23, %s4212_s29 }
  0xca   : > { %p4209_p13 = pnand %p4207_p12, %p4193_p8  ;;  %p4215_p1 = scmp.lt.s32.totalorder %s4213_s3, %s4206_s28 }
  0xcc   : > { %p4210_p10 = pneg %p4209_p13  ;;  %p4216_p3 = por %p4215_p1, %p4214_p4 }
  0xce   : > { %p4217_p2 = pnand %p4216_p3, %p4210_p10 }
  0xd0   : > { %4220 = shalt.err (!%p4217_p2)
}
  0xd1   : > { %3453 = dma.hbm_to_vmem [thread:$0]  (!%p4648_p11), %s4642_s25, 256, %s4644_s23, %s375_s18  }
  0xd2   : > { %s2955_s22 = sshll.u32 %s4337_s16, 10  ;;  %s397_s28 = scalar_lea.vmem [#allocation5], %s2912_s2 }
  0xd3   : > { %s4684_s21 = scalar_lea.hbm %s6338_s1, %s2955_s22  ;;  %s405_s29 = sshll.u32 %s397_s28, 4  ;;  %s406_s29 = int_to_ptr.vmem [resolvable:$true] %s405_s29 }
  0xd4   : > { %s6407_s3 = sand.u32 1, %s4337_s16   ;;  %s4221_s4 = scalar_lea.hbm %s4684_s21, 1024 }
  0xd5   : > { %s394_s0 = scalar_lea.sflag [#allocation6], %s6407_s3  ;;  %p4222_p4 = scmp.ne.s32.totalorder %s4684_s21, %s4221_s4 }
  0xd6   : > { %s4226_s18 = scalar_lea.hbm %s6338_s1, 2048  ;;  %p4227_p5 = scmp.lt.u32.totalorder %s4684_s21, %s6338_s1 }
  0xd7   : > { %p4224_p10 = pnand %p4222_p4, %p4193_p8  ;;  %p4228_p7 = scmp.lt.u32.totalorder %s4226_s18, %s4221_s4 }
  0xd8   : > { %p4230_p12 = scmp.lt.u32.totalorder %s4221_s4, %s4684_s21 }
  0xd9   : > { %p4225_p0 = pneg %p4224_p10  ;;  %p4229_p9 = por %p4228_p7, %p4227_p5 }
  0xdb   : > { %p4231_p13 = por %p4230_p12, %p4229_p9 }
  0xdd   : > { %p4232_p1 = pnand %p4231_p13, %p4225_p0 }
  0xdf   : > { %4235 = shalt.err (!%p4232_p1)
}
  0xe0   : > { %s4236_s2 = scalar_lea.vmem %s406_s29, 1024  ;;  %s4348_s12 = smov [#allocation5]  }
  0xe1   : > { %p4237_p3 = scmp.ne.s32.totalorder %s406_s29, %s4236_s2  ;;  %s4241_s6 = sshll.u32 %s4348_s12, 4  ;;  %s4242_s6 = int_to_ptr.vmem [resolvable:$false] %s4241_s6 }
  0xe2   : > { %s4243_s28 = scalar_lea.vmem %s4242_s6, 2048  ;;  %p4244_p10 = scmp.lt.s32.totalorder %s406_s29, %s4242_s6 }
  0xe3   : > { %p4239_p2 = pnand %p4237_p3, %p4193_p8  ;;  %p4245_p6 = scmp.lt.s32.totalorder %s4243_s28, %s4236_s2 }
  0xe5   : > { %p4240_p4 = pneg %p4239_p2  ;;  %p4246_p5 = por %p4245_p6, %p4244_p10 }
  0xe7   : > { %p4247_p7 = pnand %p4246_p5, %p4240_p4 }
  0xe9   : > { %4250 = shalt.err (!%p4247_p7)
}
  0xea   : > { %3456 = dma.hbm_to_vmem [thread:$0]  (!%p4648_p11), %s4684_s21, 1024, %s406_s29, %s394_s0  }
  0xeb   : > { %p6408_p0 = scmp.ne.s32.totalorder %s6393_s20, 0 }
  0xec   : > { %s4712_s4 = sand.u32 (!%p6408_p0), 1, %s4329_s14   ;;  %p6409_p6 = scmp.ne.s32.totalorder (!%p6408_p0), %s6402_s26, 0 }
  0xed   : > { %414 = sbr.rel (%p6408_p0) target bundleno = 2536 (0x9e8), region = 60  ;;  %s2916_s3 = sshll.u32 (!%p6408_p0), %s4712_s4, 4 }
  0xee   : > { %s417_s25 = scalar_lea.sflag (!%p6408_p0), [#allocation3], %s4712_s4  ;;  %s4716_s23 = scalar_lea.vmem (!%p6408_p0), [#allocation2], %s2916_s3 }
  0xf4   : > { %4296 = dma.done.wait (%p6409_p6), %s417_s25, 256  }
  0xf5   : > { %4298 = vsyncadd (%p6409_p6), %s417_s25, 4294967040  ;;  %s425_s0 = sand.u32 1, %s4437_s19   ;;  %s2917_s20 = sshll.u32 %s4712_s4, 6 }
  0xf6   : > { %s426_s10 = scalar_lea.sflag [#allocation6], %s425_s0  ;;  %s4724_s21 = scalar_lea.vmem [#allocation5], %s2917_s20 }
  0xf7   : > { %4300 = dma.done.wait (%p6409_p6), %s426_s10, 1024  }
  0xf8   : > { %4302 = vsyncadd (%p6409_p6), %s426_s10, 4294966272  ;;  %p6410_p11 = scmp.eq.s32.totalorder %s4437_s19, 0 }
  0xfa   : > { %4304 = dma.done.wait (%p6410_p11), [#allocation6], 29696   ;;  %p6411_p8 = pmov %p6410_p11 }
  0xfc   : > { %4306 = vsyncadd (%p6411_p8), [#allocation6], 4294937600  ;;  %p6412_p9 = pmov %p6411_p8 }
  0xfd   : > { %p6413_p12 = pmov %p6411_p8 }
  0xfe   : > { %4308 = dma.done.wait (%p6412_p9), [#allocation9], 1280  }
  0xff   : > { %4310 = vsyncadd (%p6413_p12), [#allocation9], 4294966016  ;;  %p6414_p13 = pmov %p6411_p8 }
 0x100   : > { %p6415_p1 = pmov %p6411_p8 }
 0x101   : > { %4312 = dma.done.wait (%p6414_p13), [#allocation12], 3072  }
 0x102   : > { %4314 = vsyncadd (%p6415_p1), [#allocation12], 4294964224  ;;  %p6416_p3 = pmov %p6415_p1 }
 0x103   : > { %p6417_p2 = pmov %p6415_p1 }
 0x104   : > { %4316 = dma.done.wait (%p6416_p3), [#allocation15], 2048  }
 0x105   : > { %4318 = vsyncadd (%p6417_p2), [#allocation15], 4294965248  ;;  %v507_v0 = vld [vmem:[#allocation7 + $0x8] sm:$0xff]  ;;  %v509_v2 = vld [vmem:[#allocation7 + $0x18] sm:$0xff]  ;;  %vm738_vm0 = vcmask 793600   ;;  %vm742_vm1 = vcmask 1040384  }
 0x106   : > { %v515_v1 = vld [vmem:[#allocation7 + $0x48] sm:$0xff]  ;;  %v517_v4 = vld [vmem:[#allocation7 + $0x58] sm:$0xff]  ;;  %v506_v5 = vld [vmem:[#allocation7] sm:$0xff]  ;;  %s4349_s26 = smov 33   ;;  %s4350_s29 = smov 32   ;;  %vm1447_vm2 = vcmask 130048  }
 0x107   : > { %v2957_v3 = vpack.c.bf16 %v515_v1, %v507_v0  ;;  %v514_v6 = vld [vmem:[#allocation7 + $0x40] sm:$0xff]  ;;  %v3013_v7 = vpack.c.bf16 %v517_v4, %v509_v2  ;;  %v508_v9 = vld [vmem:[#allocation7 + $0x10] sm:$0xff]  ;;  %v523_v11 = vld [vmem:[#allocation7 + $0x88] sm:$0xff]  ;;  %s4351_s18 = smov 31   ;;  %s4352_s27 = smov 1   ;;  %vm2122_vm11 = vcmask 588800  }
 0x108   : > { %v2959_v8 = vpack.c.bf16 %v514_v6, %v506_v5  ;;  %v516_v10 = vld [vmem:[#allocation7 + $0x50] sm:$0xff]  ;;  %v531_v13 = vld [vmem:[#allocation7 + $0xc8] sm:$0xff]  ;;  %v525_v14 = vld [vmem:[#allocation7 + $0x98] sm:$0xff]  ;;  %s4353_s22 = smov 127   ;;  %s4354_s2 = smov 97  }
 0x109   : > { %2958 = vmatprep.subr.bf16.mxu0 %v2957_v3  ;;  %v3015_v12 = vpack.c.bf16 %v516_v10, %v508_v9  ;;  %v533_v15 = vld [vmem:[#allocation7 + $0xd8] sm:$0xff]  ;;  %3014 = vmatprep.subr.bf16.mxu1 %v3013_v7  ;;  %v2961_v16 = vpack.c.bf16 %v531_v13, %v523_v11  ;;  %v522_v18 = vld [vmem:[#allocation7 + $0x80] sm:$0xff]  ;;  %v524_v20 = vld [vmem:[#allocation7 + $0x90] sm:$0xff]  ;;  %s4355_s12 = smov 96   ;;  %s4356_s6 = smov 95  }
 0x10a   : > { %2960 = vmatpush1.bf16.msra.mxu0 %v2959_v8  ;;  %v3017_v17 = vpack.c.bf16 %v533_v15, %v525_v14  ;;  %v530_v19 = vld [vmem:[#allocation7 + $0xc0] sm:$0xff]  ;;  %v532_v22 = vld [vmem:[#allocation7 + $0xd0] sm:$0xff]  ;;  %v539_v23 = vld [vmem:[#allocation7 + $0x108] sm:$0xff]  ;;  %p6458_p10 = scmp.ne.s32.totalorder %s6403_s24, 0 }
 0x10b   : > { %3016 = vmatpush1.bf16.msra.mxu1 %v3015_v12  ;;  %v2963_v21 = vpack.c.bf16 %v530_v19, %v522_v18  ;;  %v547_v24 = vld [vmem:[#allocation7 + $0x148] sm:$0xff]  ;;  %2962 = vmatprep.subr.bf16.mxu0 %v2961_v16  ;;  %v3019_v25 = vpack.c.bf16 %v532_v22, %v524_v20  ;;  %v541_v27 = vld [vmem:[#allocation7 + $0x118] sm:$0xff]  ;;  %v538_v29 = vld [vmem:[#allocation7 + $0x100] sm:$0xff] }
 0x10c   : > { %3018 = vmatprep.subr.bf16.mxu1 %v3017_v17  ;;  %v2965_v26 = vpack.c.bf16 %v547_v24, %v539_v23  ;;  %v549_v28 = vld [vmem:[#allocation7 + $0x158] sm:$0xff]  ;;  %v546_v31 = vld [vmem:[#allocation7 + $0x140] sm:$0xff]  ;;  %v540_v32 = vld [vmem:[#allocation7 + $0x110] sm:$0xff] }
 0x10d   : > { %v3021_v30 = vpack.c.bf16 %v549_v28, %v541_v27  ;;  %v548_v33 = vld [vmem:[#allocation7 + $0x150] sm:$0xff]  ;;  %v2967_v34 = vpack.c.bf16 %v546_v31, %v538_v29  ;;  %v555_v35 = vld [vmem:[#allocation7 + $0x188] sm:$0xff]  ;;  %v557_v37 = vld [vmem:[#allocation7 + $0x198] sm:$0xff] }
 0x10e   : > { %2964 = vmatpush1.bf16.msra.mxu0 %v2963_v21  ;;  %v563_v36 = vld [vmem:[#allocation7 + $0x1c8] sm:$0xff]  ;;  %v3023_v38 = vpack.c.bf16 %v548_v33, %v540_v32  ;;  %v565_v40 = vld [vmem:[#allocation7 + $0x1d8] sm:$0xff]  ;;  %v554_v41 = vld [vmem:[#allocation7 + $0x180] sm:$0xff] }
 0x10f   : > { %3020 = vmatpush1.bf16.msra.mxu1 %v3019_v25  ;;  %2966 = vmatprep.subr.bf16.mxu0 %v2965_v26  ;;  %v2969_v39 = vpack.c.bf16 %v563_v36, %v555_v35  ;;  %v562_v42 = vld [vmem:[#allocation7 + $0x1c0] sm:$0xff]  ;;  %v3025_v43 = vpack.c.bf16 %v565_v40, %v557_v37  ;;  %v556_v44 = vld [vmem:[#allocation7 + $0x190] sm:$0xff]  ;;  %v571_v46 = vld [vmem:[#allocation7 + $0x208] sm:$0xff] }
 0x110   : > { %3022 = vmatprep.subr.bf16.mxu1 %v3021_v30  ;;  %v564_v45 = vld [vmem:[#allocation7 + $0x1d0] sm:$0xff]  ;;  %v579_v47 = vld [vmem:[#allocation7 + $0x248] sm:$0xff]  ;;  %v573_v48 = vld [vmem:[#allocation7 + $0x218] sm:$0xff]  ;;  %v2971_v50 = vpack.c.bf16 %v562_v42, %v554_v41 }
 0x111   : > { %v581_v49 = vld [vmem:[#allocation7 + $0x258] sm:$0xff]  ;;  %v3027_v51 = vpack.c.bf16 %v564_v45, %v556_v44  ;;  %v2973_v52 = vpack.c.bf16 %v579_v47, %v571_v46  ;;  %v570_v53 = vld [vmem:[#allocation7 + $0x200] sm:$0xff]  ;;  %v572_v55 = vld [vmem:[#allocation7 + $0x210] sm:$0xff] }
 0x112   : > { %2968 = vmatpush1.bf16.msra.mxu0 %v2967_v34  ;;  %v578_v54 = vld [vmem:[#allocation7 + $0x240] sm:$0xff]  ;;  %v3029_v56 = vpack.c.bf16 %v581_v49, %v573_v48  ;;  %v580_v57 = vld [vmem:[#allocation7 + $0x250] sm:$0xff]  ;;  %v587_v58 = vld [vmem:[#allocation7 + $0x288] sm:$0xff] }
 0x113   : > { %3024 = vmatpush1.bf16.msra.mxu1 %v3023_v38  ;;  %2970 = vmatprep.subr.bf16.mxu0 %v2969_v39  ;;  %v595_v59 = vld [vmem:[#allocation7 + $0x2c8] sm:$0xff]  ;;  %v589_v60 = vld [vmem:[#allocation7 + $0x298] sm:$0xff]  ;;  %v2975_v62 = vpack.c.bf16 %v578_v54, %v570_v53  ;;  %v3031_v63 = vpack.c.bf16 %v580_v57, %v572_v55  ;;  %v586_v1 = vld [vmem:[#allocation7 + $0x280] sm:$0xff] }
 0x114   : > { %3026 = vmatprep.subr.bf16.mxu1 %v3025_v43  ;;  %v597_v61 = vld [vmem:[#allocation7 + $0x2d8] sm:$0xff]  ;;  %v2977_v0 = vpack.c.bf16 %v595_v59, %v587_v58  ;;  %v594_v2 = vld [vmem:[#allocation7 + $0x2c0] sm:$0xff]  ;;  %v588_v3 = vld [vmem:[#allocation7 + $0x290] sm:$0xff] }
 0x115   : > { %v3033_v4 = vpack.c.bf16 %v597_v61, %v589_v60  ;;  %v596_v5 = vld [vmem:[#allocation7 + $0x2d0] sm:$0xff]  ;;  %v603_v6 = vld [vmem:[#allocation7 + $0x308] sm:$0xff]  ;;  %v605_v8 = vld [vmem:[#allocation7 + $0x318] sm:$0xff]  ;;  %v2979_v10 = vpack.c.bf16 %v594_v2, %v586_v1 }
 0x116   : > { %2972 = vmatpush1.bf16.msra.mxu0 %v2971_v50  ;;  %v611_v7 = vld [vmem:[#allocation7 + $0x348] sm:$0xff]  ;;  %v613_v9 = vld [vmem:[#allocation7 + $0x358] sm:$0xff]  ;;  %v3035_v11 = vpack.c.bf16 %v596_v5, %v588_v3  ;;  %v602_v13 = vld [vmem:[#allocation7 + $0x300] sm:$0xff] }
 0x117   : > { %3028 = vmatpush1.bf16.msra.mxu1 %v3027_v51  ;;  %2974 = vmatprep.subr.bf16.mxu0 %v2973_v52  ;;  %v2981_v12 = vpack.c.bf16 %v611_v7, %v603_v6  ;;  %v610_v14 = vld [vmem:[#allocation7 + $0x340] sm:$0xff]  ;;  %v604_v15 = vld [vmem:[#allocation7 + $0x310] sm:$0xff]  ;;  %v3037_v16 = vpack.c.bf16 %v613_v9, %v605_v8  ;;  %v619_v18 = vld [vmem:[#allocation7 + $0x388] sm:$0xff] }
 0x118   : > { %3030 = vmatprep.subr.bf16.mxu1 %v3029_v56  ;;  %v612_v17 = vld [vmem:[#allocation7 + $0x350] sm:$0xff]  ;;  %v627_v19 = vld [vmem:[#allocation7 + $0x3c8] sm:$0xff]  ;;  %v621_v20 = vld [vmem:[#allocation7 + $0x398] sm:$0xff]  ;;  %v2983_v22 = vpack.c.bf16 %v610_v14, %v602_v13 }
 0x119   : > { %v629_v21 = vld [vmem:[#allocation7 + $0x3d8] sm:$0xff]  ;;  %v3039_v23 = vpack.c.bf16 %v612_v17, %v604_v15  ;;  %v2985_v24 = vpack.c.bf16 %v627_v19, %v619_v18  ;;  %v618_v25 = vld [vmem:[#allocation7 + $0x380] sm:$0xff]  ;;  %v620_v27 = vld [vmem:[#allocation7 + $0x390] sm:$0xff] }
 0x11a   : > { %2976 = vmatpush1.bf16.msra.mxu0 %v2975_v62  ;;  %v626_v26 = vld [vmem:[#allocation7 + $0x3c0] sm:$0xff]  ;;  %v3041_v28 = vpack.c.bf16 %v629_v21, %v621_v20  ;;  %v628_v29 = vld [vmem:[#allocation7 + $0x3d0] sm:$0xff]  ;;  %v635_v30 = vld [vmem:[#allocation7 + $0x408] sm:$0xff] }
 0x11b   : > { %3032 = vmatpush1.bf16.msra.mxu1 %v3031_v63  ;;  %2978 = vmatprep.subr.bf16.mxu0 %v2977_v0  ;;  %v643_v31 = vld [vmem:[#allocation7 + $0x448] sm:$0xff]  ;;  %v637_v32 = vld [vmem:[#allocation7 + $0x418] sm:$0xff]  ;;  %v2987_v34 = vpack.c.bf16 %v626_v26, %v618_v25  ;;  %v3043_v35 = vpack.c.bf16 %v628_v29, %v620_v27  ;;  %v634_v37 = vld [vmem:[#allocation7 + $0x400] sm:$0xff] }
 0x11c   : > { %3034 = vmatprep.subr.bf16.mxu1 %v3033_v4  ;;  %v645_v33 = vld [vmem:[#allocation7 + $0x458] sm:$0xff]  ;;  %v2989_v36 = vpack.c.bf16 %v643_v31, %v635_v30  ;;  %v642_v38 = vld [vmem:[#allocation7 + $0x440] sm:$0xff]  ;;  %v636_v39 = vld [vmem:[#allocation7 + $0x410] sm:$0xff] }
 0x11d   : > { %v3045_v40 = vpack.c.bf16 %v645_v33, %v637_v32  ;;  %v644_v41 = vld [vmem:[#allocation7 + $0x450] sm:$0xff]  ;;  %v651_v42 = vld [vmem:[#allocation7 + $0x488] sm:$0xff]  ;;  %v653_v44 = vld [vmem:[#allocation7 + $0x498] sm:$0xff]  ;;  %v2991_v46 = vpack.c.bf16 %v642_v38, %v634_v37 }
 0x11e   : > { %2980 = vmatpush1.bf16.msra.mxu0 %v2979_v10  ;;  %v659_v43 = vld [vmem:[#allocation7 + $0x4c8] sm:$0xff]  ;;  %v661_v45 = vld [vmem:[#allocation7 + $0x4d8] sm:$0xff]  ;;  %v3047_v47 = vpack.c.bf16 %v644_v41, %v636_v39  ;;  %v650_v49 = vld [vmem:[#allocation7 + $0x480] sm:$0xff] }
 0x11f   : > { %3036 = vmatpush1.bf16.msra.mxu1 %v3035_v11  ;;  %2982 = vmatprep.subr.bf16.mxu0 %v2981_v12  ;;  %v2993_v48 = vpack.c.bf16 %v659_v43, %v651_v42  ;;  %v658_v50 = vld [vmem:[#allocation7 + $0x4c0] sm:$0xff]  ;;  %v652_v51 = vld [vmem:[#allocation7 + $0x490] sm:$0xff]  ;;  %v3049_v52 = vpack.c.bf16 %v661_v45, %v653_v44  ;;  %v667_v54 = vld [vmem:[#allocation7 + $0x508] sm:$0xff] }
 0x120   : > { %3038 = vmatprep.subr.bf16.mxu1 %v3037_v16  ;;  %v660_v53 = vld [vmem:[#allocation7 + $0x4d0] sm:$0xff]  ;;  %v675_v55 = vld [vmem:[#allocation7 + $0x548] sm:$0xff]  ;;  %v669_v56 = vld [vmem:[#allocation7 + $0x518] sm:$0xff]  ;;  %v2995_v58 = vpack.c.bf16 %v658_v50, %v650_v49 }
 0x121   : > { %v677_v57 = vld [vmem:[#allocation7 + $0x558] sm:$0xff]  ;;  %v666_v59 = vld [vmem:[#allocation7 + $0x500] sm:$0xff]  ;;  %v3051_v60 = vpack.c.bf16 %v660_v53, %v652_v51  ;;  %v2997_v61 = vpack.c.bf16 %v675_v55, %v667_v54  ;;  %v668_v63 = vld [vmem:[#allocation7 + $0x510] sm:$0xff] }
 0x122   : > { %2984 = vmatpush1.bf16.msra.mxu0 %v2983_v22  ;;  %v674_v62 = vld [vmem:[#allocation7 + $0x540] sm:$0xff]  ;;  %v676_v0 = vld [vmem:[#allocation7 + $0x550] sm:$0xff]  ;;  %v3053_v1 = vpack.c.bf16 %v677_v57, %v669_v56  ;;  %v683_v2 = vld [vmem:[#allocation7 + $0x588] sm:$0xff] }
 0x123   : > { %3040 = vmatpush1.bf16.msra.mxu1 %v3039_v23  ;;  %2986 = vmatprep.subr.bf16.mxu0 %v2985_v24  ;;  %v691_v3 = vld [vmem:[#allocation7 + $0x5c8] sm:$0xff]  ;;  %v685_v5 = vld [vmem:[#allocation7 + $0x598] sm:$0xff]  ;;  %v2999_v7 = vpack.c.bf16 %v674_v62, %v666_v59  ;;  %v3055_v8 = vpack.c.bf16 %v676_v0, %v668_v63  ;;  %v682_v10 = vld [vmem:[#allocation7 + $0x580] sm:$0xff] }
 0x124   : > { %3042 = vmatprep.subr.bf16.mxu1 %v3041_v28  ;;  %v4747_v4 = vld [vmem:[%s4716_s23 + $0x8] sm:$0xff]  ;;  %v3001_v9 = vpack.c.bf16 %v691_v3, %v683_v2  ;;  %v690_v11 = vld [vmem:[#allocation7 + $0x5c0] sm:$0xff]  ;;  %v684_v12 = vld [vmem:[#allocation7 + $0x590] sm:$0xff] }
 0x125   : > { %v693_v6 = vld [vmem:[#allocation7 + $0x5d8] sm:$0xff]  ;;  %2927 = vmatprep.mubr.msk.f32.mxu0 %vm738_vm0, %v4747_v4  ;;  %2930 = vmatprep.mubr.msk.f32.mxu1 %vm738_vm0, %v4747_v4  ;;  %v692_v14 = vld [vmem:[#allocation7 + $0x5d0] sm:$0xff]  ;;  %v699_v15 = vld [vmem:[#allocation7 + $0x608] sm:$0xff]  ;;  %v3003_v19 = vpack.c.bf16 %v690_v11, %v682_v10 }
 0x126   : > { %2988 = vmatpush1.bf16.msra.mxu0 %v2987_v34  ;;  %v3057_v13 = vpack.c.bf16 %v693_v6, %v685_v5  ;;  %v707_v16 = vld [vmem:[#allocation7 + $0x648] sm:$0xff]  ;;  %v701_v17 = vld [vmem:[#allocation7 + $0x618] sm:$0xff]  ;;  %v3059_v20 = vpack.c.bf16 %v692_v14, %v684_v12  ;;  %v698_v22 = vld [vmem:[#allocation7 + $0x600] sm:$0xff] }
 0x127   : > { %3044 = vmatpush1.bf16.msra.mxu1 %v3043_v35  ;;  %2990 = vmatprep.subr.bf16.mxu0 %v2989_v36  ;;  %v709_v18 = vld [vmem:[#allocation7 + $0x658] sm:$0xff]  ;;  %v3005_v21 = vpack.c.bf16 %v707_v16, %v699_v15  ;;  %v706_v23 = vld [vmem:[#allocation7 + $0x640] sm:$0xff]  ;;  %v700_v24 = vld [vmem:[#allocation7 + $0x610] sm:$0xff] }
 0x128   : > { %3046 = vmatprep.subr.bf16.mxu1 %v3045_v40  ;;  %v3061_v25 = vpack.c.bf16 %v709_v18, %v701_v17  ;;  %v708_v26 = vld [vmem:[#allocation7 + $0x650] sm:$0xff]  ;;  %v715_v27 = vld [vmem:[#allocation7 + $0x688] sm:$0xff]  ;;  %v717_v29 = vld [vmem:[#allocation7 + $0x698] sm:$0xff]  ;;  %v3007_v31 = vpack.c.bf16 %v706_v23, %v698_v22 }
 0x129   : > { %v723_v28 = vld [vmem:[#allocation7 + $0x6c8] sm:$0xff]  ;;  %v725_v30 = vld [vmem:[#allocation7 + $0x6d8] sm:$0xff]  ;;  %v3063_v32 = vpack.c.bf16 %v708_v26, %v700_v24  ;;  %v714_v34 = vld [vmem:[#allocation7 + $0x680] sm:$0xff] }
 0x12a   : > { %2992 = vmatpush1.bf16.msra.mxu0 %v2991_v46  ;;  %v3009_v33 = vpack.c.bf16 %v723_v28, %v715_v27  ;;  %v722_v35 = vld [vmem:[#allocation7 + $0x6c0] sm:$0xff]  ;;  %v3065_v36 = vpack.c.bf16 %v725_v30, %v717_v29  ;;  %v716_v37 = vld [vmem:[#allocation7 + $0x690] sm:$0xff]  ;;  %v731_v41 = vld [vmem:[#allocation7 + $0x708] sm:$0x1] }
 0x12b   : > { %3048 = vmatpush1.bf16.msra.mxu1 %v3047_v47  ;;  %2994 = vmatprep.subr.bf16.mxu0 %v2993_v48  ;;  %v724_v38 = vld [vmem:[#allocation7 + $0x6d0] sm:$0xff]  ;;  %v3011_v39 = vpack.c.bf16 %v722_v35, %v714_v34  ;;  %v733_v42 = vld [vmem:[#allocation7 + $0x718] sm:$0x1]  ;;  %v511_v43 = vld [vmem:[#allocation7 + $0x28] sm:$0xff] }
 0x12c   : > { %3050 = vmatprep.subr.bf16.mxu1 %v3049_v52  ;;  %v3067_v40 = vpack.c.bf16 %v724_v38, %v716_v37  ;;  %v730_v44 = vld [vmem:[#allocation7 + $0x700] sm:$0x1]  ;;  %v519_v45 = vld [vmem:[#allocation7 + $0x68] sm:$0xff]  ;;  %v732_v48 = vld [vmem:[#allocation7 + $0x710] sm:$0x1] }
 0x12d   : > { %v510_v46 = vld [vmem:[#allocation7 + $0x20] sm:$0xff]  ;;  %v513_v49 = vld [vmem:[#allocation7 + $0x38] sm:$0xff]  ;;  %v512_v51 = vld [vmem:[#allocation7 + $0x30] sm:$0xff]  ;;  %v3069_v56 = vpack.c.bf16 %v519_v45, %v511_v43 }
 0x12e   : > { %2996 = vmatpush1.bf16.msra.mxu0 %v2995_v58  ;;  %v518_v47 = vld [vmem:[#allocation7 + $0x60] sm:$0xff]  ;;  %v521_v50 = vld [vmem:[#allocation7 + $0x78] sm:$0xff]  ;;  %v520_v52 = vld [vmem:[#allocation7 + $0x70] sm:$0xff] }
 0x12f   : > { %3052 = vmatpush1.bf16.msra.mxu1 %v3051_v60  ;;  %2998 = vmatprep.subr.bf16.mxu0 %v2997_v61  ;;  %v527_v53 = vld [vmem:[#allocation7 + $0xa8] sm:$0xff]  ;;  %v4756_v55 = vld [vmem:[%s4716_s23] sm:$0xff]  ;;  %v529_v57 = vld [vmem:[#allocation7 + $0xb8] sm:$0xff]  ;;  %v3071_v59 = vpack.c.bf16 %v518_v47, %v510_v46  ;;  %v3125_v60 = vpack.c.bf16 %v521_v50, %v513_v49  ;;  %v3127_v61 = vpack.c.bf16 %v520_v52, %v512_v51 }
 0x130   : > { %3054 = vmatprep.subr.bf16.mxu1 %v3053_v1  ;;  %v535_v54 = vld [vmem:[#allocation7 + $0xe8] sm:$0xff]  ;;  %v537_v58 = vld [vmem:[#allocation7 + $0xf8] sm:$0xff]  ;;  %v526_v63 = vld [vmem:[#allocation7 + $0xa0] sm:$0xff] }
 0x131   : > { %v3073_v62 = vpack.c.bf16 %v535_v54, %v527_v53  ;;  %v534_v0 = vld [vmem:[#allocation7 + $0xe0] sm:$0xff]  ;;  %v528_v1 = vld [vmem:[#allocation7 + $0xb0] sm:$0xff]  ;;  %v3129_v2 = vpack.c.bf16 %v537_v58, %v529_v57  ;;  %v543_v5 = vld [vmem:[#allocation7 + $0x128] sm:$0xff] }
 0x132   : > { %3000 = vmatpush1.bf16.msra.mxu0 %v2999_v7  ;;  %v536_v3 = vld [vmem:[#allocation7 + $0xf0] sm:$0xff]  ;;  %v551_v6 = vld [vmem:[#allocation7 + $0x168] sm:$0xff]  ;;  %v545_v7 = vld [vmem:[#allocation7 + $0x138] sm:$0xff] }
 0x133   : > { %3056 = vmatpush1.bf16.msra.mxu1 %v3055_v8  ;;  %3002 = vmatprep.subr.bf16.mxu0 %v3001_v9  ;;  %v553_v8 = vld [vmem:[#allocation7 + $0x178] sm:$0xff]  ;;  %v3075_v9 = vpack.c.bf16 %v534_v0, %v526_v63  ;;  %v3131_v10 = vpack.c.bf16 %v536_v3, %v528_v1  ;;  %v3077_v11 = vpack.c.bf16 %v551_v6, %v543_v5  ;;  %v542_v12 = vld [vmem:[#allocation7 + $0x120] sm:$0xff]  ;;  %v544_v14 = vld [vmem:[#allocation7 + $0x130] sm:$0xff] }
 0x134   : > { %3058 = vmatprep.subr.bf16.mxu1 %v3057_v13  ;;  %v550_v13 = vld [vmem:[#allocation7 + $0x160] sm:$0xff]  ;;  %v3133_v15 = vpack.c.bf16 %v553_v8, %v545_v7  ;;  %v552_v16 = vld [vmem:[#allocation7 + $0x170] sm:$0xff]  ;;  %v559_v17 = vld [vmem:[#allocation7 + $0x1a8] sm:$0xff] }
 0x135   : > { %v567_v18 = vld [vmem:[#allocation7 + $0x1e8] sm:$0xff]  ;;  %v3135_v22 = vpack.c.bf16 %v552_v16, %v544_v14  ;;  %v558_v24 = vld [vmem:[#allocation7 + $0x1a0] sm:$0xff]  ;;  %v560_v26 = vld [vmem:[#allocation7 + $0x1b0] sm:$0xff] }
 0x136   : > { %3004 = vmatpush1.bf16.msra.mxu0 %v3003_v19  ;;  %v561_v19 = vld [vmem:[#allocation7 + $0x1b8] sm:$0xff]  ;;  %v3081_v23 = vpack.c.bf16 %v567_v18, %v559_v17  ;;  %v568_v28 = vld [vmem:[#allocation7 + $0x1f0] sm:$0xff]  ;;  %v575_v29 = vld [vmem:[#allocation7 + $0x228] sm:$0xff] }
 0x137   : > { %3060 = vmatpush1.bf16.msra.mxu1 %v3059_v20  ;;  %3006 = vmatprep.subr.bf16.mxu0 %v3005_v21  ;;  %v569_v20 = vld [vmem:[#allocation7 + $0x1f8] sm:$0xff]  ;;  %v3079_v21 = vpack.c.bf16 %v550_v13, %v542_v12  ;;  %v583_v30 = vld [vmem:[#allocation7 + $0x268] sm:$0xff]  ;;  %v574_v35 = vld [vmem:[#allocation7 + $0x220] sm:$0xff] }
 0x138   : > { %3062 = vmatprep.subr.bf16.mxu1 %v3061_v25  ;;  %v566_v25 = vld [vmem:[#allocation7 + $0x1e0] sm:$0xff]  ;;  %v3137_v27 = vpack.c.bf16 %v569_v20, %v561_v19  ;;  %v3085_v34 = vpack.c.bf16 %v583_v30, %v575_v29  ;;  %v576_v37 = vld [vmem:[#allocation7 + $0x230] sm:$0xff]  ;;  %v601_v43 = vld [vmem:[#allocation7 + $0x2f8] sm:$0xff] }
 0x139   : > { %v590_v47 = vld [vmem:[#allocation7 + $0x2a0] sm:$0xff]  ;;  %v592_v49 = vld [vmem:[#allocation7 + $0x2b0] sm:$0xff]  ;;  %v607_v52 = vld [vmem:[#allocation7 + $0x328] sm:$0xff] }
 0x13a   : > { %3008 = vmatpush1.bf16.msra.mxu0 %v3007_v31  ;;  %v577_v31 = vld [vmem:[#allocation7 + $0x238] sm:$0xff]  ;;  %v600_v51 = vld [vmem:[#allocation7 + $0x2f0] sm:$0xff]  ;;  %v615_v53 = vld [vmem:[#allocation7 + $0x368] sm:$0xff] }
 0x13b   : > { %3064 = vmatpush1.bf16.msra.mxu1 %v3063_v32  ;;  %3010 = vmatprep.subr.bf16.mxu0 %v3009_v33  ;;  %v585_v32 = vld [vmem:[#allocation7 + $0x278] sm:$0xff]  ;;  %v3083_v33 = vpack.c.bf16 %v566_v25, %v558_v24  ;;  %v3147_v58 = vpack.c.bf16 %v600_v51, %v592_v49  ;;  %v616_v0 = vld [vmem:[#allocation7 + $0x370] sm:$0xff]  ;;  %v623_v1 = vld [vmem:[#allocation7 + $0x3a8] sm:$0xff] }
 0x13c   : > { %3066 = vmatprep.subr.bf16.mxu1 %v3065_v36  ;;  %v582_v36 = vld [vmem:[#allocation7 + $0x260] sm:$0xff]  ;;  %v3141_v38 = vpack.c.bf16 %v585_v32, %v577_v31  ;;  %v609_v54 = vld [vmem:[#allocation7 + $0x338] sm:$0xff]  ;;  %v632_v13 = vld [vmem:[#allocation7 + $0x3f0] sm:$0xff] }
 0x13d   : > { %v625_v3 = vld [vmem:[#allocation7 + $0x3b8] sm:$0xff]  ;;  %v639_v14 = vld [vmem:[#allocation7 + $0x428] sm:$0xff]  ;;  %v648_v25 = vld [vmem:[#allocation7 + $0x470] sm:$0xff] }
 0x13e   : > { %3012 = vmatpush1.bf16.msra.mxu0 %v3011_v39  ;;  %v584_v39 = vld [vmem:[#allocation7 + $0x270] sm:$0xff]  ;;  %v633_v5 = vld [vmem:[#allocation7 + $0x3f8] sm:$0xff]  ;;  %v687_v49 = vld [vmem:[#allocation7 + $0x5a8] sm:$0xff] }
 0x13f   : > { %3068 = vmatpush1.bf16.msra.mxu1 %v3067_v40  ;;  %2925 = vmatprep.subr.msk.mxu0 %vm742_vm1, %v731_v41  ;;  %v591_v40 = vld [vmem:[#allocation7 + $0x2a8] sm:$0xff]  ;;  %v3143_v45 = vpack.c.bf16 %v584_v39, %v576_v37  ;;  %v3153_v12 = vpack.c.bf16 %v633_v5, %v625_v3  ;;  %v641_v16 = vld [vmem:[#allocation7 + $0x438] sm:$0xff] }
 0x140   : > { %2928 = vmatprep.subr.msk.mxu1 %vm742_vm1, %v733_v42  ;;  %v599_v41 = vld [vmem:[#allocation7 + $0x2e8] sm:$0xff]  ;;  %v593_v42 = vld [vmem:[#allocation7 + $0x2b8] sm:$0xff] }
 0x141   : > { %v3089_v46 = vpack.c.bf16 %v599_v41, %v591_v40  ;;  %v3145_v50 = vpack.c.bf16 %v601_v43, %v593_v42  ;;  %v649_v17 = vld [vmem:[#allocation7 + $0x478] sm:$0xff]  ;;  %v671_v37 = vld [vmem:[#allocation7 + $0x528] sm:$0xff] }
 0x142   : > { %2926 = vmatpush1.msk.msra.mxu0 %vm742_vm1, %v730_v44  ;;  %v3087_v44 = vpack.c.bf16 %v582_v36, %v574_v35  ;;  %v3157_v24 = vpack.c.bf16 %v649_v17, %v641_v16  ;;  %v665_v29 = vld [vmem:[#allocation7 + $0x4f8] sm:$0xff]  ;;  %v664_v36 = vld [vmem:[#allocation7 + $0x4f0] sm:$0xff] }
 0x143   : > { %2929 = vmatpush1.msk.msra.mxu1 %vm742_vm1, %v732_v48  ;;  %832 = vmatmul.mubr.f32.vlgmr.msra.gmra.mrb[0].mxu0 %v4756_v55  ;;  %v598_v48 = vld [vmem:[#allocation7 + $0x2e0] sm:$0xff]  ;;  %v673_v39 = vld [vmem:[#allocation7 + $0x538] sm:$0xff] }
 0x144   : > { %903 = vmatmul.mubr.f32.vlgmr.msra.gmra.mrb[0].mxu1 %v4756_v55  ;;  %3070 = vmatprep.subr.bf16.mxu0 %v3069_v56  ;;  %v617_v56 = vld [vmem:[#allocation7 + $0x378] sm:$0xff]  ;;  %v3091_v57 = vpack.c.bf16 %v598_v48, %v590_v47  ;;  %v680_v48 = vld [vmem:[#allocation7 + $0x570] sm:$0xff] }
 0x145   : > { %3072 = vmatpush1.bf16.msra.mxu0 %v3071_v59  ;;  %3126 = vmatprep.subr.bf16.mxu1 %v3125_v60  ;;  %v3093_v59 = vpack.c.bf16 %v615_v53, %v607_v52  ;;  %v606_v60 = vld [vmem:[#allocation7 + $0x320] sm:$0xff]  ;;  %v3149_v63 = vpack.c.bf16 %v617_v56, %v609_v54  ;;  %v681_v40 = vld [vmem:[#allocation7 + $0x578] sm:$0xff] }
 0x146   : > { %3128 = vmatpush1.bf16.msra.mxu1 %v3127_v61  ;;  %3074 = vmatprep.subr.bf16.mxu0 %v3073_v62  ;;  %v614_v61 = vld [vmem:[#allocation7 + $0x360] sm:$0xff]  ;;  %v608_v62 = vld [vmem:[#allocation7 + $0x330] sm:$0xff]  ;;  %v3165_v47 = vpack.c.bf16 %v681_v40, %v673_v39  ;;  %v689_v51 = vld [vmem:[#allocation7 + $0x5b8] sm:$0xff] }
 0x147   : > { %3130 = vmatprep.subr.bf16.mxu1 %v3129_v2  ;;  %2933 = vmatprep.mubr.msk.f32.mxu0 %vm738_vm0, %v4747_v4  ;;  %v631_v2 = vld [vmem:[#allocation7 + $0x3e8] sm:$0xff]  ;;  %v3095_v6 = vpack.c.bf16 %v614_v61, %v606_v60  ;;  %v3151_v7 = vpack.c.bf16 %v616_v0, %v608_v62  ;;  %v697_v52 = vld [vmem:[#allocation7 + $0x5f8] sm:$0xff]  ;;  %v696_v61 = vld [vmem:[#allocation7 + $0x5f0] sm:$0xff] }
 0x148   : > { %2936 = vmatprep.mubr.msk.f32.mxu1 %vm738_vm0, %v4747_v4  ;;  %v3139_v4 = vpack.c.bf16 %v568_v28, %v560_v26  ;;  %v3097_v8 = vpack.c.bf16 %v631_v2, %v623_v1  ;;  %v655_v26 = vld [vmem:[#allocation7 + $0x4a8] sm:$0xff]  ;;  %v657_v28 = vld [vmem:[#allocation7 + $0x4b8] sm:$0xff]  ;;  %v3169_v60 = vpack.c.bf16 %v697_v52, %v689_v51  ;;  %v4874_v51 = vld [vmem:[%s4724_s21 + $0x30] sm:$0xff] }
 0x149   : > { %3076 = vmatpush1.bf16.msra.mxu0 %v3075_v9  ;;  %v622_v9 = vld [vmem:[#allocation7 + $0x3a0] sm:$0xff]  ;;  %v3161_v35 = vpack.c.bf16 %v665_v29, %v657_v28  ;;  %v703_v62 = vld [vmem:[#allocation7 + $0x628] sm:$0xff]  ;;  %v705_v0 = vld [vmem:[#allocation7 + $0x638] sm:$0xff] }
 0x14a   : > { %3132 = vmatpush1.bf16.msra.mxu1 %v3131_v10  ;;  %3078 = vmatprep.subr.bf16.mxu0 %v3077_v11  ;;  %v630_v10 = vld [vmem:[#allocation7 + $0x3e0] sm:$0xff]  ;;  %v624_v11 = vld [vmem:[#allocation7 + $0x3b0] sm:$0xff]  ;;  %v713_v1 = vld [vmem:[#allocation7 + $0x678] sm:$0xff] }
 0x14b   : > { %3134 = vmatprep.subr.bf16.mxu1 %v3133_v15  ;;  %v647_v15 = vld [vmem:[#allocation7 + $0x468] sm:$0xff]  ;;  %v3099_v18 = vpack.c.bf16 %v630_v10, %v622_v9  ;;  %v3155_v19 = vpack.c.bf16 %v632_v13, %v624_v11  ;;  %v3173_v9 = vpack.c.bf16 %v713_v1, %v705_v0  ;;  %v712_v10 = vld [vmem:[#allocation7 + $0x670] sm:$0xff]  ;;  %v721_v13 = vld [vmem:[#allocation7 + $0x6b8] sm:$0xff] }
 0x14c   : > { %v3101_v20 = vpack.c.bf16 %v647_v15, %v639_v14  ;;  %v719_v11 = vld [vmem:[#allocation7 + $0x6a8] sm:$0xff]  ;;  %v729_v14 = vld [vmem:[#allocation7 + $0x6f8] sm:$0xff]  ;;  %v736_v28 = vld [vmem:[#allocation7 + $0x730] sm:$0x1] }
 0x14d   : > { %3080 = vmatpush1.bf16.msra.mxu0 %v3079_v21  ;;  %v638_v21 = vld [vmem:[#allocation7 + $0x420] sm:$0xff]  ;;  %v4877_v52 = vld [vmem:[%s4724_s21 + $0x28] sm:$0xff] }
 0x14e   : > { %3136 = vmatpush1.bf16.msra.mxu1 %v3135_v22  ;;  %3082 = vmatprep.subr.bf16.mxu0 %v3081_v23  ;;  %v646_v22 = vld [vmem:[#allocation7 + $0x460] sm:$0xff]  ;;  %v640_v23 = vld [vmem:[#allocation7 + $0x430] sm:$0xff] }
 0x14f   : > { %3138 = vmatprep.subr.bf16.mxu1 %v3137_v27  ;;  %v663_v27 = vld [vmem:[#allocation7 + $0x4e8] sm:$0xff]  ;;  %v3103_v30 = vpack.c.bf16 %v646_v22, %v638_v21  ;;  %v3159_v31 = vpack.c.bf16 %v648_v25, %v640_v23  ;;  %v720_v21 = vld [vmem:[#allocation7 + $0x6b0] sm:$0xff]  ;;  %v4773_v29 = vld [vmem:[%s4724_s21] sm:$0xff] }
 0x150   : > { %v3105_v32 = vpack.c.bf16 %v663_v27, %v655_v26  ;;  %v728_v22 = vld [vmem:[#allocation7 + $0x6f0] sm:$0xff]  ;;  %v735_v25 = vld [vmem:[#allocation7 + $0x728] sm:$0x1]  ;;  %v737_v26 = vld [vmem:[#allocation7 + $0x738] sm:$0x1] }
 0x151   : > { %3084 = vmatpush1.bf16.msra.mxu0 %v3083_v33  ;;  %v654_v33 = vld [vmem:[#allocation7 + $0x4a0] sm:$0xff] }
 0x152   : > { %3140 = vmatpush1.bf16.msra.mxu1 %v3139_v4  ;;  %3086 = vmatprep.subr.bf16.mxu0 %v3085_v34  ;;  %v662_v4 = vld [vmem:[#allocation7 + $0x4e0] sm:$0xff]  ;;  %v656_v34 = vld [vmem:[#allocation7 + $0x4b0] sm:$0xff] }
 0x153   : > { %3142 = vmatprep.subr.bf16.mxu1 %v3141_v38  ;;  %v679_v38 = vld [vmem:[#allocation7 + $0x568] sm:$0xff]  ;;  %v3107_v41 = vpack.c.bf16 %v662_v4, %v654_v33  ;;  %v3163_v42 = vpack.c.bf16 %v664_v36, %v656_v34  ;;  %v734_v27 = vld [vmem:[#allocation7 + $0x720] sm:$0x1] }
 0x154   : > { %v3109_v43 = vpack.c.bf16 %v679_v38, %v671_v37  ;;  %v4802_v36 = vld [vmem:[%s4724_s21 + $0x8] sm:$0xff] }
 0x155   : > { %3088 = vmatpush1.bf16.msra.mxu0 %v3087_v44  ;;  %v670_v44 = vld [vmem:[#allocation7 + $0x520] sm:$0xff] }
 0x156   : > { %3144 = vmatpush1.bf16.msra.mxu1 %v3143_v45  ;;  %3090 = vmatprep.subr.bf16.mxu0 %v3089_v46  ;;  %v678_v45 = vld [vmem:[#allocation7 + $0x560] sm:$0xff]  ;;  %v672_v46 = vld [vmem:[#allocation7 + $0x530] sm:$0xff] }
 0x157   : > { %3146 = vmatprep.subr.bf16.mxu1 %v3145_v50  ;;  %v695_v50 = vld [vmem:[#allocation7 + $0x5e8] sm:$0xff]  ;;  %v3111_v53 = vpack.c.bf16 %v678_v45, %v670_v44  ;;  %v3167_v54 = vpack.c.bf16 %v680_v48, %v672_v46  ;;  %v4859_v45 = vld [vmem:[%s4724_s21 + $0x38] sm:$0xff] }
 0x158   : > { %v3113_v56 = vpack.c.bf16 %v695_v50, %v687_v49 }
 0x159   : > { %3092 = vmatpush1.bf16.msra.mxu0 %v3091_v57  ;;  %v686_v57 = vld [vmem:[#allocation7 + $0x5a0] sm:$0xff] }
 0x15a   : > { %3148 = vmatpush1.bf16.msra.mxu1 %v3147_v58  ;;  %3094 = vmatprep.subr.bf16.mxu0 %v3093_v59  ;;  %v694_v58 = vld [vmem:[#allocation7 + $0x5e0] sm:$0xff]  ;;  %v688_v59 = vld [vmem:[#allocation7 + $0x5b0] sm:$0xff] }
 0x15b   : > { %3150 = vmatprep.subr.bf16.mxu1 %v3149_v63  ;;  %v711_v63 = vld [vmem:[#allocation7 + $0x668] sm:$0xff]  ;;  %v3115_v2 = vpack.c.bf16 %v694_v58, %v686_v57  ;;  %v3171_v3 = vpack.c.bf16 %v696_v61, %v688_v59 }
 0x15c   : > { %v3117_v5 = vpack.c.bf16 %v711_v63, %v703_v62  ;;  %v4907_v59 = vld [vmem:[#allocation8 + $0x8] sm:$0xff] }
 0x15d   : > { %3096 = vmatpush1.bf16.msra.mxu0 %v3095_v6  ;;  %v702_v6 = vld [vmem:[#allocation7 + $0x620] sm:$0xff] }
 0x15e   : > { %3152 = vmatpush1.bf16.msra.mxu1 %v3151_v7  ;;  %3098 = vmatprep.subr.bf16.mxu0 %v3097_v8  ;;  %v710_v7 = vld [vmem:[#allocation7 + $0x660] sm:$0xff]  ;;  %v704_v8 = vld [vmem:[#allocation7 + $0x630] sm:$0xff] }
 0x15f   : > { %3154 = vmatprep.subr.bf16.mxu1 %v3153_v12  ;;  %v727_v12 = vld [vmem:[#allocation7 + $0x6e8] sm:$0xff]  ;;  %v3119_v15 = vpack.c.bf16 %v710_v7, %v702_v6  ;;  %v3175_v16 = vpack.c.bf16 %v712_v10, %v704_v8 }
 0x160   : > { %v3121_v17 = vpack.c.bf16 %v727_v12, %v719_v11 }
 0x161   : > { %3100 = vmatpush1.bf16.msra.mxu0 %v3099_v18  ;;  %v718_v18 = vld [vmem:[#allocation7 + $0x6a0] sm:$0xff] }
 0x162   : > { %3156 = vmatpush1.bf16.msra.mxu1 %v3155_v19  ;;  %3102 = vmatprep.subr.bf16.mxu0 %v3101_v20  ;;  %v726_v19 = vld [vmem:[#allocation7 + $0x6e0] sm:$0xff]  ;;  %v3177_v20 = vpack.c.bf16 %v729_v14, %v721_v13 }
 0x163   : > { %3158 = vmatprep.subr.bf16.mxu1 %v3157_v24  ;;  %v3123_v23 = vpack.c.bf16 %v726_v19, %v718_v18  ;;  %v3179_v24 = vpack.c.bf16 %v728_v22, %v720_v21 }
 0x165   : > { %3104 = vmatpush1.bf16.msra.mxu0 %v3103_v30  ;;  %v4776_v30 = vld [vmem:[%s4724_s21 + $0x10] sm:$0xff] }
 0x166   : > { %3160 = vmatpush1.bf16.msra.mxu1 %v3159_v31  ;;  %3106 = vmatprep.subr.bf16.mxu0 %v3105_v32 }
 0x167   : > { %3162 = vmatprep.subr.bf16.mxu1 %v3161_v35 }
 0x169   : > { %3108 = vmatpush1.bf16.msra.mxu0 %v3107_v41 }
 0x16a   : > { %3164 = vmatpush1.bf16.msra.mxu1 %v3163_v42  ;;  %3110 = vmatprep.subr.bf16.mxu0 %v3109_v43  ;;  %v4853_v43 = vld [vmem:[%s4724_s21 + $0x20] sm:$0xff] }
 0x16b   : > { %3166 = vmatprep.subr.bf16.mxu1 %v3165_v47 }
 0x16d   : > { %3112 = vmatpush1.bf16.msra.mxu0 %v3111_v53 }
 0x16e   : > { %3168 = vmatpush1.bf16.msra.mxu1 %v3167_v54  ;;  %3114 = vmatprep.subr.bf16.mxu0 %v3113_v56 }
 0x16f   : > { %3170 = vmatprep.subr.bf16.mxu1 %v3169_v60 }
 0x171   : > { %3116 = vmatpush1.bf16.msra.mxu0 %v3115_v2 }
 0x172   : > { %3172 = vmatpush1.bf16.msra.mxu1 %v3171_v3  ;;  %3118 = vmatprep.subr.bf16.mxu0 %v3117_v5 }
 0x173   : > { %3174 = vmatprep.subr.bf16.mxu1 %v3173_v9  ;;  %v6356_v9 = vlaneseq }
 0x175   : > { %3120 = vmatpush1.bf16.msra.mxu0 %v3119_v15  ;;  %v4959_v12 = vand.u32 127, %v6356_v9 }
 0x176   : > { %3176 = vmatpush1.bf16.msra.mxu1 %v3175_v16  ;;  %3122 = vmatprep.subr.bf16.mxu0 %v3121_v17 }
 0x177   : > { %3178 = vmatprep.subr.bf16.mxu1 %v3177_v20  ;;  %vm1087_vm3 = vcmp.lt.s32.totalorder %v4959_v12, 33  ;;  %vm1136_vm4 = vcmp.lt.s32.totalorder %v4959_v12, 32  ;;  %vm1185_vm5 = vcmp.lt.s32.totalorder %v4959_v12, 31  ;;  %vm1234_vm6 = vcmp.lt.s32.totalorder %v4959_v12, 1 }
 0x178   : > { %vm1283_vm7 = vcmp.lt.s32.totalorder %v4959_v12, 127  ;;  %vm1332_vm8 = vcmp.lt.s32.totalorder %v4959_v12, 97  ;;  %vm1381_vm9 = vcmp.lt.s32.totalorder %v4959_v12, 96  ;;  %vm1430_vm10 = vcmp.lt.s32.totalorder %v4959_v12, 95 }
 0x179   : > { %3124 = vmatpush1.bf16.msra.mxu0 %v3123_v23 }
 0x17a   : > { %3180 = vmatpush1.bf16.msra.mxu1 %v3179_v24  ;;  %2931 = vmatprep.subr.msk.mxu0 %vm742_vm1, %v735_v25 }
 0x17b   : > { %2934 = vmatprep.subr.msk.mxu1 %vm742_vm1, %v737_v26 }
 0x17d   : > { %2932 = vmatpush1.msk.msra.mxu0 %vm742_vm1, %v734_v27 }
 0x17e   : > { %974 = vmatmul.mubr.f32.vlgmr.msra.gmra.mrb[2].mxu0 %v4756_v55  ;;  %2935 = vmatpush1.msk.msra.mxu1 %vm742_vm1, %v736_v28 }
 0x17f   : > { %1045 = vmatmul.mubr.f32.vlgmr.msra.gmra.mrb[2].mxu1 %v4756_v55  ;;  %v4799_v55 = vld [vmem:[%s4724_s21 + $0x18] sm:$0xff]  ;;  %2937 = vmatprep.mubr.msk.f32.mxu0 %vm1447_vm2, %v4907_v59 }
 0x180   : > { %2938 = vmatprep.mubr.msk.f32.mxu1 %vm1447_vm2, %v4907_v59 }
 0x216   : > { %v4778_v31 = vpop.f32.mrb[0].mxu0 }
 0x217   : > { %v4780_v32 = vpop.f32.mrb[0].mxu1  ;;  %v4782_v33 = vpop.f32.mrb[1].mxu0  ;;  %v4786_v4 = vpack.i.bf16 %v4778_v31, %v4773_v29 }
 0x218   : > { %v4790_v34 = vpack.i.bf16 %v4780_v32, %v4776_v30  ;;  %v4792_v35 = vpop.f32.mrb[1].mxu1  ;;  %v3235_v38 = vpack.c.bf16 %v4780_v32, %v4776_v30  ;;  %v3596_v41 = vpack.i.bf16 %v4782_v33, %v4802_v36 }
 0x219   : > { %3527 = vrot.lane.b32.xlu0 %v4786_v4, %s4349_s26  ;;  %v3233_v37 = vpack.c.bf16 %v4792_v35, %v4799_v55  ;;  %v3611_v42 = vpack.i.bf16 %v4792_v35, %v4799_v55 }
 0x21a   : > { %3532 = vrot.lane.b32.xlu1 %v4790_v34, %s4349_s26 }
 0x21d   : > { %3542 = vrot.lane.b32.xlu0 %v4790_v34, %s4350_s29 }
 0x21e   : > { %3537 = vrot.lane.b32.xlu1 %v4786_v4, %s4350_s29 }
 0x221   : > { %3547 = vrot.lane.b32.xlu0 %v4786_v4, %s4351_s18 }
 0x222   : > { %3552 = vrot.lane.b32.xlu1 %v4790_v34, %s4351_s18 }
 0x225   : > { %3562 = vrot.lane.b32.xlu0 %v4790_v34, %s4352_s27 }
 0x226   : > { %3557 = vrot.lane.b32.xlu1 %v4786_v4, %s4352_s27 }
 0x229   : > { %3572 = vrot.lane.b32.xlu0 %v4786_v4, %s4353_s22 }
 0x22a   : > { %3567 = vrot.lane.b32.xlu1 %v4790_v34, %s4353_s22 }
 0x22d   : > { %3577 = vrot.lane.b32.xlu0 %v4790_v34, %s4354_s2 }
 0x22e   : > { %3582 = vrot.lane.b32.xlu1 %v4786_v4, %s4354_s2 }
 0x231   : > { %3592 = vrot.lane.b32.xlu0 %v4786_v4, %s4355_s12 }
 0x232   : > { %3587 = vrot.lane.b32.xlu1 %v4790_v34, %s4355_s12 }
 0x235   : > { %3597 = vrot.lane.b32.xlu0 %v3596_v41, %s4349_s26 }
 0x236   : > { %3612 = vrot.lane.b32.xlu1 %v3611_v42, %s4350_s29 }
 0x239   : > { %3602 = vrot.lane.b32.xlu0 %v3611_v42, %s4349_s26 }
 0x23a   : > { %3617 = vrot.lane.b32.xlu1 %v3596_v41, %s4351_s18 }
 0x23d   : > { %3607 = vrot.lane.b32.xlu0 %v3596_v41, %s4350_s29 }
 0x23e   : > { %3632 = vrot.lane.b32.xlu1 %v3611_v42, %s4352_s27 }
 0x241   : > { %3622 = vrot.lane.b32.xlu0 %v3611_v42, %s4351_s18 }
 0x242   : > { %3642 = vrot.lane.b32.xlu1 %v3611_v42, %s4353_s22 }
 0x245   : > { %3627 = vrot.lane.b32.xlu0 %v3596_v41, %s4352_s27 }
 0x246   : > { %3647 = vrot.lane.b32.xlu1 %v3596_v41, %s4354_s2 }
 0x249   : > { %3637 = vrot.lane.b32.xlu0 %v3596_v41, %s4353_s22 }
 0x24d   : > { %3652 = vrot.lane.b32.xlu0 %v3611_v42, %s4354_s2 }
 0x251   : > { %v4855_v44 = vpop.f32.mrb[2].mxu0  ;;  %3657 = vrot.lane.b32.xlu0 %v3596_v41, %s4355_s12 }
 0x252   : > { %v4861_v46 = vpop.f32.mrb[3].mxu0  ;;  %v4863_v47 = vpop.f32.mrb[2].mxu1  ;;  %v3666_v48 = vpack.i.bf16 %v4855_v44, %v4853_v43 }
 0x253   : > { %v4867_v49 = vpop.f32.mrb[3].mxu1  ;;  %v3731_v58 = vpack.i.bf16 %v4863_v47, %v4874_v51  ;;  %v3766_v60 = vpack.i.bf16 %v4861_v46, %v4877_v52 }
 0x254   : > { %3667 = vrot.lane.b32.xlu1 %v3666_v48, %s4354_s2  ;;  %v3671_v50 = vpack.i.bf16 %v4867_v49, %v4859_v45 }
 0x255   : > { %3662 = vrot.lane.b32.xlu0 %v3666_v48, %s4353_s22 }
 0x258   : > { %3672 = vrot.lane.b32.xlu1 %v3671_v50, %s4349_s26 }
 0x259   : > { %3687 = vrot.lane.b32.xlu0 %v3671_v50, %s4351_s18 }
 0x25c   : > { %3677 = vrot.lane.b32.xlu1 %v3671_v50, %s4350_s29 }
 0x25d   : > { %3692 = vrot.lane.b32.xlu0 %v3666_v48, %s4355_s12 }
 0x260   : > { %3682 = vrot.lane.b32.xlu1 %v3611_v42, %s4355_s12 }
 0x261   : > { %3707 = vrot.lane.b32.xlu0 %v4790_v34, %s4356_s6 }
 0x264   : > { %3697 = vrot.lane.b32.xlu1 %v3671_v50, %s4352_s27 }
 0x265   : > { %3717 = vrot.lane.b32.xlu0 %v3666_v48, %s4349_s26 }
 0x268   : > { %3702 = vrot.lane.b32.xlu1 %v3596_v41, %s4356_s6 }
 0x269   : > { %3722 = vrot.lane.b32.xlu0 %v3611_v42, %s4356_s6 }
 0x26c   : > { %3712 = vrot.lane.b32.xlu1 %v4786_v4, %s4356_s6 }
 0x26d   : > { %3732 = vrot.lane.b32.xlu0 %v3731_v58, %s4349_s26 }
 0x270   : > { %3727 = vrot.lane.b32.xlu1 %v3666_v48, %s4356_s6 }
 0x271   : > { %3747 = vrot.lane.b32.xlu0 %v3666_v48, %s4351_s18 }
 0x274   : > { %3737 = vrot.lane.b32.xlu1 %v3666_v48, %s4350_s29 }
 0x275   : > { %3752 = vrot.lane.b32.xlu0 %v3731_v58, %s4351_s18 }
 0x278   : > { %3742 = vrot.lane.b32.xlu1 %v3731_v58, %s4350_s29 }
 0x279   : > { %3767 = vrot.lane.b32.xlu0 %v3766_v60, %s4350_s29 }
 0x27c   : > { %3757 = vrot.lane.b32.xlu1 %v3766_v60, %s4349_s26 }
 0x27d   : > { %3787 = vrot.lane.b32.xlu0 %v3731_v58, %s4354_s2 }
 0x280   : > { %3762 = vrot.lane.b32.xlu1 %v3666_v48, %s4352_s27 }
 0x281   : > { %3797 = vrot.lane.b32.xlu0 %v3766_v60, %s4352_s27 }
 0x284   : > { %3772 = vrot.lane.b32.xlu1 %v3766_v60, %s4351_s18 }
 0x285   : > { %3802 = vrot.lane.b32.xlu0 %v3766_v60, %s4353_s22 }
 0x288   : > { %3777 = vrot.lane.b32.xlu1 %v3731_v58, %s4352_s27 }
 0x289   : > { %3807 = vrot.lane.b32.xlu0 %v3671_v50, %s4353_s22 }
 0x28b   : > { %v4925_v61 = vpop.permute.xlu0 %3527 }
 0x28c   : > { %v3533_v62 = vpop.permute.xlu1 %3532  ;;  %3782 = vrot.lane.b32.xlu1 %v3731_v58, %s4353_s22  ;;  %v3530_v15 = vunpack.i.h.bf16 %v4925_v61  ;;  %v3529_v16 = vunpack.i.l.bf16 %v4925_v61 }
 0x28d   : > { %3822 = vrot.lane.b32.xlu0 %v3766_v60, %s4355_s12  ;;  %v3535_v24 = vunpack.i.h.bf16 %v3533_v62  ;;  %v3534_v25 = vunpack.i.l.bf16 %v3533_v62 }
 0x28f   : > { %v4929_v63 = vpop.permute.xlu0 %3542 }
 0x290   : > { %v4931_v0 = vpop.permute.xlu1 %3537  ;;  %3792 = vrot.lane.b32.xlu1 %v3731_v58, %s4355_s12  ;;  %v3545_v28 = vunpack.i.h.bf16 %v4929_v63  ;;  %v3544_v4 = vunpack.i.l.bf16 %v4929_v63 }
 0x291   : > { %3827 = vrot.lane.b32.xlu0 %v3671_v50, %s4355_s12 }
 0x293   : > { %v4935_v1 = vpop.permute.xlu0 %3547 }
 0x294   : > { %v4937_v2 = vpop.permute.xlu1 %3552  ;;  %3812 = vrot.lane.b32.xlu1 %v3766_v60, %s4354_s2 }
 0x295   : > { %3832 = vrot.lane.b32.xlu0 %v3731_v58, %s4356_s6 }
 0x297   : > { %v4941_v3 = vpop.permute.xlu0 %3562 }
 0x298   : > { %v4943_v5 = vpop.permute.xlu1 %3557  ;;  %3817 = vrot.lane.b32.xlu1 %v3671_v50, %s4354_s2 }
 0x29b   : > { %v4946_v6 = vpop.permute.xlu0 %3572 }
 0x29c   : > { %v4948_v7 = vpop.permute.xlu1 %3567  ;;  %3837 = vrot.lane.b32.xlu1 %v3766_v60, %s4356_s6 }
 0x29d   : > { %v6363_v55 = vunpack.i.h.bf16 %v4948_v7  ;;  %v6364_v30 = vunpack.i.l.bf16 %v4948_v7 }
 0x29f   : > { %v4951_v8 = vpop.permute.xlu0 %3577 }
 0x2a0   : > { %v4953_v10 = vpop.permute.xlu1 %3582  ;;  %3842 = vrot.lane.b32.xlu1 %v3671_v50, %s4356_s6 }
 0x2a3   : > { %v4956_v11 = vpop.permute.xlu0 %3592 }
 0x2a4   : > { %v4961_v13 = vpop.permute.xlu1 %3587 }
 0x2a7   : > { %v3598_v14 = vpop.permute.xlu0 %3597 }
 0x2a8   : > { %v4966_v17 = vpop.permute.xlu1 %3612  ;;  %v3600_v18 = vunpack.i.h.bf16 %v3598_v14  ;;  %v3599_v19 = vunpack.i.l.bf16 %v3598_v14 }
 0x2a9   : > { %v6358_v20 = vunpack.i.h.bf16 %v4966_v17  ;;  %v6357_v21 = vunpack.i.l.bf16 %v4966_v17 }
 0x2aa   : > { %v1100_v22 = vsel %vm1087_vm3, %v3529_v16, %v3599_v19  ;;  %v1101_v23 = vsel %vm1087_vm3, %v3530_v15, %v3600_v18  ;;  %v1099_v48 = vsel %vm1087_vm3, %v3600_v18, %v3535_v24  ;;  %v1098_v50 = vsel %vm1087_vm3, %v3599_v19, %v3534_v25 }
 0x2ab   : > { %v4978_v26 = vpop.permute.xlu0 %3602  ;;  %v3181_v27 = vpack.c.bf16 %v1101_v23, %v1100_v22  ;;  %v1145_v62 = vsel %vm1136_vm4, %v3544_v4, %v6357_v21  ;;  %v1146_v63 = vsel %vm1136_vm4, %v3545_v28, %v6358_v20  ;;  %v3219_v19 = vpack.c.bf16 %v1099_v48, %v1098_v50 }
 0x2ac   : > { %v4983_v34 = vpop.permute.xlu1 %3617  ;;  %v6366_v41 = vunpack.i.h.bf16 %v4978_v26  ;;  %v6365_v42 = vunpack.i.l.bf16 %v4978_v26  ;;  %v3221_v9 = vpack.c.bf16 %v1146_v63, %v1145_v62 }
 0x2ad   : > { %3182 = vmatprep.subr.bf16.mxu0 %v3181_v27  ;;  %v3619_v27 = vunpack.i.l.bf16 %v4983_v34 }
 0x2ae   : > { %v1096_v58 = vsel %vm1087_vm3, %v3534_v25, %v6365_v42  ;;  %v1097_v60 = vsel %vm1087_vm3, %v3535_v24, %v6366_v41  ;;  %v3620_v25 = vunpack.i.h.bf16 %v4983_v34  ;;  %v3579_v42 = vunpack.i.l.bf16 %v4951_v8 }
 0x2af   : > { %v5007_v14 = vpop.permute.xlu0 %3607  ;;  %v3217_v18 = vpack.c.bf16 %v1097_v60, %v1096_v58  ;;  %v3555_v58 = vunpack.i.h.bf16 %v4937_v2  ;;  %v3554_v60 = vunpack.i.l.bf16 %v4937_v2 }
 0x2b0   : > { %v5009_v22 = vpop.permute.xlu1 %3632  ;;  %v3610_v23 = vunpack.i.h.bf16 %v5007_v14  ;;  %v3609_v24 = vunpack.i.l.bf16 %v5007_v14 }
 0x2b1   : > { %3218 = vmatprep.subr.bf16.mxu1 %v3217_v18  ;;  %v6360_v56 = vunpack.i.h.bf16 %v5009_v22  ;;  %v6359_v57 = vunpack.i.l.bf16 %v5009_v22  ;;  %v3565_v18 = vunpack.i.h.bf16 %v4941_v3  ;;  %v1196_v2 = vsel %vm1185_vm5, %v3619_v27, %v3554_v60 }
 0x2b2   : > { %v1148_v48 = vsel %vm1136_vm4, %v3610_v23, %v3545_v28  ;;  %v1147_v50 = vsel %vm1136_vm4, %v3609_v24, %v3544_v4  ;;  %3220 = vmatpush1.bf16.msra.mxu1 %v3219_v19  ;;  %v3564_v28 = vunpack.i.l.bf16 %v4941_v3  ;;  %v1197_v4 = vsel %vm1185_vm5, %v3620_v25, %v3555_v58 }
 0x2b3   : > { %v3223_v62 = vpack.c.bf16 %v1148_v48, %v1147_v50  ;;  %v5028_v63 = vpop.permute.xlu0 %3622  ;;  %3222 = vmatprep.subr.bf16.mxu1 %v3221_v9  ;;  %v1244_v48 = vsel %vm1234_vm6, %v3565_v18, %v6360_v56  ;;  %v3227_v21 = vpack.c.bf16 %v1197_v4, %v1196_v2 }
 0x2b4   : > { %v6362_v53 = vunpack.i.h.bf16 %v5028_v63  ;;  %v6361_v54 = vunpack.i.l.bf16 %v5028_v63  ;;  %v1243_v19 = vsel %vm1234_vm6, %v3564_v28, %v6359_v57  ;;  %v3643_v4 = vpop.permute.xlu1 %3642 }
 0x2b6   : > { %3224 = vmatpush1.bf16.msra.mxu1 %v3223_v62  ;;  %v1194_v3 = vsel %vm1185_vm5, %v3554_v60, %v6361_v54  ;;  %v1195_v9 = vsel %vm1185_vm5, %v3555_v58, %v6362_v53  ;;  %v3229_v58 = vpack.c.bf16 %v1244_v48, %v1243_v19 }
 0x2b7   : > { %v5059_v50 = vpop.permute.xlu0 %3627  ;;  %v3225_v62 = vpack.c.bf16 %v1195_v9, %v1194_v3 }
 0x2b8   : > { %v6368_v60 = vunpack.i.h.bf16 %v5059_v50  ;;  %v3629_v20 = vunpack.i.l.bf16 %v5059_v50  ;;  %v5076_v9 = vpop.permute.xlu1 %3647 }
 0x2b9   : > { %3226 = vmatprep.subr.bf16.mxu1 %v3225_v62 }
 0x2ba   : > { %v1246_v57 = vsel %vm1234_vm6, %v6368_v60, %v3565_v18  ;;  %v1245_v56 = vsel %vm1234_vm6, %v3629_v20, %v3564_v28  ;;  %3228 = vmatpush1.bf16.msra.mxu1 %v3227_v21  ;;  %v3540_v21 = vunpack.i.h.bf16 %v4931_v0  ;;  %v3550_v28 = vunpack.i.h.bf16 %v4935_v1 }
 0x2bb   : > { %v3231_v54 = vpack.c.bf16 %v1246_v57, %v1245_v56  ;;  %v5071_v3 = vpop.permute.xlu0 %3637  ;;  %3230 = vmatprep.subr.bf16.mxu1 %v3229_v58  ;;  %v3645_v56 = vunpack.i.h.bf16 %v3643_v4  ;;  %v3644_v57 = vunpack.i.l.bf16 %v3643_v4  ;;  %v3549_v58 = vunpack.i.l.bf16 %v4935_v1 }
 0x2bc   : > { %v3580_v4 = vunpack.i.h.bf16 %v4951_v8  ;;  %v6424_v8 = vpack.c.bf16 %v4778_v31, %v4773_v29 }
 0x2bd   : > { %v1293_v53 = vsel %vm1283_vm7, %v6363_v55, %v3645_v56  ;;  %v1292_v40 = vsel %vm1283_vm7, %v6364_v30, %v3644_v57  ;;  %v1198_v61 = vsel %vm1185_vm5, %v3549_v58, %v3619_v27  ;;  %v3590_v27 = vunpack.i.h.bf16 %v4961_v13 }
 0x2be   : > { %3232 = vmatpush1.bf16.msra.mxu1 %v3231_v54  ;;  %v3539_v54 = vunpack.i.l.bf16 %v4931_v0 }
 0x2bf   : > { %v3653_v2 = vpop.permute.xlu0 %3652  ;;  %3234 = vmatprep.subr.bf16.mxu1 %v3233_v37 }
 0x2c0   : > { %v3655_v19 = vunpack.i.h.bf16 %v3653_v2  ;;  %v3654_v48 = vunpack.i.l.bf16 %v3653_v2 }
 0x2c2   : > { %3236 = vmatpush1.bf16.msra.mxu1 %v3235_v38 }
 0x2c3   : > { %v5081_v18 = vpop.permute.xlu0 %3657 }
 0x2c6   : > { %v5088_v35 = vpop.permute.xlu1 %3667 }
 0x2c7   : > { %v6370_v32 = vunpack.i.h.bf16 %v5088_v35  ;;  %v6369_v37 = vunpack.i.l.bf16 %v5088_v35  ;;  %v5094_v38 = vpop.permute.xlu0 %3662 }
 0x2c8   : > { %v6371_v0 = vunpack.i.h.bf16 %v5094_v38  ;;  %v6367_v62 = vunpack.i.l.bf16 %v5094_v38 }
 0x2c9   : > { %v1339_v55 = vsel %vm1332_vm8, %v3654_v48, %v6369_v37  ;;  %v1340_v30 = vsel %vm1332_vm8, %v3655_v19, %v6370_v32  ;;  %v1342_v37 = vsel %vm1332_vm8, %v3580_v4, %v3655_v19  ;;  %v1149_v32 = vsel %vm1136_vm4, %v3539_v54, %v3609_v24 }
 0x2ca   : > { %v5108_v39 = vpop.permute.xlu1 %3672  ;;  %v1290_v2 = vsel %vm1283_vm7, %v3644_v57, %v6367_v62  ;;  %v1291_v1 = vsel %vm1283_vm7, %v3645_v56, %v6371_v0  ;;  %v3239_v56 = vpack.c.bf16 %v1293_v53, %v1292_v40  ;;  %v1150_v0 = vsel %vm1136_vm4, %v3540_v21, %v3610_v23 }
 0x2cb   : > { %v3675_v41 = vunpack.i.h.bf16 %v5108_v39  ;;  %v3674_v57 = vunpack.i.l.bf16 %v5108_v39  ;;  %v5129_v62 = vpop.permute.xlu0 %3687  ;;  %v3237_v60 = vpack.c.bf16 %v1291_v1, %v1290_v2  ;;  %v1341_v40 = vsel %vm1332_vm8, %v3579_v42, %v3654_v48 }
 0x2cc   : > { %v3241_v23 = vpack.c.bf16 %v1340_v30, %v1339_v55  ;;  %v6372_v19 = vunpack.i.h.bf16 %v5129_v62  ;;  %v6373_v48 = vunpack.i.l.bf16 %v5129_v62  ;;  %v1199_v55 = vsel %vm1185_vm5, %v3550_v28, %v3620_v25 }
 0x2cd   : > { %v1103_v53 = vsel %vm1087_vm3, %v3675_v41, %v3530_v15  ;;  %v1102_v14 = vsel %vm1087_vm3, %v3674_v57, %v3529_v16  ;;  %3238 = vmatprep.subr.bf16.mxu1 %v3237_v60  ;;  %v3185_v60 = vpack.c.bf16 %v1150_v0, %v1149_v32  ;;  %v3560_v30 = vunpack.i.h.bf16 %v4943_v5 }
 0x2ce   : > { %v3183_v24 = vpack.c.bf16 %v1103_v53, %v1102_v14  ;;  %v5161_v2 = vpop.permute.xlu1 %3677  ;;  %3240 = vmatpush1.bf16.msra.mxu1 %v3239_v56  ;;  %v3559_v56 = vunpack.i.l.bf16 %v4943_v5  ;;  %v3243_v53 = vpack.c.bf16 %v1342_v37, %v1341_v40  ;;  %v3589_v14 = vunpack.i.l.bf16 %v4961_v13 }
 0x2cf   : > { %v6374_v15 = vunpack.i.h.bf16 %v5161_v2  ;;  %v3679_v1 = vunpack.i.l.bf16 %v5161_v2  ;;  %v5169_v16 = vpop.permute.xlu0 %3692  ;;  %3242 = vmatprep.subr.bf16.mxu1 %v3241_v23  ;;  %v1201_v5 = vsel %vm1185_vm5, %v6372_v19, %v3550_v28  ;;  %v1200_v25 = vsel %vm1185_vm5, %v6373_v48, %v3549_v58 }
 0x2d0   : > { %3184 = vmatpush1.bf16.msra.mxu0 %v3183_v24  ;;  %v6376_v40 = vunpack.i.h.bf16 %v5169_v16  ;;  %v6375_v23 = vunpack.i.l.bf16 %v5169_v16  ;;  %v1247_v28 = vsel %vm1234_vm6, %v3559_v56, %v3629_v20  ;;  %v6418_v58 = vunpack.i.h.bf16 %v5059_v50 }
 0x2d1   : > { %v1152_v32 = vsel %vm1136_vm4, %v6374_v15, %v3540_v21  ;;  %v1151_v34 = vsel %vm1136_vm4, %v3679_v1, %v3539_v54  ;;  %3186 = vmatprep.subr.bf16.mxu0 %v3185_v60  ;;  %v3189_v21 = vpack.c.bf16 %v1199_v55, %v1198_v61  ;;  %v3640_v15 = vunpack.i.h.bf16 %v5071_v3 }
 0x2d2   : > { %v3187_v37 = vpack.c.bf16 %v1152_v32, %v1151_v34  ;;  %v3683_v0 = vpop.permute.xlu1 %3682  ;;  %3244 = vmatpush1.bf16.msra.mxu1 %v3243_v53  ;;  %v1248_v61 = vsel %vm1234_vm6, %v3560_v30, %v6418_v58  ;;  %v3191_v32 = vpack.c.bf16 %v1201_v5, %v1200_v25  ;;  %v3650_v5 = vunpack.i.h.bf16 %v5076_v9 }
 0x2d3   : > { %v3685_v54 = vunpack.i.h.bf16 %v3683_v0  ;;  %v3684_v24 = vunpack.i.l.bf16 %v3683_v0  ;;  %v5197_v60 = vpop.permute.xlu0 %3707  ;;  %v3193_v48 = vpack.c.bf16 %v1248_v61, %v1247_v28  ;;  %v3649_v25 = vunpack.i.l.bf16 %v5076_v9 }
 0x2d4   : > { %3188 = vmatpush1.bf16.msra.mxu0 %v3187_v37  ;;  %v6381_v61 = vunpack.i.h.bf16 %v4946_v6 }
 0x2d5   : > { %v1391_v55 = vsel %vm1381_vm9, %v3590_v27, %v3685_v54  ;;  %v1390_v53 = vsel %vm1381_vm9, %v3589_v14, %v3684_v24  ;;  %3190 = vmatprep.subr.bf16.mxu0 %v3189_v21  ;;  %v1388_v20 = vsel %vm1381_vm9, %v3684_v24, %v6375_v23  ;;  %v1389_v50 = vsel %vm1381_vm9, %v3685_v54, %v6376_v40 }
 0x2d6   : > { %v3247_v34 = vpack.c.bf16 %v1391_v55, %v1390_v53  ;;  %v5224_v37 = vpop.permute.xlu1 %3697  ;;  %v3245_v0 = vpack.c.bf16 %v1389_v50, %v1388_v20  ;;  %v3639_v24 = vunpack.i.l.bf16 %v5071_v3  ;;  %v6419_v53 = vunpack.i.h.bf16 %v4978_v26 }
 0x2d7   : > { %v6377_v58 = vunpack.i.h.bf16 %v5224_v37  ;;  %v6378_v19 = vunpack.i.l.bf16 %v5224_v37  ;;  %v5228_v21 = vpop.permute.xlu0 %3717  ;;  %v3574_v20 = vunpack.i.l.bf16 %v4946_v6  ;;  %v6379_v50 = vunpack.i.h.bf16 %v4953_v10 }
 0x2d8   : > { %v3720_v23 = vunpack.i.h.bf16 %v5228_v21  ;;  %v3719_v54 = vunpack.i.l.bf16 %v5228_v21  ;;  %3192 = vmatpush1.bf16.msra.mxu0 %v3191_v32  ;;  %3246 = vmatprep.subr.bf16.mxu1 %v3245_v0  ;;  %v6380_v32 = vunpack.i.l.bf16 %v4953_v10 }
 0x2d9   : > { %v1250_v28 = vsel %vm1234_vm6, %v6377_v58, %v3560_v30  ;;  %v1249_v3 = vsel %vm1234_vm6, %v6378_v19, %v3559_v56  ;;  %3194 = vmatprep.subr.bf16.mxu0 %v3193_v48  ;;  %3248 = vmatpush1.bf16.msra.mxu1 %v3247_v34  ;;  %v6420_v30 = vunpack.i.l.bf16 %v4978_v26  ;;  %v3659_v26 = vunpack.i.l.bf16 %v5081_v18 }
 0x2da   : > { %v3195_v55 = vpack.c.bf16 %v1250_v28, %v1249_v3  ;;  %v5252_v9 = vsel %vm1087_vm3, %v6419_v53, %v3720_v23  ;;  %v5262_v48 = vpop.permute.xlu1 %3702  ;;  %v3660_v28 = vunpack.i.h.bf16 %v5081_v18  ;;  %v6421_v3 = vunpack.i.l.bf16 %v4948_v7 }
 0x2db   : > { %v5260_v56 = vsel %vm1087_vm3, %v6420_v30, %v3719_v54  ;;  %v3723_v0 = vpop.permute.xlu0 %3722  ;;  %v6422_v30 = vunpack.i.h.bf16 %v4948_v7  ;;  %v1346_v58 = vsel %vm1332_vm8, %v6379_v50, %v3650_v5  ;;  %v1345_v18 = vsel %vm1332_vm8, %v6380_v32, %v3649_v25 }
 0x2dc   : > { %3196 = vmatpush1.bf16.msra.mxu0 %v3195_v55  ;;  %v1294_v53 = vsel %vm1283_vm7, %v3639_v24, %v6421_v3  ;;  %v3725_v55 = vunpack.i.h.bf16 %v3723_v0  ;;  %v3724_v19 = vunpack.i.l.bf16 %v3723_v0  ;;  %v6423_v3 = vpack.c.bf16 %v4782_v33, %v4802_v36 }
 0x2dd   : > { %v1295_v40 = vsel %vm1283_vm7, %v3640_v15, %v6422_v30  ;;  %v6382_v7 = vunpack.i.h.bf16 %v4956_v11  ;;  %v1297_v30 = vsel %vm1283_vm7, %v6381_v61, %v3640_v15  ;;  %v1343_v50 = vsel %vm1332_vm8, %v3649_v25, %v3579_v42 }
 0x2de   : > { %3198 = vmatprep.subr.bf16.mxu0 %v6423_v3  ;;  %v5295_v34 = vpop.permute.xlu1 %3712  ;;  %v1344_v33 = vsel %vm1332_vm8, %v3650_v5, %v3580_v4  ;;  %v1296_v36 = vsel %vm1283_vm7, %v3574_v20, %v3639_v24  ;;  %v3710_v0 = vunpack.i.h.bf16 %v5197_v60  ;;  %v3709_v15 = vunpack.i.l.bf16 %v5197_v60 }
 0x2df   : > { %v5311_v3 = vpop.permute.xlu0 %3732  ;;  %v3201_v32 = vpack.c.bf16 %v1295_v40, %v1294_v53  ;;  %v3594_v61 = vunpack.i.l.bf16 %v4956_v11  ;;  %v3207_v42 = vpack.c.bf16 %v1346_v58, %v1345_v18  ;;  %v1392_v4 = vsel %vm1381_vm9, %v3659_v26, %v3589_v14 }
 0x2e0   : > { %3200 = vmatpush1.bf16.msra.mxu0 %v6424_v8  ;;  %v1393_v60 = vsel %vm1381_vm9, %v3660_v28, %v3590_v27  ;;  %v1439_v40 = vsel %vm1430_vm10, %v3709_v15, %v3724_v19  ;;  %v1440_v58 = vsel %vm1430_vm10, %v3710_v0, %v3725_v55  ;;  %v3735_v24 = vunpack.i.h.bf16 %v5311_v3 }
 0x2e1   : > { %v3734_v29 = vunpack.i.l.bf16 %v5311_v3  ;;  %3202 = vmatprep.subr.bf16.mxu0 %v3201_v32  ;;  %v3203_v31 = vpack.c.bf16 %v1297_v30, %v1296_v36  ;;  %v1395_v13 = vsel %vm1381_vm9, %v6382_v7, %v3660_v28  ;;  %v1394_v27 = vsel %vm1381_vm9, %v3594_v61, %v3659_v26 }
 0x2e2   : > { %v5339_v14 = vpop.permute.xlu1 %3727  ;;  %v3205_v5 = vpack.c.bf16 %v1344_v33, %v1343_v50  ;;  %v3705_v25 = vunpack.i.h.bf16 %v5262_v48  ;;  %v3209_v30 = vpack.c.bf16 %v1393_v60, %v1392_v4  ;;  %v3704_v36 = vunpack.i.l.bf16 %v5262_v48 }
 0x2e3   : > { %v6384_v53 = vunpack.i.h.bf16 %v5339_v14  ;;  %v6383_v32 = vunpack.i.l.bf16 %v5339_v14  ;;  %v5344_v18 = vpop.permute.xlu0 %3747  ;;  %v3251_v28 = vpack.c.bf16 %v1440_v58, %v1439_v40  ;;  %v1088_v48 = vsel %vm1087_vm3, %v3734_v29, %v3674_v57 }
 0x2e4   : > { %v3750_v8 = vunpack.i.h.bf16 %v5344_v18  ;;  %v3749_v7 = vunpack.i.l.bf16 %v5344_v18  ;;  %3204 = vmatpush1.bf16.msra.mxu0 %v3203_v31  ;;  %v1089_v33 = vsel %vm1087_vm3, %v3735_v24, %v3675_v41  ;;  %v6426_v57 = vunpack.i.l.bf16 %v5028_v63 }
 0x2e5   : > { %3206 = vmatprep.subr.bf16.mxu0 %v3205_v5  ;;  %v1437_v50 = vsel %vm1430_vm10, %v3724_v19, %v6383_v32  ;;  %v1438_v26 = vsel %vm1430_vm10, %v3725_v55, %v6384_v53  ;;  %v6386_v19 = vunpack.i.h.bf16 %v5295_v34  ;;  %v6425_v55 = vunpack.i.h.bf16 %v5028_v63 }
 0x2e6   : > { %v5384_v39 = vsel %vm1185_vm5, %v6426_v57, %v3749_v7  ;;  %v3738_v60 = vpop.permute.xlu1 %3737  ;;  %v3249_v41 = vpack.c.bf16 %v1438_v26, %v1437_v50  ;;  %v6385_v40 = vunpack.i.l.bf16 %v5295_v34  ;;  %v1441_v63 = vsel %vm1430_vm10, %v3704_v36, %v3709_v15 }
 0x2e7   : > { %v5376_v4 = vsel %vm1185_vm5, %v6425_v55, %v3750_v8  ;;  %v3740_v31 = vunpack.i.h.bf16 %v3738_v60  ;;  %v3739_v5 = vunpack.i.l.bf16 %v3738_v60  ;;  %v5389_v32 = vpop.permute.xlu0 %3752  ;;  %v3289_v55 = vpack.c.bf16 %v1089_v33, %v1088_v48 }
 0x2e8   : > { %v3263_v58 = vpack.c.bf16 %v5376_v4, %v5384_v39  ;;  %3208 = vmatpush1.bf16.msra.mxu0 %v3207_v42  ;;  %3250 = vmatprep.subr.bf16.mxu1 %v3249_v41  ;;  %v1442_v57 = vsel %vm1430_vm10, %v3705_v25, %v3710_v0  ;;  %v6427_v50 = vunpack.i.h.bf16 %v4966_v17  ;;  %v6428_v53 = vunpack.i.l.bf16 %v4966_v17  ;;  %v5407_v42 = vld [vmem:[#allocation8] sm:$0xff] }
 0x2e9   : > { %3210 = vmatprep.subr.bf16.mxu0 %v3209_v30  ;;  %3252 = vmatpush1.bf16.msra.mxu1 %v3251_v28  ;;  %v3211_v15 = vpack.c.bf16 %v1395_v13, %v1394_v27  ;;  %v1443_v33 = vsel %vm1430_vm10, %v6385_v40, %v3704_v36  ;;  %v1444_v17 = vsel %vm1430_vm10, %v6386_v19, %v3705_v25  ;;  %v3754_v40 = vunpack.i.l.bf16 %v5389_v32 }
 0x2ea   : > { %v5399_v26 = vsel %vm1136_vm4, %v6427_v50, %v3740_v31  ;;  %v5405_v60 = vsel %vm1136_vm4, %v6428_v53, %v3739_v5  ;;  %v3743_v48 = vpop.permute.xlu1 %3742  ;;  %3290 = vmatprep.subr.bf16.mxu1 %v3289_v55  ;;  %v3213_v30 = vpack.c.bf16 %v1442_v57, %v1441_v63  ;;  %v3215_v55 = vpack.c.bf16 %v1444_v17, %v1443_v33 }
 0x2eb   : > { %v3259_v0 = vpack.c.bf16 %v5399_v26, %v5405_v60  ;;  %v3768_v53 = vpop.permute.xlu0 %3767  ;;  %v3745_v28 = vunpack.i.h.bf16 %v3743_v48  ;;  %v3744_v41 = vunpack.i.l.bf16 %v3743_v48  ;;  %v3755_v50 = vunpack.i.h.bf16 %v5389_v32 }
 0x2ec   : > { %3212 = vmatpush1.bf16.msra.mxu0 %v3211_v15  ;;  %v3770_v13 = vunpack.i.h.bf16 %v3768_v53  ;;  %v3769_v27 = vunpack.i.l.bf16 %v3768_v53  ;;  %1587 = vmatmul.mubr.f32.vlgmr.msra.gmra.mrb[4].mxu1 %v5407_v42  ;;  %v6429_v15 = vunpack.i.h.bf16 %v5161_v2 }
 0x2ed   : > { %3214 = vmatprep.subr.bf16.mxu0 %v3213_v30  ;;  %2940 = vmatprep.mubr.msk.f32.mxu1 %vm1447_vm2, %v4907_v59  ;;  %v1137_v57 = vsel %vm1136_vm4, %v3744_v41, %v3679_v1 }
 0x2ee   : > { %v3758_v36 = vpop.permute.xlu1 %3757  ;;  %v1138_v48 = vsel %vm1136_vm4, %v3745_v28, %v6429_v15  ;;  %v1141_v33 = vsel %vm1136_vm4, %v3739_v5, %v3769_v27  ;;  %v1142_v32 = vsel %vm1136_vm4, %v3740_v31, %v3770_v13  ;;  %v1139_v3 = vsel %vm1136_vm4, %v3769_v27, %v3744_v41 }
 0x2ef   : > { %v3760_v25 = vunpack.i.h.bf16 %v3758_v36  ;;  %v3759_v19 = vunpack.i.l.bf16 %v3758_v36  ;;  %v5424_v63 = vpop.permute.xlu0 %3787  ;;  %v3257_v36 = vpack.c.bf16 %v1142_v32, %v1141_v33  ;;  %v6432_v41 = vpack.c.bf16 %v5252_v9, %v5260_v56 }
 0x2f0   : > { %3216 = vmatpush1.bf16.msra.mxu0 %v3215_v55  ;;  %v3293_v55 = vpack.c.bf16 %v1138_v48, %v1137_v57 }
 0x2f1   : > { %v1091_v17 = vsel %vm1087_vm3, %v3760_v25, %v3735_v24  ;;  %v1090_v1 = vsel %vm1087_vm3, %v3759_v19, %v3734_v29  ;;  %v1092_v2 = vsel %vm1087_vm3, %v3719_v54, %v3759_v19  ;;  %v1093_v31 = vsel %vm1087_vm3, %v3720_v23, %v3760_v25 }
 0x2f2   : > { %v3291_v5 = vpack.c.bf16 %v1091_v17, %v1090_v1  ;;  %v3763_v53 = vpop.permute.xlu1 %3762  ;;  %v3253_v30 = vpack.c.bf16 %v1093_v31, %v1092_v2  ;;  %v1140_v24 = vsel %vm1136_vm4, %v3770_v13, %v3745_v28  ;;  %v6430_v54 = vunpack.i.l.bf16 %v5129_v62 }
 0x2f3   : > { %1516 = vmatmul.mubr.f32.vlgmr.msra.gmra.mrb[4].mxu0 %v5407_v42  ;;  %v3798_v29 = vpop.permute.xlu0 %3797  ;;  %v6431_v25 = vunpack.i.h.bf16 %v5129_v62  ;;  %v3295_v13 = vpack.c.bf16 %v1140_v24, %v1139_v3  ;;  %v3765_v27 = vunpack.i.h.bf16 %v3763_v53  ;;  %v3764_v57 = vunpack.i.l.bf16 %v3763_v53 }
 0x2f4   : > { %v1186_v21 = vsel %vm1185_vm5, %v3754_v40, %v6430_v54  ;;  %v3800_v19 = vunpack.i.h.bf16 %v3798_v29  ;;  %v3799_v23 = vunpack.i.l.bf16 %v3798_v29  ;;  %3254 = vmatprep.subr.bf16.mxu0 %v3253_v30  ;;  %3292 = vmatpush1.bf16.msra.mxu1 %v3291_v5  ;;  %v6433_v5 = vunpack.i.h.bf16 %v5009_v22 }
 0x2f5   : > { %v1187_v28 = vsel %vm1185_vm5, %v3755_v50, %v6431_v25  ;;  %3256 = vmatpush1.bf16.msra.mxu0 %v6432_v41  ;;  %3294 = vmatprep.subr.bf16.mxu1 %v3293_v55  ;;  %v6434_v30 = vunpack.i.l.bf16 %v5009_v22  ;;  %v6435_v55 = vunpack.i.l.bf16 %v5224_v37  ;;  %v6436_v22 = vunpack.i.h.bf16 %v5224_v37 }
 0x2f6   : > { %v3773_v15 = vpop.permute.xlu1 %3772  ;;  %3258 = vmatprep.subr.bf16.mxu0 %v3257_v36  ;;  %2939 = vmatprep.mubr.msk.f32.mxu0 %vm1447_vm2, %v4907_v59  ;;  %v3297_v62 = vpack.c.bf16 %v1187_v28, %v1186_v21  ;;  %v1239_v17 = vsel %vm1234_vm6, %v3764_v57, %v3799_v23  ;;  %v1240_v9 = vsel %vm1234_vm6, %v3765_v27, %v3800_v19 }
 0x2f7   : > { %v3775_v48 = vunpack.i.h.bf16 %v3773_v15  ;;  %v3774_v33 = vunpack.i.l.bf16 %v3773_v15  ;;  %v3803_v32 = vpop.permute.xlu0 %3802  ;;  %v3265_v18 = vpack.c.bf16 %v1240_v9, %v1239_v17  ;;  %v6437_v15 = vunpack.i.h.bf16 %v4946_v6 }
 0x2f8   : > { %3296 = vmatpush1.bf16.msra.mxu1 %v3295_v13  ;;  %v3805_v28 = vunpack.i.h.bf16 %v3803_v32 }
 0x2f9   : > { %v1189_v56 = vsel %vm1185_vm5, %v3775_v48, %v3755_v50  ;;  %v1188_v1 = vsel %vm1185_vm5, %v3774_v33, %v3754_v40  ;;  %3260 = vmatpush1.bf16.msra.mxu0 %v3259_v0  ;;  %3298 = vmatprep.subr.bf16.mxu1 %v3297_v62  ;;  %v1190_v59 = vsel %vm1185_vm5, %v3749_v7, %v3774_v33 }
 0x2fa   : > { %v3299_v2 = vpack.c.bf16 %v1189_v56, %v1188_v1  ;;  %v3778_v31 = vpop.permute.xlu1 %3777  ;;  %v1191_v50 = vsel %vm1185_vm5, %v3750_v8, %v3775_v48  ;;  %v1242_v40 = vsel %vm1234_vm6, %v6433_v5, %v3765_v27  ;;  %v1241_v7 = vsel %vm1234_vm6, %v6434_v30, %v3764_v57 }
 0x2fb   : > { %v3780_v26 = vunpack.i.h.bf16 %v3778_v31  ;;  %v3779_v60 = vunpack.i.l.bf16 %v3778_v31  ;;  %v3808_v0 = vpop.permute.xlu0 %3807  ;;  %v3261_v53 = vpack.c.bf16 %v1191_v50, %v1190_v59  ;;  %v3267_v57 = vpack.c.bf16 %v1242_v40, %v1241_v7 }
 0x2fc   : > { %v3810_v24 = vunpack.i.h.bf16 %v3808_v0  ;;  %v3809_v3 = vunpack.i.l.bf16 %v3808_v0  ;;  %3300 = vmatpush1.bf16.msra.mxu1 %v3299_v2  ;;  %v6443_v5 = vpack.c.bf16 %v4855_v44, %v4853_v43  ;;  %v6444_v7 = vunpack.i.h.bf16 %v5088_v35 }
 0x2fd   : > { %v1238_v8 = vsel %vm1234_vm6, %v3800_v19, %v3780_v26  ;;  %v1237_v29 = vsel %vm1234_vm6, %v3799_v23, %v3779_v60  ;;  %3262 = vmatprep.subr.bf16.mxu0 %v3261_v53  ;;  %v1235_v54 = vsel %vm1234_vm6, %v3779_v60, %v6435_v55  ;;  %v1236_v21 = vsel %vm1234_vm6, %v3780_v26, %v6436_v22 }
 0x2fe   : > { %v3303_v36 = vpack.c.bf16 %v1238_v8, %v1237_v29  ;;  %3264 = vmatpush1.bf16.msra.mxu0 %v3263_v58  ;;  %v3783_v19 = vpop.permute.xlu1 %3782  ;;  %v3301_v25 = vpack.c.bf16 %v1236_v21, %v1235_v54  ;;  %v3804_v23 = vunpack.i.l.bf16 %v3803_v32  ;;  %v1298_v37 = vsel %vm1283_vm7, %v3809_v3, %v3574_v20 }
 0x2ff   : > { %v3785_v41 = vunpack.i.h.bf16 %v3783_v19  ;;  %v3784_v13 = vunpack.i.l.bf16 %v3783_v19  ;;  %3266 = vmatprep.subr.bf16.mxu0 %v3265_v18  ;;  %v3823_v27 = vpop.permute.xlu0 %3822  ;;  %v1299_v4 = vsel %vm1283_vm7, %v3810_v24, %v6437_v15  ;;  %v6438_v58 = vpack.c.bf16 %v4867_v49, %v4859_v45 }
 0x300   : > { %3302 = vmatprep.subr.bf16.mxu1 %v3301_v25  ;;  %v6439_v20 = vunpack.i.h.bf16 %v5094_v38  ;;  %v6440_v32 = vunpack.i.l.bf16 %v5094_v38  ;;  %v6441_v45 = vpack.c.bf16 %v4861_v46, %v4877_v52  ;;  %v3309_v49 = vpack.c.bf16 %v1299_v4, %v1298_v37 }
 0x301   : > { %3304 = vmatpush1.bf16.msra.mxu1 %v3303_v36  ;;  %v1286_v48 = vsel %vm1283_vm7, %v3804_v23, %v3784_v13  ;;  %v1287_v33 = vsel %vm1283_vm7, %v3805_v28, %v3785_v41  ;;  %v1285_v17 = vsel %vm1283_vm7, %v3785_v41, %v3810_v24  ;;  %v1284_v9 = vsel %vm1283_vm7, %v3784_v13, %v3809_v3 }
 0x302   : > { %3268 = vmatpush1.bf16.msra.mxu0 %v3267_v57  ;;  %v5522_v39 = vpop.permute.xlu1 %3792  ;;  %3306 = vmatprep.subr.bf16.mxu1 %v6438_v58  ;;  %v1289_v6 = vsel %vm1283_vm7, %v6439_v20, %v3805_v28  ;;  %v1288_v62 = vsel %vm1283_vm7, %v6440_v32, %v3804_v23  ;;  %v6442_v38 = vpack.c.bf16 %v4863_v47, %v4874_v51  ;;  %v3790_v46 = vunpack.i.h.bf16 %v5424_v63 }
 0x303   : > { %3270 = vmatprep.subr.bf16.mxu0 %v6441_v45  ;;  %v3795_v56 = vunpack.i.h.bf16 %v5522_v39  ;;  %v3794_v1 = vunpack.i.l.bf16 %v5522_v39  ;;  %v3828_v59 = vpop.permute.xlu0 %3827  ;;  %v3273_v2 = vpack.c.bf16 %v1287_v33, %v1286_v48  ;;  %v3789_v52 = vunpack.i.l.bf16 %v5424_v63 }
 0x304   : > { %v3825_v31 = vunpack.i.h.bf16 %v3823_v27  ;;  %v3824_v50 = vunpack.i.l.bf16 %v3823_v27  ;;  %v3275_v26 = vpack.c.bf16 %v1289_v6, %v1288_v62  ;;  %v3311_v60 = vpack.c.bf16 %v1285_v17, %v1284_v9 }
 0x305   : > { %3308 = vmatpush1.bf16.msra.mxu1 %v6442_v38  ;;  %v3830_v47 = vunpack.i.h.bf16 %v3828_v59  ;;  %v3829_v51 = vunpack.i.l.bf16 %v3828_v59  ;;  %v6445_v44 = vunpack.i.l.bf16 %v5088_v35  ;;  %v6446_v54 = vunpack.i.h.bf16 %v5169_v16 }
 0x306   : > { %3272 = vmatpush1.bf16.msra.mxu0 %v6443_v5  ;;  %v3813_v40 = vpop.permute.xlu1 %3812  ;;  %3310 = vmatprep.subr.bf16.mxu1 %v3309_v49  ;;  %v1384_v30 = vsel %vm1381_vm9, %v3824_v50, %v3794_v1  ;;  %v1385_v63 = vsel %vm1381_vm9, %v3825_v31, %v3795_v56  ;;  %v6447_v36 = vunpack.i.l.bf16 %v5169_v16  ;;  %v6448_v41 = vunpack.i.h.bf16 %v4956_v11 }
 0x307   : > { %v3815_v0 = vunpack.i.h.bf16 %v3813_v40  ;;  %v3814_v53 = vunpack.i.l.bf16 %v3813_v40  ;;  %3274 = vmatprep.subr.bf16.mxu0 %v3273_v2  ;;  %v1387_v22 = vsel %vm1381_vm9, %v6446_v54, %v3825_v31  ;;  %v3833_v25 = vpop.permute.xlu0 %3832  ;;  %v3281_v28 = vpack.c.bf16 %v1385_v63, %v1384_v30 }
 0x308   : > { %v1386_v19 = vsel %vm1381_vm9, %v6447_v36, %v3824_v50  ;;  %v1396_v23 = vsel %vm1381_vm9, %v3829_v51, %v3594_v61  ;;  %v1397_v13 = vsel %vm1381_vm9, %v3830_v47, %v6448_v41  ;;  %v6449_v57 = vunpack.i.l.bf16 %v4953_v10 }
 0x309   : > { %v1338_v43 = vsel %vm1332_vm8, %v6444_v7, %v3815_v0  ;;  %v1337_v24 = vsel %vm1332_vm8, %v6445_v44, %v3814_v53  ;;  %3312 = vmatpush1.bf16.msra.mxu1 %v3311_v60  ;;  %v1335_v3 = vsel %vm1332_vm8, %v3814_v53, %v3789_v52  ;;  %v1336_v18 = vsel %vm1332_vm8, %v3815_v0, %v3790_v46 }
 0x30a   : > { %v3279_v8 = vpack.c.bf16 %v1338_v43, %v1337_v24  ;;  %3276 = vmatpush1.bf16.msra.mxu0 %v3275_v26  ;;  %v3818_v29 = vpop.permute.xlu1 %3817  ;;  %v3277_v55 = vpack.c.bf16 %v1336_v18, %v1335_v3  ;;  %v6450_v15 = vunpack.i.h.bf16 %v4953_v10  ;;  %v3835_v58 = vunpack.i.h.bf16 %v3833_v25  ;;  %v495_v24 = vld [vmem:[%s6346_s9] sm:$0xff] }
 0x30b   : > { %v3820_v35 = vunpack.i.h.bf16 %v3818_v29  ;;  %v3819_v21 = vunpack.i.l.bf16 %v3818_v29  ;;  %v3834_v48 = vunpack.i.l.bf16 %v3833_v25  ;;  %v3283_v6 = vpack.c.bf16 %v1387_v22, %v1386_v19 }
 0x30c   : > { %3278 = vmatprep.subr.bf16.mxu0 %v3277_v55  ;;  %v1382_v32 = vsel %vm1381_vm9, %v3794_v1, %v3829_v51  ;;  %v1383_v62 = vsel %vm1381_vm9, %v3795_v56, %v3830_v47  ;;  %v3317_v10 = vpack.c.bf16 %v1397_v13, %v1396_v23  ;;  %v6451_v45 = vunpack.i.h.bf16 %v5339_v14 }
 0x30d   : > { %v1334_v27 = vsel %vm1332_vm8, %v3790_v46, %v3820_v35  ;;  %v1333_v16 = vsel %vm1332_vm8, %v3789_v52, %v3819_v21  ;;  %v1347_v37 = vsel %vm1332_vm8, %v3819_v21, %v6449_v57  ;;  %v1348_v61 = vsel %vm1332_vm8, %v3820_v35, %v6450_v15 }
 0x30e   : > { %v3315_v11 = vpack.c.bf16 %v1334_v27, %v1333_v16  ;;  %3280 = vmatpush1.bf16.msra.mxu0 %v3279_v8  ;;  %v3838_v4 = vpop.permute.xlu1 %3837  ;;  %v3313_v39 = vpack.c.bf16 %v1348_v61, %v1347_v37  ;;  %v6452_v17 = vunpack.i.l.bf16 %v5339_v14  ;;  %v3319_v46 = vpack.c.bf16 %v1383_v62, %v1382_v32 }
 0x30f   : > { %v3840_v33 = vunpack.i.h.bf16 %v3838_v4  ;;  %v3839_v20 = vunpack.i.l.bf16 %v3838_v4  ;;  %3282 = vmatprep.subr.bf16.mxu0 %v3281_v28  ;;  %v6453_v5 = vunpack.i.l.bf16 %v5295_v34  ;;  %v6454_v26 = vunpack.i.h.bf16 %v5295_v34 }
 0x310   : > { %3314 = vmatprep.subr.bf16.mxu1 %v3313_v39  ;;  %v6455_v7 = vlaneseq }
 0x311   : > { %v1436_v49 = vsel %vm1430_vm10, %v6451_v45, %v3840_v33  ;;  %v1435_v9 = vsel %vm1430_vm10, %v6452_v17, %v3839_v20  ;;  %3316 = vmatpush1.bf16.msra.mxu1 %v3315_v11  ;;  %v1433_v59 = vsel %vm1430_vm10, %v3839_v20, %v3834_v48  ;;  %v1434_v1 = vsel %vm1430_vm10, %v3840_v33, %v3835_v58 }
 0x312   : > { %v3287_v56 = vpack.c.bf16 %v1436_v49, %v1435_v9  ;;  %3284 = vmatpush1.bf16.msra.mxu0 %v3283_v6  ;;  %v3843_v38 = vpop.permute.xlu1 %3842  ;;  %3318 = vmatprep.subr.bf16.mxu1 %v3317_v10  ;;  %v3285_v2 = vpack.c.bf16 %v1434_v1, %v1433_v59  ;;  %v1753_v43 = vshrl.u32 %v6455_v7, 7 }
 0x313   : > { %v3845_v52 = vunpack.i.h.bf16 %v3843_v38  ;;  %v3844_v31 = vunpack.i.l.bf16 %v3843_v38 }
 0x314   : > { %3286 = vmatprep.subr.bf16.mxu0 %v3285_v2  ;;  %v1754_v44 = vsub.s32 0, %v1753_v43  ;;  %v1758_v34 = vsub.s32 1, %v1753_v43  ;;  %v1762_v8 = vsub.s32 2, %v1753_v43  ;;  %v1766_v54 = vsub.s32 3, %v1753_v43 }
 0x315   : > { %v1432_v14 = vsel %vm1430_vm10, %v3835_v58, %v3845_v52  ;;  %v1431_v50 = vsel %vm1430_vm10, %v3834_v48, %v3844_v31  ;;  %3320 = vmatpush1.bf16.msra.mxu1 %v3319_v46  ;;  %v1445_v40 = vsel %vm1430_vm10, %v3844_v31, %v6453_v5  ;;  %v1446_v60 = vsel %vm1430_vm10, %v3845_v52, %v6454_v26 }
 0x316   : > { %v3323_v0 = vpack.c.bf16 %v1432_v14, %v1431_v50  ;;  %3288 = vmatpush1.bf16.msra.mxu0 %v3287_v56  ;;  %v3321_v53 = vpack.c.bf16 %v1446_v60, %v1445_v40  ;;  %v5634_v3 = vrot.slane %v495_v24, %v1754_v44  ;;  %v5636_v18 = vrot.slane %v495_v24, %v1758_v34 }
 0x317   : > { %v5640_v55 = vrot.slane %v495_v24, %v1762_v8  ;;  %v5643_v21 = vrot.slane %v495_v24, %v1766_v54  ;;  %v1770_v36 = vsub.s32 4, %v1753_v43  ;;  %v1774_v19 = vsub.s32 5, %v1753_v43 }
 0x318   : > { %3322 = vmatprep.subr.bf16.mxu1 %v3321_v53  ;;  %v1778_v25 = vsub.s32 6, %v1753_v43  ;;  %v1782_v13 = vsub.s32 7, %v1753_v43 }
 0x319   : > { %1658 = vmatmul.mubr.f32.vlgmr.msra.gmra.mrb[6].mxu0 %v5407_v42  ;;  %3324 = vmatpush1.bf16.msra.mxu1 %v3323_v0  ;;  %v5646_v41 = vrot.slane %v495_v24, %v1770_v36  ;;  %v5648_v27 = vrot.slane %v495_v24, %v1774_v19 }
 0x31a   : > { %v5650_v57 = vrot.slane %v495_v24, %v1778_v25  ;;  %v5653_v11 = vrot.slane %v495_v24, %v1782_v13 }
 0x31c   : > { %1729 = vmatmul.mubr.f32.vlgmr.msra.gmra.mrb[6].mxu1 %v5407_v42 }
 0x3bf   : > { %v1588_v47 = vpop.f32.mrb[4].mxu1 }
 0x3c0   : > { %v1590_v51 = vpop.f32.mrb[5].mxu1  ;;  %v1794_v35 = vmul.f32 %v5640_v55, %v1588_v47 }
 0x3c1   : > { %v1795_v23 = vmul.f32 %v5643_v21, %v1590_v51 }
 0x3c6   : > { %v1517_v30 = vpop.f32.mrb[4].mxu0 }
 0x3c7   : > { %v1519_v63 = vpop.f32.mrb[5].mxu0  ;;  %v1792_v29 = vmul.f32 %v5634_v3, %v1517_v30 }
 0x3c8   : > { %v1793_v42 = vmul.f32 %v5636_v18, %v1519_v63 }
 0x3ca   : > { %v1800_v22 = vadd.f32 %v1793_v42, %v1792_v29 }
 0x3cc   : > { %v1801_v28 = vadd.f32 %v1800_v22, %v1794_v35 }
 0x3ce   : > { %v1802_v37 = vadd.f32 %v1801_v28, %v1795_v23 }
 0x3ec   : > { %v1659_v16 = vpop.f32.mrb[6].mxu0 }
 0x3ed   : > { %v1796_v15 = vmul.f32 %v5646_v41, %v1659_v16  ;;  %v1661_v61 = vpop.f32.mrb[7].mxu0 }
 0x3ee   : > { %v1797_v4 = vmul.f32 %v5648_v27, %v1661_v61 }
 0x3ef   : > { %v1803_v39 = vadd.f32 %v1802_v37, %v1796_v15  ;;  %v1730_v58 = vpop.f32.mrb[6].mxu1 }
 0x3f0   : > { %v1798_v48 = vmul.f32 %v5650_v57, %v1730_v58  ;;  %v1732_v33 = vpop.f32.mrb[7].mxu1  ;;  %v1735_v58 = vld [vmem:[#allocation10] sm:$0xff] }
 0x3f1   : > { %v1804_v20 = vadd.f32 %v1803_v39, %v1797_v4  ;;  %v1799_v6 = vmul.f32 %v5653_v11, %v1732_v33  ;;  %v1737_v33 = vld [vmem:[#allocation10 + $0x10] sm:$0xff] }
 0x3f3   : > { %v1805_v32 = vadd.f32 %v1804_v20, %v1798_v48  ;;  %v1738_v20 = vld [vmem:[#allocation10 + $0x18] sm:$0xff] }
 0x3f5   : > { %v1806_v62 = vadd.f32 %v1805_v32, %v1799_v6  ;;  %v1739_v32 = vld [vmem:[#allocation10 + $0x20] sm:$0xff] }
 0x3f7   : > { %1807 = vadd.xlane.f32.xlu0 %v1806_v62 }
 0x484   : > { %v1808_v10 = vpop.xlane.xlu0 %1807 }
 0x485   : > { %v1809_v45 = vrot.slane %v1808_v10, 4 }
 0x487   : > { %v1810_v49 = vadd.f32 %v1809_v45, %v1808_v10 }
 0x489   : > { %v1811_v17 = vrot.slane %v1810_v49, 2 }
 0x48b   : > { %v1812_v9 = vadd.f32 %v1811_v17, %v1810_v49  ;;  %v1743_v17 = vld [vmem:[#allocation11] sm:$0xff] }
 0x48d   : > { %v1813_v59 = vrot.slane %v1812_v9, 1 }
 0x48f   : > { %v1814_v1 = vadd.f32 %v1813_v59, %v1812_v9  ;;  %v1744_v9 = vld [vmem:[#allocation11 + $0x8] sm:$0xff]  ;;  %v1745_v59 = vld [vmem:[#allocation11 + $0x10] sm:$0xff] }
 0x491   : > { %3389 = vpush %v1814_v1 }
 0x4c2   : > { %s3390_s25 = spop %3389 }
 0x4c3   : > { %s1816_s23 = smul.f32 0.00013888889, %s3390_s25 }
 0x4c5   : > { %v1817_v56 = vstv %s1816_s23  ;;  %s2924_s23 = sshll.u32 %s4712_s4, 7 }
 0x4c6   : > { %v1818_v38 = vsub.f32 %v1792_v29, %v1817_v56  ;;  %v1819_v2 = vsub.f32 %v1793_v42, %v1817_v56  ;;  %v1820_v46 = vsub.f32 %v1794_v35, %v1817_v56  ;;  %v1821_v52 = vsub.f32 %v1795_v23, %v1817_v56 }
 0x4c7   : > { %v1822_v31 = vsub.f32 %v1796_v15, %v1817_v56  ;;  %v1823_v40 = vsub.f32 %v1797_v4, %v1817_v56  ;;  %v1824_v53 = vsub.f32 %v1798_v48, %v1817_v56  ;;  %v1825_v63 = vsub.f32 %v1799_v6, %v1817_v56  ;;  %v1736_v48 = vld [vmem:[#allocation10 + $0x8] sm:$0xff] }
 0x4c8   : > { %v1826_v14 = vmul.f32 %v1818_v38, %v5634_v3  ;;  %v1827_v50 = vmul.f32 %v1819_v2, %v5636_v18  ;;  %v1828_v5 = vmul.f32 %v1820_v46, %v5640_v55  ;;  %v1829_v26 = vmul.f32 %v1821_v52, %v5643_v21  ;;  %v1742_v38 = vld [vmem:[#allocation10 + $0x38] sm:$0xff] }
 0x4c9   : > { %v1830_v47 = vmul.f32 %v1822_v31, %v5646_v41  ;;  %v5664_v7 = vmul.f32 %v1823_v40, %v5648_v27  ;;  %v5667_v34 = vmul.f32 %v1824_v53, %v5650_v57  ;;  %v1833_v29 = vmul.f32 %v1825_v63, %v5653_v11  ;;  %v1746_v40 = vld [vmem:[#allocation11 + $0x18] sm:$0xff] }
 0x4ca   : > { %v1834_v60 = vmul.f32 %v1826_v14, %v1826_v14  ;;  %v1835_v0 = vmul.f32 %v1827_v50, %v1827_v50  ;;  %v1836_v51 = vmul.f32 %v1828_v5, %v1828_v5  ;;  %v1837_v43 = vmul.f32 %v1829_v26, %v1829_v26 }
 0x4cb   : > { %v1838_v24 = vmul.f32 %v1830_v47, %v1830_v47  ;;  %v1839_v42 = vmul.f32 %v5664_v7, %v5664_v7  ;;  %v1840_v22 = vmul.f32 %v5667_v34, %v5667_v34  ;;  %v1841_v36 = vmul.f32 %v1833_v29, %v1833_v29 }
 0x4cc   : > { %v1842_v30 = vadd.f32 %v1835_v0, %v1834_v60  ;;  %v1747_v60 = vld [vmem:[#allocation11 + $0x20] sm:$0xff] }
 0x4ce   : > { %v1843_v44 = vadd.f32 %v1842_v30, %v1836_v51 }
 0x4d0   : > { %v1844_v8 = vadd.f32 %v1843_v44, %v1837_v43 }
 0x4d2   : > { %v1845_v54 = vadd.f32 %v1844_v8, %v1838_v24 }
 0x4d4   : > { %v1846_v35 = vadd.f32 %v1845_v54, %v1839_v42 }
 0x4d6   : > { %v1847_v19 = vadd.f32 %v1846_v35, %v1840_v22 }
 0x4d8   : > { %v1848_v25 = vadd.f32 %v1847_v19, %v1841_v36 }
 0x4da   : > { %1849 = vadd.xlane.f32.xlu1 %v1848_v25 }
 0x567   : > { %v1850_v28 = vpop.xlane.xlu1 %1849 }
 0x568   : > { %v1851_v23 = vrot.slane %v1850_v28, 4 }
 0x56a   : > { %v1852_v13 = vadd.f32 %v1851_v23, %v1850_v28 }
 0x56c   : > { %v1853_v16 = vrot.slane %v1852_v13, 2 }
 0x56e   : > { %v1854_v37 = vadd.f32 %v1853_v16, %v1852_v13 }
 0x570   : > { %v1855_v15 = vrot.slane %v1854_v37, 1 }
 0x572   : > { %v1856_v61 = vadd.f32 %v1855_v15, %v1854_v37 }
 0x574   : > { %3391 = vpush %v1856_v61 }
 0x5a5   : > { %s3392_s0 = spop %3391 }
 0x5a6   : > { %s1858_s20 = smul.f32 0.00013888889, %s3392_s0  ;;  %s6257_s0 = scalar_lea.vmem [#allocation16], %s2924_s23 }
 0x5a8   : > { %s1859_s10 = sadd.f32 1e-05, %s1858_s20  ;;  %s2956_s20 = sshll.u32 %s4437_s19, 11 }
 0x5aa   : > { %v1860_v4 = vstv %s1859_s10  ;;  %s2747_s10 = sshll.u32 %s6257_s0, 4  ;;  %s6290_s10 = int_to_ptr.vmem [resolvable:$true] %s2747_s10 }
 0x5ab   : > { %3971 = vrsqrt.f32 %v1860_v4 }
 0x5b5   : > { %v3972_v39 = vpop.eup %3971 }
 0x5b6   : > { %3393 = vpush %v3972_v39 }
 0x5e7   : > { %s3394_s21 = spop %3393 }
 0x5e8   : > { %v5674_v6 = vstv %s3394_s21 }
 0x5e9   : > { %v1864_v62 = vmul.f32 %v5674_v6, %v1826_v14  ;;  %v1865_v10 = vmul.f32 %v5674_v6, %v1827_v50  ;;  %v1866_v45 = vmul.f32 %v5674_v6, %v1828_v5  ;;  %v1867_v49 = vmul.f32 %v5674_v6, %v1829_v26  ;;  %v1750_v26 = vld [vmem:[#allocation11 + $0x38] sm:$0xff] }
 0x5ea   : > { %v1868_v1 = vmul.f32 %v5674_v6, %v1830_v47  ;;  %v1871_v56 = vmul.f32 %v5674_v6, %v1833_v29 }
 0x5eb   : > { %v1872_v2 = vmul.f32 %v1864_v62, %v1735_v58  ;;  %v1873_v46 = vmul.f32 %v1865_v10, %v1736_v48  ;;  %v1874_v52 = vmul.f32 %v1866_v45, %v1737_v33  ;;  %v1875_v31 = vmul.f32 %v1867_v49, %v1738_v20  ;;  %v1740_v49 = vld [vmem:[#allocation10 + $0x28] sm:$0xff] }
 0x5ec   : > { %v1876_v14 = vmul.f32 %v1868_v1, %v1739_v32  ;;  %v1879_v53 = vmul.f32 %v1871_v56, %v1742_v38  ;;  %v1869_v32 = vmul.f32 %v5674_v6, %v5664_v7  ;;  %v1748_v7 = vld [vmem:[#allocation11 + $0x28] sm:$0xff] }
 0x5ed   : > { %v1880_v50 = vadd.f32 %v1872_v2, %v1743_v17  ;;  %v1881_v0 = vadd.f32 %v1873_v46, %v1744_v9  ;;  %v1882_v5 = vadd.f32 %v1874_v52, %v1745_v59  ;;  %v1883_v51 = vadd.f32 %v1875_v31, %v1746_v40  ;;  %v1741_v9 = vld [vmem:[#allocation10 + $0x30] sm:$0xff] }
 0x5ee   : > { %v1884_v30 = vadd.f32 %v1876_v14, %v1747_v60  ;;  %v1887_v44 = vadd.f32 %v1879_v53, %v1750_v26  ;;  %v1870_v17 = vmul.f32 %v5674_v6, %v5667_v34  ;;  %v1877_v38 = vmul.f32 %v1869_v32, %v1740_v49  ;;  %v1749_v46 = vld [vmem:[#allocation11 + $0x30] sm:$0xff] }
 0x5ef   : > { %v1896_v63 = vmul.f32 0.70710677, %v1880_v50  ;;  %v1897_v43 = vmul.f32 0.70710677, %v1881_v0  ;;  %v1898_v47 = vmul.f32 0.70710677, %v1882_v5 }
 0x5f0   : > { %v1899_v24 = vmul.f32 0.70710677, %v1883_v51  ;;  %v1900_v8 = vmul.f32 0.70710677, %v1884_v30  ;;  %v1903_v29 = vmul.f32 0.70710677, %v1887_v44  ;;  %v1878_v2 = vmul.f32 %v1870_v17, %v1741_v9 }
 0x5f1   : > { %3973 = verf.f32 %v1896_v63  ;;  %v1888_v22 = vmul.f32 0.5, %v1880_v50  ;;  %v1889_v19 = vmul.f32 0.5, %v1881_v0  ;;  %v1890_v15 = vmul.f32 0.5, %v1882_v5 }
 0x5f2   : > { %3975 = verf.f32 %v1897_v43  ;;  %v1895_v39 = vmul.f32 0.5, %v1887_v44  ;;  %v1891_v62 = vmul.f32 0.5, %v1883_v51  ;;  %v1892_v10 = vmul.f32 0.5, %v1884_v30 }
 0x5f3   : > { %3977 = verf.f32 %v1898_v47  ;;  %v1885_v34 = vadd.f32 %v1877_v38, %v1748_v7  ;;  %v1886_v6 = vadd.f32 %v1878_v2, %v1749_v46  ;;  %v4357_v47 = vmov 0.0  }
 0x5f4   : > { %3979 = verf.f32 %v1899_v24  ;;  %2193 = vmatprep.mubr.f32.mxu0 %v4357_v47  ;;  %2270 = vmatprep.mubr.f32.mxu1 %v4357_v47 }
 0x5f5   : > { %3981 = verf.f32 %v1900_v8  ;;  %v1901_v31 = vmul.f32 0.70710677, %v1885_v34  ;;  %v1902_v40 = vmul.f32 0.70710677, %v1886_v6  ;;  %v1893_v26 = vmul.f32 0.5, %v1885_v34 }
 0x5f6   : > { %3983 = verf.f32 %v1903_v29  ;;  %v1894_v51 = vmul.f32 0.5, %v1886_v6 }
 0x5f7   : > { %3985 = verf.f32 %v1901_v31 }
 0x5f8   : > { %3987 = verf.f32 %v1902_v40 }
 0x5fb   : > { %v3974_v42 = vpop.eup %3973 }
 0x5fc   : > { %v3976_v54 = vpop.eup %3975  ;;  %v1912_v35 = vadd.f32 1.0, %v3974_v42 }
 0x5fd   : > { %v3978_v36 = vpop.eup %3977  ;;  %v1913_v25 = vadd.f32 1.0, %v3976_v54 }
 0x5fe   : > { %v5682_v28 = vmul.f32 %v1912_v35, %v1888_v22  ;;  %v3980_v23 = vpop.eup %3979  ;;  %v1914_v13 = vadd.f32 1.0, %v3978_v36 }
 0x5ff   : > { %v5684_v16 = vmul.f32 %v1913_v25, %v1889_v19  ;;  %v3982_v37 = vpop.eup %3981  ;;  %v1915_v58 = vadd.f32 1.0, %v3980_v23 }
 0x600   : > { %v3984_v4 = vpop.eup %3983  ;;  %v1916_v48 = vadd.f32 1.0, %v3982_v37  ;;  %v5688_v20 = vmul.f32 %v1914_v13, %v1890_v15 }
 0x601   : > { %v3851_v61 = vpack.i.bf16 %v5684_v16, %v5682_v28  ;;  %v1919_v33 = vadd.f32 1.0, %v3984_v4  ;;  %v5698_v59 = vmul.f32 %v1915_v58, %v1891_v62  ;;  %v3986_v50 = vpop.eup %3985 }
 0x602   : > { %v5700_v1 = vmul.f32 %v1916_v48, %v1892_v10  ;;  %v3906_v60 = vpack.i.bf16 %v5688_v20, %v5684_v16  ;;  %v3988_v0 = vpop.eup %3987  ;;  %v1917_v5 = vadd.f32 1.0, %v3986_v50 }
 0x603   : > { %3852 = vrot.lane.b32.xlu1 %v3851_v61, %s4350_s29  ;;  %3847 = vrot.lane.b32.xlu0 %v3851_v61, %s4349_s26  ;;  %v5694_v45 = vmul.f32 %v1919_v33, %v1895_v39  ;;  %v3911_v14 = vpack.i.bf16 %v5698_v59, %v5682_v28  ;;  %v1918_v53 = vadd.f32 1.0, %v3988_v0 }
 0x604   : > { %v3871_v52 = vpack.i.bf16 %v5700_v1, %v5698_v59  ;;  %v5727_v30 = vmul.f32 %v1917_v5, %v1893_v26 }
 0x605   : > { %v3861_v56 = vpack.i.bf16 %v5688_v20, %v5694_v45  ;;  %v5729_v63 = vmul.f32 %v1918_v53, %v1894_v51 }
 0x607   : > { %3862 = vrot.lane.b32.xlu1 %v3861_v56, %s4350_s29  ;;  %3857 = vrot.lane.b32.xlu0 %v3861_v56, %s4349_s26  ;;  %v3936_v43 = vpack.i.bf16 %v5729_v63, %v5727_v30 }
 0x60b   : > { %3872 = vrot.lane.b32.xlu1 %v3871_v52, %s4350_s29  ;;  %3867 = vrot.lane.b32.xlu0 %v3871_v52, %s4349_s26 }
 0x60f   : > { %3882 = vrot.lane.b32.xlu1 %v3851_v61, %s4352_s27  ;;  %3877 = vrot.lane.b32.xlu0 %v3851_v61, %s4351_s18 }
 0x613   : > { %3892 = vrot.lane.b32.xlu1 %v3861_v56, %s4352_s27  ;;  %3887 = vrot.lane.b32.xlu0 %v3861_v56, %s4351_s18 }
 0x617   : > { %3902 = vrot.lane.b32.xlu1 %v3871_v52, %s4352_s27  ;;  %3897 = vrot.lane.b32.xlu0 %v3871_v52, %s4351_s18 }
 0x61b   : > { %3912 = vrot.lane.b32.xlu1 %v3911_v14, %s4353_s22  ;;  %3907 = vrot.lane.b32.xlu0 %v3906_v60, %s4353_s22 }
 0x61f   : > { %3917 = vrot.lane.b32.xlu1 %v3906_v60, %s4354_s2  ;;  %2034 = vrot.lane.b32.xlu0 %v5700_v1, %s4353_s22 }
 0x623   : > { %3927 = vrot.lane.b32.xlu1 %v3911_v14, %s4354_s2  ;;  %3922 = vrot.lane.b32.xlu0 %v3906_v60, %s4355_s12 }
 0x627   : > { %2058 = vrot.lane.b32.xlu1 %v5700_v1, %s4354_s2  ;;  %3932 = vrot.lane.b32.xlu0 %v3911_v14, %s4355_s12 }
 0x62b   : > { %3937 = vrot.lane.b32.xlu1 %v3936_v43, %s4349_s26  ;;  %2082 = vrot.lane.b32.xlu0 %v5700_v1, %s4355_s12  ;;  %s6457_s26 = sld [smem:[#allocation29_spill]] }
 0x62f   : > { %2100 = vrot.lane.b32.xlu1 %v5684_v16, %s4356_s6  ;;  %3942 = vrot.lane.b32.xlu0 %v3936_v43, %s4350_s29 }
 0x631   : > { %s6288_s29 = scalar_lea.hbm %s6457_s26, %s2956_s20 }
 0x633   : > { %2098 = vrot.lane.b32.xlu1 %v5682_v28, %s4356_s6  ;;  %2102 = vrot.lane.b32.xlu0 %v5688_v20, %s4356_s6 }
 0x637   : > { %3952 = vrot.lane.b32.xlu1 %v3936_v43, %s4352_s27  ;;  %3947 = vrot.lane.b32.xlu0 %v3936_v43, %s4351_s18  ;;  %s6456_s18 = sld [smem:[#allocation28_spill]]  ;;  %s2734_s27 = scalar_lea.sflag [#allocation4], %s4712_s4 }
 0x63b   : > { %2106 = vrot.lane.b32.xlu1 %v5700_v1, %s4356_s6  ;;  %2104 = vrot.lane.b32.xlu0 %v5698_v59, %s4356_s6 }
 0x63f   : > { %2040 = vrot.lane.b32.xlu1 %v5694_v45, %s4353_s22  ;;  %3957 = vrot.lane.b32.xlu0 %v3936_v43, %s4353_s22  ;;  %s4251_s22 = scalar_lea.vmem %s6290_s10, 2048 }
 0x640   : > { %p4252_p4 = scmp.ne.s32.totalorder %s6290_s10, %s4251_s22 }
 0x642   : > { %p4253_p5 = pnand %p4252_p4, %p6458_p10 }
 0x643   : > { %3967 = vrot.lane.b32.xlu1 %v3936_v43, %s4355_s12  ;;  %3962 = vrot.lane.b32.xlu0 %v3936_v43, %s4354_s2 }
 0x644   : > { %p4254_p7 = pneg %p4253_p5 }
 0x647   : > { %2088 = vrot.lane.b32.xlu1 %v5694_v45, %s4355_s12  ;;  %2064 = vrot.lane.b32.xlu0 %v5694_v45, %s4354_s2 }
 0x64b   : > { %2110 = vrot.lane.b32.xlu1 %v5729_v63, %s4356_s6  ;;  %2108 = vrot.lane.b32.xlu0 %v5727_v30, %s4356_s6 }
 0x64f   : > { %2112 = vrot.lane.b32.xlu0 %v5694_v45, %s4356_s6 }
 0x675   : > { %v3853_v44 = vpop.permute.xlu1 %3852  ;;  %v3848_v24 = vpop.permute.xlu0 %3847 }
 0x676   : > { %v3855_v8 = vunpack.i.h.bf16 %v3853_v44  ;;  %v3854_v29 = vunpack.i.l.bf16 %v3853_v44  ;;  %v3850_v42 = vunpack.i.h.bf16 %v3848_v24  ;;  %v3849_v54 = vunpack.i.l.bf16 %v3848_v24 }
 0x678   : > { %v1952_v22 = vsel %vm1087_vm3, %v3849_v54, %v3850_v42  ;;  %v1976_v35 = vsel %vm1136_vm4, %v3854_v29, %v3855_v8 }
 0x679   : > { %v3325_v36 = vpack.c.bf16 %v1976_v35, %v1952_v22  ;;  %v5773_v19 = vpop.permute.xlu1 %3862  ;;  %v5775_v25 = vpop.permute.xlu0 %3857 }
 0x67a   : > { %v3865_v23 = vunpack.i.h.bf16 %v5773_v19  ;;  %v3864_v13 = vunpack.i.l.bf16 %v5773_v19  ;;  %v3860_v37 = vunpack.i.h.bf16 %v5775_v25  ;;  %v3859_v15 = vunpack.i.l.bf16 %v5775_v25 }
 0x67b   : > { %3326 = vmatprep.subr.bf16.mxu0 %v3325_v36 }
 0x67c   : > { %v1977_v61 = vsel %vm1136_vm4, %v3864_v13, %v3854_v29  ;;  %v1953_v4 = vsel %vm1087_vm3, %v3859_v15, %v3849_v54  ;;  %v1975_v33 = vsel %vm1136_vm4, %v3855_v8, %v3865_v23  ;;  %v1951_v32 = vsel %vm1087_vm3, %v3850_v42, %v3860_v37 }
 0x67d   : > { %v3327_v39 = vpack.c.bf16 %v1977_v61, %v1953_v4  ;;  %v5789_v58 = vpop.permute.xlu1 %3872  ;;  %v5791_v48 = vpop.permute.xlu0 %3867  ;;  %v3343_v9 = vpack.c.bf16 %v1975_v33, %v1951_v32 }
 0x67e   : > { %v3874_v62 = vunpack.i.l.bf16 %v5789_v58  ;;  %v3869_v10 = vunpack.i.l.bf16 %v5791_v48 }
 0x67f   : > { %3328 = vmatpush1.bf16.msra.mxu0 %v3327_v39 }
 0x680   : > { %v1950_v49 = vsel %vm1087_vm3, %v3860_v37, %v3869_v10  ;;  %v1974_v17 = vsel %vm1136_vm4, %v3865_v23, %v3874_v62 }
 0x681   : > { %v3883_v56 = vpop.permute.xlu1 %3882  ;;  %v3878_v38 = vpop.permute.xlu0 %3877  ;;  %v3341_v7 = vpack.c.bf16 %v1974_v17, %v1950_v49 }
 0x682   : > { %v3885_v2 = vunpack.i.h.bf16 %v3883_v56  ;;  %v3884_v46 = vunpack.i.l.bf16 %v3883_v56  ;;  %v3880_v52 = vunpack.i.h.bf16 %v3878_v38  ;;  %v3879_v34 = vunpack.i.l.bf16 %v3878_v38 }
 0x683   : > { %3342 = vmatprep.subr.bf16.mxu1 %v3341_v7 }
 0x684   : > { %3344 = vmatpush1.bf16.msra.mxu1 %v3343_v9  ;;  %v2000_v6 = vsel %vm1185_vm5, %v3879_v34, %v3880_v52  ;;  %v2024_v31 = vsel %vm1234_vm6, %v3884_v46, %v3885_v2 }
 0x685   : > { %v5811_v40 = vpop.permute.xlu1 %3892  ;;  %v5813_v14 = vpop.permute.xlu0 %3887  ;;  %v3329_v60 = vpack.c.bf16 %v2024_v31, %v2000_v6 }
 0x686   : > { %v3895_v50 = vunpack.i.h.bf16 %v5811_v40  ;;  %v3894_v0 = vunpack.i.l.bf16 %v5811_v40  ;;  %v3890_v5 = vunpack.i.h.bf16 %v5813_v14  ;;  %v3889_v53 = vunpack.i.l.bf16 %v5813_v14 }
 0x687   : > { %3330 = vmatprep.subr.bf16.mxu0 %v3329_v60 }
 0x688   : > { %v2025_v26 = vsel %vm1234_vm6, %v3894_v0, %v3884_v46  ;;  %v2001_v51 = vsel %vm1185_vm5, %v3889_v53, %v3879_v34  ;;  %v2023_v8 = vsel %vm1234_vm6, %v3885_v2, %v3895_v50  ;;  %v1999_v29 = vsel %vm1185_vm5, %v3880_v52, %v3890_v5 }
 0x689   : > { %v3331_v43 = vpack.c.bf16 %v2025_v26, %v2001_v51  ;;  %v5827_v44 = vpop.permute.xlu1 %3902  ;;  %v5829_v24 = vpop.permute.xlu0 %3897  ;;  %v3347_v36 = vpack.c.bf16 %v2023_v8, %v1999_v29 }
 0x68a   : > { %v3904_v42 = vunpack.i.l.bf16 %v5827_v44  ;;  %v3899_v54 = vunpack.i.l.bf16 %v5829_v24 }
 0x68b   : > { %3332 = vmatpush1.bf16.msra.mxu0 %v3331_v43 }
 0x68c   : > { %v1998_v22 = vsel %vm1185_vm5, %v3890_v5, %v3899_v54  ;;  %v2022_v35 = vsel %vm1234_vm6, %v3895_v50, %v3904_v42 }
 0x68d   : > { %v5845_v23 = vpop.permute.xlu1 %3912  ;;  %v3908_v37 = vpop.permute.xlu0 %3907  ;;  %v3345_v61 = vpack.c.bf16 %v2022_v35, %v1998_v22 }
 0x68e   : > { %v3915_v4 = vunpack.i.h.bf16 %v5845_v23  ;;  %v3914_v39 = vunpack.i.l.bf16 %v5845_v23  ;;  %v3910_v33 = vunpack.i.h.bf16 %v3908_v37  ;;  %v3909_v32 = vunpack.i.l.bf16 %v3908_v37 }
 0x68f   : > { %3346 = vmatprep.subr.bf16.mxu1 %v3345_v61 }
 0x690   : > { %v2048_v49 = vsel %vm1283_vm7, %v3914_v39, %v3909_v32  ;;  %3348 = vmatpush1.bf16.msra.mxu1 %v3347_v36  ;;  %v2047_v17 = vsel %vm1283_vm7, %v3909_v32, %v3910_v33  ;;  %v2046_v9 = vsel %vm1283_vm7, %v3910_v33, %v3915_v4 }
 0x691   : > { %v3335_v56 = vpack.c.bf16 %v2048_v49, %v5682_v28  ;;  %v3918_v38 = vpop.permute.xlu1 %3917  ;;  %v5858_v7 = vpop.permute.xlu0 %2034  ;;  %v3333_v2 = vpack.c.bf16 %v2047_v17, %v5684_v16  ;;  %v3351_v34 = vpack.c.bf16 %v2046_v9, %v5688_v20 }
 0x692   : > { %v2045_v46 = vsel %vm1283_vm7, %v3915_v4, %v5858_v7  ;;  %v3920_v6 = vunpack.i.h.bf16 %v3918_v38  ;;  %v3919_v31 = vunpack.i.l.bf16 %v3918_v38  ;;  %v3875_v38 = vunpack.i.h.bf16 %v5789_v58 }
 0x693   : > { %v3349_v52 = vpack.c.bf16 %v2045_v46, %v5698_v59  ;;  %3334 = vmatprep.subr.bf16.mxu0 %v3333_v2  ;;  %v3870_v2 = vunpack.i.h.bf16 %v5791_v48 }
 0x694   : > { %3336 = vmatpush1.bf16.msra.mxu0 %v3335_v56  ;;  %v2071_v26 = vsel %vm1332_vm8, %v3919_v31, %v3920_v6 }
 0x695   : > { %v5866_v60 = vpop.permute.xlu1 %3927  ;;  %v3923_v28 = vpop.permute.xlu0 %3922  ;;  %3350 = vmatprep.subr.bf16.mxu1 %v3349_v52 }
 0x696   : > { %v3925_v50 = vunpack.i.h.bf16 %v3923_v28  ;;  %v3924_v5 = vunpack.i.l.bf16 %v3923_v28  ;;  %3352 = vmatpush1.bf16.msra.mxu1 %v3351_v34  ;;  %v3929_v16 = vunpack.i.l.bf16 %v5866_v60  ;;  %v3930_v22 = vunpack.i.h.bf16 %v5866_v60 }
 0x698   : > { %v2095_v59 = vsel %vm1381_vm9, %v3924_v5, %v3925_v50  ;;  %v2072_v35 = vsel %vm1332_vm8, %v3929_v16, %v3919_v31  ;;  %v2070_v17 = vsel %vm1332_vm8, %v3920_v6, %v3930_v22  ;;  %v1973_v6 = vsel %vm1136_vm4, %v3874_v62, %v3875_v38  ;;  %v5929_v62 = vld [vmem:[%s6456_s18] sm:$0xff] }
 0x699   : > { %v5873_v51 = vpop.permute.xlu1 %2058  ;;  %v5875_v20 = vpop.permute.xlu0 %3932  ;;  %v3337_v43 = vpack.c.bf16 %v2095_v59, %v2071_v26  ;;  %v3900_v26 = vunpack.i.h.bf16 %v5829_v24  ;;  %v5946_v24 = vld [vmem:[%s6456_s18 + $0x8] sm:$0xff] }
 0x69a   : > { %v3935_v8 = vunpack.i.h.bf16 %v5875_v20  ;;  %v3934_v29 = vunpack.i.l.bf16 %v5875_v20  ;;  %v2069_v32 = vsel %vm1332_vm8, %v3930_v22, %v5873_v51 }
 0x69b   : > { %3338 = vmatprep.subr.bf16.mxu0 %v3337_v43 }
 0x69c   : > { %v2096_v36 = vsel %vm1381_vm9, %v3934_v29, %v3924_v5  ;;  %v2094_v37 = vsel %vm1381_vm9, %v3925_v50, %v3935_v8  ;;  %v1949_v50 = vsel %vm1087_vm3, %v3869_v10, %v3870_v2  ;;  %v3905_v5 = vunpack.i.h.bf16 %v5827_v44 }
 0x69d   : > { %v3339_v61 = vpack.c.bf16 %v2096_v36, %v2072_v35  ;;  %v5890_v4 = vpop.permute.xlu1 %3937  ;;  %v5892_v33 = vpop.permute.xlu0 %2082  ;;  %v3355_v56 = vpack.c.bf16 %v2094_v37, %v2070_v17  ;;  %v3359_v22 = vpack.c.bf16 %v1973_v6, %v1949_v50  ;;  %v1997_v37 = vsel %vm1185_vm5, %v3899_v54, %v3900_v26 }
 0x69e   : > { %v2093_v49 = vsel %vm1381_vm9, %v3935_v8, %v5892_v33  ;;  %v3939_v34 = vunpack.i.l.bf16 %v5890_v4  ;;  %v2021_v36 = vsel %vm1234_vm6, %v3904_v42, %v3905_v5 }
 0x69f   : > { %v3353_v9 = vpack.c.bf16 %v2093_v49, %v2069_v32  ;;  %3340 = vmatpush1.bf16.msra.mxu0 %v3339_v61  ;;  %v3940_v61 = vunpack.i.h.bf16 %v5890_v4 }
 0x6a0   : > { %v1948_v48 = vsel %vm1087_vm3, %v3870_v2, %v3939_v34 }
 0x6a1   : > { %v2101_v46 = vpop.permute.xlu1 %2100  ;;  %v3943_v52 = vpop.permute.xlu0 %3942  ;;  %3354 = vmatprep.subr.bf16.mxu1 %v3353_v9  ;;  %v1946_v6 = vsel %vm1087_vm3, %v3940_v61, %v3859_v15  ;;  %v1947_v15 = vsel %vm1087_vm3, %v3939_v34, %v3940_v61 }
 0x6a2   : > { %v3944_v31 = vunpack.i.l.bf16 %v3943_v52  ;;  %3356 = vmatpush1.bf16.msra.mxu1 %v3355_v56  ;;  %v3945_v35 = vunpack.i.h.bf16 %v3943_v52 }
 0x6a4   : > { %v1972_v28 = vsel %vm1136_vm4, %v3875_v38, %v3944_v31  ;;  %v1970_v4 = vsel %vm1136_vm4, %v3945_v35, %v3864_v13  ;;  %v3363_v38 = vpack.c.bf16 %v2021_v36, %v1997_v37  ;;  %v1971_v2 = vsel %vm1136_vm4, %v3944_v31, %v3945_v35 }
 0x6a5   : > { %v5917_v59 = vpop.permute.xlu1 %2098  ;;  %v2103_v43 = vpop.permute.xlu0 %2102  ;;  %v3357_v10 = vpack.c.bf16 %v1972_v28, %v1948_v48  ;;  %v3373_v50 = vpack.c.bf16 %v1970_v4, %v1946_v6 }
 0x6a6   : > { %v2120_v8 = vsel %vm1430_vm10, %v5917_v59, %v2101_v46  ;;  %v2119_v58 = vsel %vm1430_vm10, %v2101_v46, %v2103_v43 }
 0x6a7   : > { %2145 = vmatprep.subr.mxu0 %v2119_v58 }
 0x6a8   : > { %2146 = vmatpush1.msra.mxu0 %v2120_v8 }
 0x6a9   : > { %v3953_v32 = vpop.permute.xlu1 %3952  ;;  %v3948_v49 = vpop.permute.xlu0 %3947  ;;  %3358 = vmatprep.subr.bf16.mxu0 %v3357_v10  ;;  %2941 = vmatmul.mubr.msk.f32.vlgmr.msra.gmra.mrb[8].mxu0 %vm2122_vm11, %v5929_v62 }
 0x6aa   : > { %v3955_v17 = vunpack.i.h.bf16 %v3953_v32  ;;  %v3954_v9 = vunpack.i.l.bf16 %v3953_v32  ;;  %v3950_v56 = vunpack.i.h.bf16 %v3948_v49  ;;  %v3949_v44 = vunpack.i.l.bf16 %v3948_v49  ;;  %3360 = vmatpush1.bf16.msra.mxu0 %v3359_v22  ;;  %2199 = vmatprep.mubr.f32.mxu0 %v4357_v47 }
 0x6ac   : > { %v1996_v42 = vsel %vm1185_vm5, %v3900_v26, %v3949_v44  ;;  %v2020_v54 = vsel %vm1234_vm6, %v3905_v5, %v3954_v9  ;;  %v1994_v31 = vsel %vm1185_vm5, %v3950_v56, %v3889_v53  ;;  %v2018_v25 = vsel %vm1234_vm6, %v3955_v17, %v3894_v0 }
 0x6ad   : > { %v5958_v46 = vpop.permute.xlu1 %2106  ;;  %v2105_v52 = vpop.permute.xlu0 %2104  ;;  %v3361_v28 = vpack.c.bf16 %v2020_v54, %v1996_v42  ;;  %2942 = vmatmul.mubr.msk.f32.gmra.mrb[10].mxu0 %vm2122_vm11, %v5946_v24  ;;  %v3375_v5 = vpack.c.bf16 %v1971_v2, %v1947_v15  ;;  %v2019_v14 = vsel %vm1234_vm6, %v3954_v9, %v3955_v17  ;;  %v1995_v40 = vsel %vm1185_vm5, %v3949_v44, %v3950_v56 }
 0x6ae   : > { %v2118_v19 = vsel %vm1430_vm10, %v2103_v43, %v2105_v52  ;;  %v2117_v13 = vsel %vm1430_vm10, %v2105_v52, %v5958_v46  ;;  %2347 = vmatprep.mubr.f32.mxu0 %v4357_v47  ;;  %v3377_v0 = vpack.c.bf16 %v2018_v25, %v1994_v31  ;;  %v3379_v58 = vpack.c.bf16 %v2019_v14, %v1995_v40 }
 0x6af   : > { %2222 = vmatprep.subr.mxu1 %v2117_v13  ;;  %3362 = vmatprep.subr.bf16.mxu0 %v3361_v28 }
 0x6b0   : > { %2223 = vmatpush1.msra.mxu1 %v2118_v19  ;;  %3364 = vmatpush1.bf16.msra.mxu0 %v3363_v38 }
 0x6b1   : > { %v2041_v53 = vpop.permute.xlu1 %2040  ;;  %v3958_v26 = vpop.permute.xlu0 %3957  ;;  %3374 = vmatprep.subr.bf16.mxu1 %v3373_v50  ;;  %2943 = vmatmul.mubr.msk.f32.vlgmr.msra.gmra.mrb[8].mxu1 %vm2122_vm11, %v5929_v62 }
 0x6b2   : > { %v2049_v34 = vsel %vm1283_vm7, %v2041_v53, %v3914_v39  ;;  %v3960_v43 = vunpack.i.h.bf16 %v3958_v26  ;;  %v3959_v8 = vunpack.i.l.bf16 %v3958_v26  ;;  %3376 = vmatpush1.bf16.msra.mxu1 %v3375_v5  ;;  %2276 = vmatprep.mubr.f32.mxu1 %v4357_v47 }
 0x6b3   : > { %3378 = vmatprep.subr.bf16.mxu1 %v3377_v0  ;;  %v3381_v22 = vpack.c.bf16 %v2049_v34, %v5694_v45 }
 0x6b4   : > { %v2042_v48 = vsel %vm1283_vm7, %v3960_v43, %v2041_v53  ;;  %v2044_v10 = vsel %vm1283_vm7, %v5858_v7, %v3959_v8  ;;  %v2043_v23 = vsel %vm1283_vm7, %v3959_v8, %v3960_v43 }
 0x6b5   : > { %v3367_v39 = vpack.c.bf16 %v2044_v10, %v5700_v1  ;;  %v3968_v35 = vpop.permute.xlu1 %3967  ;;  %v3963_v36 = vpop.permute.xlu0 %3962  ;;  %v3365_v37 = vpack.c.bf16 %v2043_v23, %v5727_v30  ;;  %2944 = vmatmul.mubr.msk.f32.gmra.mrb[10].mxu1 %vm2122_vm11, %v5946_v24  ;;  %v3383_v7 = vpack.c.bf16 %v2042_v48, %v5729_v63 }
 0x6b6   : > { %v3970_v61 = vunpack.i.h.bf16 %v3968_v35  ;;  %v3969_v32 = vunpack.i.l.bf16 %v3968_v35  ;;  %v3965_v49 = vunpack.i.h.bf16 %v3963_v36  ;;  %v3964_v17 = vunpack.i.l.bf16 %v3963_v36  ;;  %3380 = vmatpush1.bf16.msra.mxu1 %v3379_v58  ;;  %2424 = vmatprep.mubr.f32.mxu1 %v4357_v47 }
 0x6b7   : > { %3366 = vmatprep.subr.bf16.mxu0 %v3365_v37  ;;  %3382 = vmatprep.subr.bf16.mxu1 %v3381_v22 }
 0x6b8   : > { %v2092_v45 = vsel %vm1381_vm9, %v5892_v33, %v3969_v32  ;;  %v2068_v1 = vsel %vm1332_vm8, %v5873_v51, %v3964_v17  ;;  %3368 = vmatpush1.bf16.msra.mxu0 %v3367_v39  ;;  %v2067_v30 = vsel %vm1332_vm8, %v3964_v17, %v3965_v49  ;;  %v2091_v9 = vsel %vm1381_vm9, %v3969_v32, %v3970_v61 }
 0x6b9   : > { %v3371_v56 = vpack.c.bf16 %v2092_v45, %v2068_v1  ;;  %v2089_v44 = vpop.permute.xlu1 %2088  ;;  %v2065_v63 = vpop.permute.xlu0 %2064  ;;  %v3369_v42 = vpack.c.bf16 %v2091_v9, %v2067_v30 }
 0x6ba   : > { %v2090_v54 = vsel %vm1381_vm9, %v3970_v61, %v2089_v44  ;;  %v2097_v33 = vsel %vm1381_vm9, %v2089_v44, %v3934_v29  ;;  %v2066_v51 = vsel %vm1332_vm8, %v3965_v49, %v2065_v63  ;;  %v2073_v4 = vsel %vm1332_vm8, %v2065_v63, %v3929_v16  ;;  %3384 = vmatpush1.bf16.msra.mxu1 %v3383_v7 }
 0x6bb   : > { %v3385_v38 = vpack.c.bf16 %v2097_v33, %v2073_v4  ;;  %v3387_v2 = vpack.c.bf16 %v2090_v54, %v2066_v51  ;;  %3370 = vmatprep.subr.bf16.mxu0 %v3369_v42 }
 0x6bc   : > { %3372 = vmatpush1.bf16.msra.mxu0 %v3371_v56 }
 0x6bd   : > { %v2111_v52 = vpop.permute.xlu1 %2110  ;;  %v2109_v28 = vpop.permute.xlu0 %2108  ;;  %3386 = vmatprep.subr.bf16.mxu1 %v3385_v38 }
 0x6be   : > { %v2116_v20 = vsel %vm1430_vm10, %v5958_v46, %v2109_v28  ;;  %3388 = vmatpush1.bf16.msra.mxu1 %v3387_v2  ;;  %v2115_v29 = vsel %vm1430_vm10, %v2109_v28, %v2111_v52 }
 0x6bf   : > { %2299 = vmatprep.subr.mxu0 %v2115_v29 }
 0x6c0   : > { %2300 = vmatpush1.msra.mxu0 %v2116_v20 }
 0x6c1   : > { %v2113_v60 = vpop.permute.xlu0 %2112  ;;  %2945 = vmatmul.mubr.msk.f32.vlgmr.msra.gmra.mrb[12].mxu0 %vm2122_vm11, %v5929_v62 }
 0x6c2   : > { %v2114_v16 = vsel %vm1430_vm10, %v2111_v52, %v2113_v60  ;;  %v2121_v6 = vsel %vm1430_vm10, %v2113_v60, %v5917_v59  ;;  %2353 = vmatprep.mubr.f32.mxu0 %v4357_v47 }
 0x6c3   : > { %2376 = vmatprep.subr.mxu1 %v2121_v6 }
 0x6c4   : > { %2377 = vmatpush1.msra.mxu1 %v2114_v16 }
 0x6c5   : > { %2947 = vmatmul.mubr.msk.f32.vlgmr.msra.gmra.mrb[12].mxu1 %vm2122_vm11, %v5929_v62  ;;  %2946 = vmatmul.mubr.msk.f32.gmra.mrb[14].mxu0 %vm2122_vm11, %v5946_v24 }
 0x6c6   : > { %2430 = vmatprep.mubr.f32.mxu1 %v4357_v47 }
 0x6c9   : > { %2948 = vmatmul.mubr.msk.f32.gmra.mrb[14].mxu1 %vm2122_vm11, %v5946_v24 }
 0x77c   : > { %v2195_v46 = vpop.f32.mrb[8].mxu0 }
 0x77d   : > { %v2197_v19 = vpop.f32.mrb[9].mxu0  ;;  %v2469_v15 = vmul.f32 %v2195_v46, %v5634_v3 }
 0x77e   : > { %v2470_v50 = vmul.f32 %v2197_v19, %v5636_v18 }
 0x780   : > { %v2201_v13 = vpop.f32.mrb[10].mxu0  ;;  %v2485_v5 = vadd.f32 %v2470_v50, %v2469_v15 }
 0x781   : > { %v2203_v12 = vpop.f32.mrb[11].mxu0  ;;  %v2477_v37 = vmul.f32 %v2201_v13, %v5634_v3 }
 0x782   : > { %v2478_v49 = vmul.f32 %v2203_v12, %v5636_v18 }
 0x784   : > { %v2272_v59 = vpop.f32.mrb[8].mxu1 }
 0x785   : > { %v2274_v31 = vpop.f32.mrb[9].mxu1  ;;  %v2471_v14 = vmul.f32 %v2272_v59, %v5640_v55 }
 0x786   : > { %v2472_v47 = vmul.f32 %v2274_v31, %v5643_v21 }
 0x787   : > { %v2486_v40 = vadd.f32 %v2485_v5, %v2471_v14 }
 0x788   : > { %v2278_v25 = vpop.f32.mrb[10].mxu1 }
 0x789   : > { %v2280_v62 = vpop.f32.mrb[11].mxu1  ;;  %v2487_v24 = vadd.f32 %v2486_v40, %v2472_v47  ;;  %v6060_v7 = vmul.f32 %v2278_v25, %v5640_v55 }
 0x78a   : > { %v6063_v1 = vmul.f32 %v2280_v62, %v5643_v21 }
 0x794   : > { %v2349_v53 = vpop.f32.mrb[12].mxu0 }
 0x795   : > { %v2473_v26 = vmul.f32 %v2349_v53, %v5646_v41  ;;  %v2351_v0 = vpop.f32.mrb[13].mxu0 }
 0x796   : > { %v2474_v34 = vmul.f32 %v2351_v0, %v5648_v27 }
 0x797   : > { %v2488_v43 = vadd.f32 %v2487_v24, %v2473_v26 }
 0x798   : > { %v2426_v8 = vpop.f32.mrb[12].mxu1  ;;  %v2355_v58 = vpop.f32.mrb[14].mxu0 }
 0x799   : > { %v2489_v48 = vadd.f32 %v2488_v43, %v2474_v34  ;;  %v2475_v10 = vmul.f32 %v2426_v8, %v5650_v57  ;;  %v2428_v23 = vpop.f32.mrb[13].mxu1  ;;  %v2357_v22 = vpop.f32.mrb[15].mxu0  ;;  %v6066_v30 = vmul.f32 %v2355_v58, %v5646_v41 }
 0x79a   : > { %v2476_v39 = vmul.f32 %v2428_v23, %v5653_v11  ;;  %v6072_v63 = vmul.f32 %v2357_v22, %v5648_v27 }
 0x79b   : > { %v2490_v35 = vadd.f32 %v2489_v48, %v2475_v10 }
 0x79c   : > { %v2432_v36 = vpop.f32.mrb[14].mxu1 }
 0x79d   : > { %v2491_v61 = vadd.f32 %v2490_v35, %v2476_v39  ;;  %v2434_v32 = vpop.f32.mrb[15].mxu1  ;;  %v6075_v42 = vmul.f32 %v2432_v36, %v5650_v57 }
 0x79e   : > { %v6080_v51 = vmul.f32 %v2434_v32, %v5653_v11 }
 0x79f   : > { %v2492_v17 = vadd.f32 %v2491_v61, %v2477_v37 }
 0x7a1   : > { %v2493_v45 = vadd.f32 %v2492_v17, %v2478_v49 }
 0x7a3   : > { %v2494_v9 = vadd.f32 %v2493_v45, %v6060_v7 }
 0x7a5   : > { %v2495_v56 = vadd.f32 %v2494_v9, %v6063_v1 }
 0x7a7   : > { %v2496_v44 = vadd.f32 %v2495_v56, %v6066_v30 }
 0x7a9   : > { %v2497_v54 = vadd.f32 %v2496_v44, %v6072_v63 }
 0x7ab   : > { %v2498_v33 = vadd.f32 %v2497_v54, %v6075_v42 }
 0x7ad   : > { %v2499_v4 = vadd.f32 %v2498_v33, %v6080_v51 }
 0x7af   : > { %2500 = vadd.xlane.f32.xlu1 %v2499_v4 }
 0x83c   : > { %v2501_v38 = vpop.xlane.xlu1 %2500 }
 0x83d   : > { %v2502_v2 = vrot.slane %v2501_v38, 4 }
 0x83f   : > { %v2503_v52 = vadd.f32 %v2502_v2, %v2501_v38 }
 0x841   : > { %v2504_v28 = vrot.slane %v2503_v52, 2 }
 0x843   : > { %v2505_v20 = vadd.f32 %v2504_v28, %v2503_v52 }
 0x845   : > { %v2506_v29 = vrot.slane %v2505_v20, 1 }
 0x847   : > { %v2507_v60 = vadd.f32 %v2506_v29, %v2505_v20 }
 0x849   : > { %3395 = vpush %v2507_v60 }
 0x87a   : > { %s3396_s2 = spop %3395 }
 0x87b   : > { %s2509_s12 = smul.f32 6.9444446e-05, %s3396_s2  ;;  %s4358_s2 = smov [#allocation16]  }
 0x87d   : > { %v2510_v16 = vstv %s2509_s12  ;;  %s4255_s12 = sshll.u32 %s4358_s2, 4  ;;  %s4256_s12 = int_to_ptr.vmem [resolvable:$false] %s4255_s12 }
 0x87e   : > { %v2511_v6 = vsub.f32 %v2469_v15, %v2510_v16  ;;  %v2512_v46 = vsub.f32 %v2470_v50, %v2510_v16  ;;  %v2513_v19 = vsub.f32 %v2471_v14, %v2510_v16  ;;  %v2514_v59 = vsub.f32 %v2472_v47, %v2510_v16  ;;  %p4258_p0 = scmp.lt.s32.totalorder %s6290_s10, %s4256_s12 }
 0x87f   : > { %v2515_v31 = vsub.f32 %v2473_v26, %v2510_v16  ;;  %v2516_v15 = vsub.f32 %v2474_v34, %v2510_v16  ;;  %v2517_v14 = vsub.f32 %v2475_v10, %v2510_v16  ;;  %v2518_v24 = vsub.f32 %v2476_v39, %v2510_v16 }
 0x880   : > { %v6084_v13 = vmul.f32 %v2511_v6, %v5634_v3  ;;  %v6087_v12 = vmul.f32 %v2512_v46, %v5636_v18  ;;  %v6090_v25 = vmul.f32 %v2513_v19, %v5640_v55  ;;  %v6097_v50 = vmul.f32 %v2514_v59, %v5643_v21 }
 0x881   : > { %v6100_v40 = vmul.f32 %v2515_v31, %v5646_v41  ;;  %v6105_v26 = vmul.f32 %v2516_v15, %v5648_v27  ;;  %v2519_v34 = vsub.f32 %v2477_v37, %v2510_v16  ;;  %v6110_v8 = vmul.f32 %v2517_v14, %v5650_v57 }
 0x882   : > { %v2543_v62 = vmul.f32 %v6084_v13, %v6084_v13  ;;  %v2544_v5 = vmul.f32 %v6087_v12, %v6087_v12  ;;  %v2545_v47 = vmul.f32 %v6090_v25, %v6090_v25  ;;  %v2546_v0 = vmul.f32 %v6097_v50, %v6097_v50 }
 0x883   : > { %v2547_v58 = vmul.f32 %v6100_v40, %v6100_v40  ;;  %v2520_v10 = vsub.f32 %v2478_v49, %v2510_v16  ;;  %v6115_v23 = vmul.f32 %v2518_v24, %v5653_v11  ;;  %v2548_v22 = vmul.f32 %v6105_v26, %v6105_v26 }
 0x884   : > { %v2559_v53 = vadd.f32 %v2544_v5, %v2543_v62  ;;  %v2521_v35 = vsub.f32 %v6060_v7, %v2510_v16  ;;  %v6121_v36 = vmul.f32 %v2519_v34, %v5634_v3  ;;  %v2549_v37 = vmul.f32 %v6110_v8, %v6110_v8  ;;  %v2439_v34 = vld [vmem:[#allocation13 + $0x10] sm:$0xff] }
 0x885   : > { %v2522_v32 = vsub.f32 %v6063_v1, %v2510_v16  ;;  %v6127_v49 = vmul.f32 %v2520_v10, %v5636_v18  ;;  %v2550_v17 = vmul.f32 %v6115_v23, %v6115_v23  ;;  %v2523_v9 = vsub.f32 %v6066_v30, %v2510_v16 }
 0x886   : > { %v2560_v43 = vadd.f32 %v2559_v53, %v2545_v47  ;;  %v6133_v7 = vmul.f32 %v2521_v35, %v5640_v55  ;;  %v2551_v3 = vmul.f32 %v6121_v36, %v6121_v36  ;;  %v2524_v44 = vsub.f32 %v6072_v63, %v2510_v16  ;;  %v2443_v35 = vld [vmem:[#allocation13 + $0x30] sm:$0xff] }
 0x887   : > { %v6139_v1 = vmul.f32 %v2522_v32, %v5643_v21  ;;  %v2552_v18 = vmul.f32 %v6127_v49, %v6127_v49  ;;  %v2525_v33 = vsub.f32 %v6075_v42, %v2510_v16  ;;  %v6145_v30 = vmul.f32 %v2523_v9, %v5646_v41  ;;  %v2453_v32 = vld [vmem:[#allocation14] sm:$0xff] }
 0x888   : > { %v2561_v48 = vadd.f32 %v2560_v43, %v2546_v0  ;;  %v2553_v55 = vmul.f32 %v6133_v7, %v6133_v7  ;;  %v2526_v38 = vsub.f32 %v6080_v51, %v2510_v16  ;;  %v6151_v63 = vmul.f32 %v2524_v44, %v5648_v27  ;;  %v2437_v0 = vld [vmem:[#allocation13] sm:$0xff]  ;;  %v2438_v43 = vld [vmem:[#allocation13 + $0x8] sm:$0xff] }
 0x889   : > { %v2554_v21 = vmul.f32 %v6139_v1, %v6139_v1  ;;  %v6156_v52 = vmul.f32 %v2525_v33, %v5650_v57  ;;  %v2555_v41 = vmul.f32 %v6145_v30, %v6145_v30  ;;  %v2445_v44 = vld [vmem:[#allocation13 + $0x40] sm:$0xff] }
 0x88a   : > { %v2562_v39 = vadd.f32 %v2561_v48, %v2547_v58  ;;  %v6161_v28 = vmul.f32 %v2526_v38, %v5653_v11  ;;  %v2556_v51 = vmul.f32 %v6151_v63, %v6151_v63  ;;  %v2440_v48 = vld [vmem:[#allocation13 + $0x18] sm:$0xff]  ;;  %v2458_v38 = vld [vmem:[#allocation14 + $0x28] sm:$0xff] }
 0x88b   : > { %v2557_v27 = vmul.f32 %v6156_v52, %v6156_v52 }
 0x88c   : > { %v2563_v61 = vadd.f32 %v2562_v39, %v2548_v22  ;;  %v2558_v60 = vmul.f32 %v6161_v28, %v6161_v28  ;;  %v2441_v22 = vld [vmem:[#allocation13 + $0x20] sm:$0xff]  ;;  %v2442_v39 = vld [vmem:[#allocation13 + $0x28] sm:$0xff] }
 0x88e   : > { %v2564_v45 = vadd.f32 %v2563_v61, %v2549_v37 }
 0x890   : > { %v2565_v56 = vadd.f32 %v2564_v45, %v2550_v17  ;;  %v2454_v17 = vld [vmem:[#allocation14 + $0x8] sm:$0xff]  ;;  %v2455_v45 = vld [vmem:[#allocation14 + $0x10] sm:$0xff] }
 0x892   : > { %v2566_v54 = vadd.f32 %v2565_v56, %v2551_v3  ;;  %v2456_v3 = vld [vmem:[#allocation14 + $0x18] sm:$0xff] }
 0x894   : > { %v2567_v4 = vadd.f32 %v2566_v54, %v2552_v18  ;;  %v2457_v18 = vld [vmem:[#allocation14 + $0x20] sm:$0xff] }
 0x896   : > { %v2568_v2 = vadd.f32 %v2567_v4, %v2553_v55  ;;  %v2446_v55 = vld [vmem:[#allocation13 + $0x48] sm:$0xff]  ;;  %v2447_v4 = vld [vmem:[#allocation13 + $0x50] sm:$0xff] }
 0x898   : > { %v2569_v42 = vadd.f32 %v2568_v2, %v2554_v21 }
 0x89a   : > { %v2570_v20 = vadd.f32 %v2569_v42, %v2555_v41 }
 0x89c   : > { %v2571_v29 = vadd.f32 %v2570_v20, %v2556_v51  ;;  %v2448_v20 = vld [vmem:[#allocation13 + $0x58] sm:$0xff] }
 0x89e   : > { %v2572_v57 = vadd.f32 %v2571_v29, %v2557_v27  ;;  %v2460_v27 = vld [vmem:[#allocation14 + $0x38] sm:$0xff] }
 0x8a0   : > { %v2573_v16 = vadd.f32 %v2572_v57, %v2558_v60 }
 0x8a2   : > { %2574 = vadd.xlane.f32.xlu0 %v2573_v16 }
 0x92f   : > { %v2575_v6 = vpop.xlane.xlu0 %2574 }
 0x930   : > { %v2576_v46 = vrot.slane %v2575_v6, 4 }
 0x932   : > { %v2577_v19 = vadd.f32 %v2576_v46, %v2575_v6  ;;  %v2450_v6 = vld [vmem:[#allocation13 + $0x68] sm:$0xff]  ;;  %v2461_v46 = vld [vmem:[#allocation14 + $0x40] sm:$0xff] }
 0x934   : > { %v2578_v59 = vrot.slane %v2577_v19, 2 }
 0x936   : > { %v2579_v11 = vadd.f32 %v2578_v59, %v2577_v19  ;;  %v2462_v19 = vld [vmem:[#allocation14 + $0x48] sm:$0xff] }
 0x938   : > { %v2580_v31 = vrot.slane %v2579_v11, 1 }
 0x93a   : > { %v2581_v62 = vadd.f32 %v2580_v31, %v2579_v11 }
 0x93c   : > { %3397 = vpush %v2581_v62 }
 0x96d   : > { %s3398_s6 = spop %3397 }
 0x96e   : > { %s2583_s28 = smul.f32 6.9444446e-05, %s3398_s6  ;;  %s4257_s6 = scalar_lea.vmem %s4256_s12, 4096 }
 0x96f   : > { %p4259_p6 = scmp.lt.s32.totalorder %s4257_s6, %s4251_s22 }
 0x970   : > { %s2584_s3 = sadd.f32 1e-05, %s2583_s28 }
 0x971   : > { %p4260_p11 = por %p4259_p6, %p4258_p0 }
 0x972   : > { %v2585_v5 = vstv %s2584_s3 }
 0x973   : > { %3989 = vrsqrt.f32 %v2585_v5  ;;  %p4261_p8 = pnand %p4260_p11, %p4254_p7 }
 0x97d   : > { %v3990_v15 = vpop.eup %3989 }
 0x97e   : > { %3399 = vpush %v3990_v15  ;;  %v2451_v15 = vld [vmem:[#allocation13 + $0x70] sm:$0xff] }
 0x9af   : > { %s3400_s25 = spop %3399 }
 0x9b0   : > { %v6169_v14 = vstv %s3400_s25 }
 0x9b1   : > { %v2589_v47 = vmul.f32 %v6169_v14, %v6084_v13  ;;  %v2590_v53 = vmul.f32 %v6169_v14, %v6087_v12  ;;  %v2591_v24 = vmul.f32 %v6169_v14, %v6090_v25  ;;  %v2592_v58 = vmul.f32 %v6169_v14, %v6097_v50 }
 0x9b2   : > { %v2593_v10 = vmul.f32 %v6169_v14, %v6100_v40  ;;  %v2594_v13 = vmul.f32 %v6169_v14, %v6105_v26  ;;  %v2595_v12 = vmul.f32 %v6169_v14, %v6110_v8  ;;  %v2596_v50 = vmul.f32 %v6169_v14, %v6115_v23  ;;  %v2444_v40 = vld [vmem:[#allocation13 + $0x38] sm:$0xff] }
 0x9b3   : > { %v2605_v25 = vmul.f32 %v2589_v47, %v2437_v0  ;;  %v2606_v37 = vmul.f32 %v2590_v53, %v2438_v43  ;;  %v2607_v61 = vmul.f32 %v2591_v24, %v2439_v34  ;;  %v2608_v9 = vmul.f32 %v2592_v58, %v2440_v48  ;;  %v2463_v47 = vld [vmem:[#allocation14 + $0x50] sm:$0xff]  ;;  %v2452_v43 = vld [vmem:[#allocation13 + $0x78] sm:$0xff] }
 0x9b4   : > { %v2597_v26 = vmul.f32 %v6169_v14, %v6121_v36  ;;  %v2609_v56 = vmul.f32 %v2593_v10, %v2441_v22  ;;  %v2598_v8 = vmul.f32 %v6169_v14, %v6127_v49  ;;  %v2599_v54 = vmul.f32 %v6169_v14, %v6133_v7  ;;  %v2459_v36 = vld [vmem:[#allocation14 + $0x30] sm:$0xff]  ;;  %v2449_v7 = vld [vmem:[#allocation13 + $0x60] sm:$0xff]  ;;  %v2464_v34 = vld [vmem:[#allocation14 + $0x58] sm:$0xff] }
 0x9b5   : > { %v2610_v33 = vmul.f32 %v2594_v13, %v2442_v39  ;;  %v2611_v23 = vmul.f32 %v2595_v12, %v2443_v35  ;;  %v6193_v21 = vadd.f32 %v2605_v25, %v2453_v32  ;;  %v6195_v2 = vadd.f32 %v2606_v37, %v2454_v17  ;;  %v2465_v22 = vld [vmem:[#allocation14 + $0x60] sm:$0xff]  ;;  %v2467_v37 = vld [vmem:[#allocation14 + $0x70] sm:$0xff] }
 0x9b6   : > { %v6197_v41 = vadd.f32 %v2607_v61, %v2455_v45  ;;  %v2600_v42 = vmul.f32 %v6169_v14, %v6139_v1  ;;  %v2612_v51 = vmul.f32 %v2596_v50, %v2444_v40  ;;  %v6201_v49 = vadd.f32 %v2608_v9, %v2456_v3  ;;  %v2468_v45 = vld [vmem:[#allocation14 + $0x78] sm:$0xff] }
 0x9b7   : > { %v2601_v29 = vmul.f32 %v6169_v14, %v6145_v30  ;;  %v2602_v60 = vmul.f32 %v6169_v14, %v6151_v63  ;;  %v2613_v57 = vmul.f32 %v2597_v26, %v2445_v44  ;;  %v6207_v16 = vadd.f32 %v2609_v56, %v2457_v18 }
 0x9b8   : > { %v2603_v1 = vmul.f32 %v6169_v14, %v6156_v52  ;;  %v2614_v59 = vmul.f32 %v2598_v8, %v2446_v55  ;;  %v2615_v11 = vmul.f32 %v2599_v54, %v2447_v4  ;;  %v6211_v31 = vadd.f32 %v2610_v33, %v2458_v38 }
 0x9b9   : > { %v6213_v62 = vadd.f32 %v2611_v23, %v2459_v36  ;;  %v2653_v30 = vmul.f32 0.70710677, %v6193_v21  ;;  %v2654_v5 = vmul.f32 0.70710677, %v6195_v2  ;;  %v2655_v63 = vmul.f32 0.70710677, %v6197_v41 }
 0x9ba   : > { %v2604_v53 = vmul.f32 %v6169_v14, %v6161_v28  ;;  %v2616_v24 = vmul.f32 %v2600_v42, %v2448_v20  ;;  %v6220_v0 = vadd.f32 %v2612_v51, %v2460_v27  ;;  %v2656_v52 = vmul.f32 0.70710677, %v6201_v49  ;;  %v2466_v28 = vld [vmem:[#allocation14 + $0x68] sm:$0xff] }
 0x9bb   : > { %v2617_v58 = vmul.f32 %v2601_v29, %v2449_v7  ;;  %v6223_v48 = vadd.f32 %v2613_v57, %v2461_v46  ;;  %v2657_v10 = vmul.f32 0.70710677, %v6207_v16  ;;  %3991 = verf.f32 %v2653_v30 }
 0x9bc   : > { %v2618_v13 = vmul.f32 %v2602_v60, %v2450_v6  ;;  %v6226_v39 = vadd.f32 %v2614_v59, %v2462_v19  ;;  %v2658_v35 = vmul.f32 0.70710677, %v6211_v31  ;;  %3993 = verf.f32 %v2654_v5 }
 0x9bd   : > { %v2619_v14 = vmul.f32 %v2603_v1, %v2451_v15  ;;  %v6229_v12 = vadd.f32 %v2615_v11, %v2463_v47  ;;  %v2659_v25 = vmul.f32 0.70710677, %v6213_v62  ;;  %3995 = verf.f32 %v2655_v63 }
 0x9be   : > { %v2620_v61 = vmul.f32 %v2604_v53, %v2452_v43  ;;  %v6232_v32 = vadd.f32 %v2616_v24, %v2464_v34  ;;  %v2660_v17 = vmul.f32 0.70710677, %v6220_v0  ;;  %3997 = verf.f32 %v2656_v52 }
 0x9bf   : > { %v6235_v50 = vadd.f32 %v2617_v58, %v2465_v22  ;;  %v2661_v9 = vmul.f32 0.70710677, %v6223_v48  ;;  %3999 = verf.f32 %v2657_v10  ;;  %v6238_v40 = vadd.f32 %v2618_v13, %v2466_v28 }
 0x9c0   : > { %v2662_v3 = vmul.f32 0.70710677, %v6226_v39  ;;  %4001 = verf.f32 %v2658_v35  ;;  %v6241_v26 = vadd.f32 %v2619_v14, %v2467_v37  ;;  %v2663_v56 = vmul.f32 0.70710677, %v6229_v12 }
 0x9c1   : > { %4003 = verf.f32 %v2659_v25  ;;  %v6244_v44 = vadd.f32 %v2620_v61, %v2468_v45  ;;  %v2664_v18 = vmul.f32 0.70710677, %v6232_v32  ;;  %v2665_v8 = vmul.f32 0.70710677, %v6235_v50 }
 0x9c2   : > { %4005 = verf.f32 %v2660_v17  ;;  %v2666_v54 = vmul.f32 0.70710677, %v6238_v40  ;;  %v2667_v55 = vmul.f32 0.70710677, %v6241_v26  ;;  %v2637_v38 = vmul.f32 0.5, %v6193_v21 }
 0x9c3   : > { %4007 = verf.f32 %v2661_v9  ;;  %v2668_v23 = vmul.f32 0.70710677, %v6244_v44  ;;  %v2638_v51 = vmul.f32 0.5, %v6195_v2  ;;  %v2639_v27 = vmul.f32 0.5, %v6197_v41 }
 0x9c4   : > { %4009 = verf.f32 %v2662_v3  ;;  %v2640_v6 = vmul.f32 0.5, %v6201_v49  ;;  %v2641_v1 = vmul.f32 0.5, %v6207_v16  ;;  %v2642_v11 = vmul.f32 0.5, %v6211_v31 }
 0x9c5   : > { %v3992_v33 = vpop.eup %3991  ;;  %4011 = verf.f32 %v2663_v56  ;;  %v2643_v16 = vmul.f32 0.5, %v6213_v62  ;;  %v2644_v53 = vmul.f32 0.5, %v6220_v0  ;;  %v2645_v31 = vmul.f32 0.5, %v6223_v48 }
 0x9c6   : > { %v3994_v4 = vpop.eup %3993  ;;  %4013 = verf.f32 %v2664_v18  ;;  %v2685_v36 = vadd.f32 1.0, %v3992_v33  ;;  %v2646_v62 = vmul.f32 0.5, %v6226_v39  ;;  %v2647_v0 = vmul.f32 0.5, %v6229_v12 }
 0x9c7   : > { %v3996_v42 = vpop.eup %3995  ;;  %4015 = verf.f32 %v2665_v8  ;;  %v2686_v20 = vadd.f32 1.0, %v3994_v4  ;;  %v2648_v25 = vmul.f32 0.5, %v6232_v32  ;;  %v2649_v17 = vmul.f32 0.5, %v6235_v50 }
 0x9c8   : > { %v3998_v7 = vpop.eup %3997  ;;  %4017 = verf.f32 %v2666_v54  ;;  %v2687_v29 = vadd.f32 1.0, %v3996_v42  ;;  %v2701_v60 = vmul.f32 %v2685_v36, %v2637_v38  ;;  %v2650_v3 = vmul.f32 0.5, %v6238_v40 }
 0x9c9   : > { %v4000_v57 = vpop.eup %3999  ;;  %4019 = verf.f32 %v2667_v55  ;;  %v2688_v21 = vadd.f32 1.0, %v3998_v7  ;;  %v2702_v46 = vmul.f32 %v2686_v20, %v2638_v51  ;;  %v2651_v8 = vmul.f32 0.5, %v6241_v26 }
 0x9ca   : > { %v4002_v19 = vpop.eup %4001  ;;  %4021 = verf.f32 %v2668_v23  ;;  %v2689_v59 = vadd.f32 1.0, %v4000_v57  ;;  %v2703_v2 = vmul.f32 %v2687_v29, %v2639_v27  ;;  %2717 = vst [vmem:[%s6257_s0] sm:$0xff] %v2701_v60  ;;  %v2652_v33 = vmul.f32 0.5, %v6244_v44 }
 0x9cb   : > { %v4004_v41 = vpop.eup %4003  ;;  %v2690_v49 = vadd.f32 1.0, %v4002_v19  ;;  %v2704_v30 = vmul.f32 %v2688_v21, %v2640_v6  ;;  %2718 = vst [vmem:[%s6257_s0 + $0x8] sm:$0xff] %v2702_v46 }
 0x9cc   : > { %v4006_v5 = vpop.eup %4005  ;;  %v2691_v63 = vadd.f32 1.0, %v4004_v41  ;;  %v2705_v15 = vmul.f32 %v2689_v59, %v2641_v1  ;;  %2719 = vst [vmem:[%s6257_s0 + $0x10] sm:$0xff] %v2703_v2 }
 0x9cd   : > { %v4008_v47 = vpop.eup %4007  ;;  %v2692_v24 = vadd.f32 1.0, %v4006_v5  ;;  %v2706_v52 = vmul.f32 %v2690_v49, %v2642_v11  ;;  %2720 = vst [vmem:[%s6257_s0 + $0x18] sm:$0xff] %v2704_v30 }
 0x9ce   : > { %v4010_v43 = vpop.eup %4009  ;;  %v2693_v34 = vadd.f32 1.0, %v4008_v47  ;;  %v2707_v58 = vmul.f32 %v2691_v63, %v2643_v16  ;;  %2721 = vst [vmem:[%s6257_s0 + $0x20] sm:$0xff] %v2705_v15 }
 0x9cf   : > { %v4012_v10 = vpop.eup %4011  ;;  %v2694_v22 = vadd.f32 1.0, %v4010_v43  ;;  %v2708_v13 = vmul.f32 %v2692_v24, %v2644_v53  ;;  %2722 = vst [vmem:[%s6257_s0 + $0x28] sm:$0xff] %v2706_v52 }
 0x9d0   : > { %v4014_v35 = vpop.eup %4013  ;;  %v2695_v28 = vadd.f32 1.0, %v4012_v10  ;;  %v2709_v14 = vmul.f32 %v2693_v34, %v2645_v31  ;;  %2723 = vst [vmem:[%s6257_s0 + $0x30] sm:$0xff] %v2707_v58 }
 0x9d1   : > { %v4016_v48 = vpop.eup %4015  ;;  %v2696_v37 = vadd.f32 1.0, %v4014_v35  ;;  %v2710_v61 = vmul.f32 %v2694_v22, %v2646_v62  ;;  %2724 = vst [vmem:[%s6257_s0 + $0x38] sm:$0xff] %v2708_v13 }
 0x9d2   : > { %v4018_v39 = vpop.eup %4017  ;;  %v2697_v45 = vadd.f32 1.0, %v4016_v48  ;;  %v2711_v9 = vmul.f32 %v2695_v28, %v2647_v0  ;;  %2725 = vst [vmem:[%s6257_s0 + $0x40] sm:$0xff] %v2709_v14 }
 0x9d3   : > { %v4020_v12 = vpop.eup %4019  ;;  %v2698_v56 = vadd.f32 1.0, %v4018_v39  ;;  %v2712_v18 = vmul.f32 %v2696_v37, %v2648_v25  ;;  %2726 = vst [vmem:[%s6257_s0 + $0x48] sm:$0xff] %v2710_v61 }
 0x9d4   : > { %v4022_v32 = vpop.eup %4021  ;;  %v2699_v50 = vadd.f32 1.0, %v4020_v12  ;;  %v2713_v54 = vmul.f32 %v2697_v45, %v2649_v17  ;;  %2727 = vst [vmem:[%s6257_s0 + $0x50] sm:$0xff] %v2711_v9 }
 0x9d5   : > { %v2700_v40 = vadd.f32 1.0, %v4022_v32  ;;  %v2714_v55 = vmul.f32 %v2698_v56, %v2650_v3  ;;  %2728 = vst [vmem:[%s6257_s0 + $0x58] sm:$0xff] %v2712_v18 }
 0x9d6   : > { %v2715_v4 = vmul.f32 %v2699_v50, %v2651_v8  ;;  %2729 = vst [vmem:[%s6257_s0 + $0x60] sm:$0xff] %v2713_v54 }
 0x9d7   : > { %v2716_v26 = vmul.f32 %v2700_v40, %v2652_v33  ;;  %2730 = vst [vmem:[%s6257_s0 + $0x68] sm:$0xff] %v2714_v55 }
 0x9d8   : > { %2731 = vst [vmem:[%s6257_s0 + $0x70] sm:$0xff] %v2715_v4 }
 0x9d9   : > { %2732 = vst [vmem:[%s6257_s0 + $0x78] sm:$0xff] %v2716_v26 }
 0x9da   : > { %4264 = shalt.err (!%p4261_p8)
}
 0x9db   : > { %s4265_s28 = scalar_lea.hbm %s6288_s29, 2048  ;;  %s4269_s23 = scalar_lea.hbm %s6457_s26, 4096 }
 0x9dc   : > { %p4266_p9 = scmp.ne.s32.totalorder %s6288_s29, %s4265_s28  ;;  %p4270_p1 = scmp.lt.u32.totalorder %s6288_s29, %s6457_s26 }
 0x9dd   : > { %p4271_p3 = scmp.lt.u32.totalorder %s4269_s23, %s4265_s28  ;;  %p4273_p4 = scmp.lt.u32.totalorder %s4265_s28, %s6288_s29 }
 0x9de   : > { %p4267_p12 = pnand %p4266_p9, %p6458_p10 }
 0x9df   : > { %p4272_p2 = por %p4271_p3, %p4270_p1 }
 0x9e0   : > { %p4268_p13 = pneg %p4267_p12 }
 0x9e1   : > { %p4274_p5 = por %p4273_p4, %p4272_p2 }
 0x9e3   : > { %p4275_p7 = pnand %p4274_p5, %p4268_p13 }
 0x9e5   : > { %4278 = shalt.err (!%p4275_p7)
}
 0x9e6   : > { %s4359_s19 = smov 1024   ;;  %s4360_s21 = smov 64  }
 0x9e7   : > { %3429 = dma.vmem_to_hbm [thread:$0]  (%p6458_p10), %s6290_s10, 2048, %s6288_s29, %s2734_s27, %s4359_s19, %s4359_s19, %s4360_s21  }
 0x9e8 PF: > { %s2762_s22 = sand.u32 1, %s4325_s13   ;;  %p6459_p0 = scmp.ne.s32.totalorder %s6404_s17, 0 }
 0x9e9   : > { %p6460_p6 = scmp.ge.s32.totalorder %s4337_s16, 2  ;;  %s2763_s2 = scalar_lea.sflag [#allocation4], %s2762_s22 }
 0x9eb   : > { %p3458_p11 = pnand %p6460_p6, %p6459_p0 }
 0x9ed   : > { %4320 = dma.done.wait (!%p3458_p11), %s2763_s2, 2048  }
 0x9ee   : > { %4322 = vsyncadd (!%p3458_p11), %s2763_s2, 4294965248  ;;  %p29_p8 = scmp.ge.s32.totalorder %s4601_s11, 4   ;;  %s6461_s13 = smov %s4329_s14 }
 0x9ef   : > { %s6462_s14 = smov %s4333_s15  ;;  %s6463_s15 = smov %s4612_s30 }
 0x9f0   : > { %s6464_s16 = smov %s4601_s11  ;;  %31 = sbr.rel (!%p29_p8) target bundleno = 17 (0x11), region = 142 }
 0x9f7   :  { %2768 = vsyncpa [#allocation3], 1 }
 0x9f8   :  { %2770 = vsyncpa [#allocation3 + $0x1], 1 }
 0x9f9   :  { %2771 = vsyncpa [#allocation6], 1 }
 0x9fa   :  { %2773 = vsyncpa [#allocation6 + $0x1], 1 }
 0x9fb   :  { %2774 = vsyncpa [#allocation9], 1 }
 0x9fc   :  { %2775 = vsyncpa [#allocation12], 1 }
 0x9fd   :  { %2776 = vsyncpa [#allocation15], 1 }
 0x9fe   :  { %2777 = vsyncpa [#allocation4], 1 }
 0x9ff   :  { %2779 = vsyncpa [#allocation4 + $0x1], 1 }

</bundles_post_ra>
